<compile_context>
chip_gen: v7x
topology: tpu7x:2x2x1
jax: 0.10.0
libtpu: 0.0.40
codegen_flags: <defaults>
</compile_context>

<pallas_src>
import functools

import jax
import jax.numpy as jnp
from jax import lax
from jax.experimental import pallas as pl
from jax.experimental.pallas import tpu as pltpu

EPS = 1e-5
_MIB = 1024 * 1024

# --------------------------------------------------------------------------- #
# Compile-only capability probe: can Mosaic concatenate `n` c-wide slabs on   #
# the lane axis (needed for the folded conv)?  Tiny kernel, AOT-compiled,     #
# keyed per (c, n, dtype): cannot be mis-classified by unrelated failures.    #
# --------------------------------------------------------------------------- #
_CONCAT_OK = {}


def _concat_ok(c, n, mm_dtype):
    key = (int(c), int(n), jnp.dtype(mm_dtype).name)
    if key not in _CONCAT_OK:
        def probe_kernel(*refs):
            *in_refs, w_ref, o_ref = refs
            patch = jnp.concatenate([r[...] for r in in_refs], axis=-1)
            o_ref[...] = jnp.dot(patch, w_ref[...],
                                 preferred_element_type=jnp.float32)

        vmem = pl.BlockSpec(memory_space=pltpu.MemorySpace.VMEM)
        fn = pl.pallas_call(
            probe_kernel,
            out_shape=jax.ShapeDtypeStruct((256, 128), jnp.float32),
            in_specs=[vmem] * (n + 1), out_specs=vmem)
        args = ([jnp.zeros((256, c), mm_dtype) for _ in range(n)]
                + [jnp.zeros((n * c, 128), mm_dtype)])
        try:
            jax.jit(fn).lower(*args).compile()
            _CONCAT_OK[key] = True
        except Exception:
            _CONCAT_OK[key] = False
    return _CONCAT_OK[key]


def _pick_fold(cin, mm_dtype):
    """2: one matmul per conv (K=9*cin), 1: kx folded (K=3*cin), 0: 9 matmuls."""
    if 9 * cin <= 256 and _concat_ok(cin, 9, mm_dtype):
        return 2
    if _concat_ok(cin, 3, mm_dtype):
        return 1
    return 0


# --------------------------------------------------------------------------- #
# In-kernel helpers                                                            #
# --------------------------------------------------------------------------- #
def _zero_halo(pad_ref, n, h, w, c):
    """Zero only the 4 border strips of a (n, h+2, w+2, c) padded scratch."""
    z = functools.partial(jnp.zeros, dtype=pad_ref.dtype)
    pad_ref[:, 0:1, :, :] = z((n, 1, w + 2, c))
    pad_ref[:, h + 1:h + 2, :, :] = z((n, 1, w + 2, c))
    pad_ref[:, :, 0:1, :] = z((n, h + 2, 1, c))
    pad_ref[:, :, w + 1:w + 2, :] = z((n, h + 2, 1, c))


def _conv3x3_from_padded_ref(xpad_ref, w_ref, n, h_out, w_out, stride, cin,
                             cout, mm_dtype, fold):
    """3x3 conv; each tap is a ref-window slice (no full padded-buffer load).

    Returns (acc, center_tap): acc is (n*h_out*w_out, cout) float32, and
    center_tap (== strided x) is reused as the 1x1-shortcut matmul operand.
    """
    rows = n * h_out * w_out

    def tap(ky, kx):
        if stride == 1:
            v = xpad_ref[:, ky:ky + h_out, kx:kx + w_out, :]
        else:
            # stride > 1 path (not exercised by the small test configs):
            # contiguous ref window, then value-level strided slice.
            sh = stride * (h_out - 1) + 1
            sw = stride * (w_out - 1) + 1
            v = lax.slice(xpad_ref[:, ky:ky + sh, kx:kx + sw, :],
                          (0, 0, 0, 0), (n, sh, sw, cin),
                          (1, stride, stride, 1))
        return v.reshape(rows, cin).astype(mm_dtype)

    center = tap(1, 1)

    def t(ky, kx):
        return center if (ky, kx) == (1, 1) else tap(ky, kx)

    if fold == 2:                                     # 1 MXU push, K = 9*cin
        patch = jnp.concatenate(
            [t(ky, kx) for ky in range(3) for kx in range(3)], axis=-1)
        acc = jnp.dot(patch, w_ref[...], preferred_element_type=jnp.float32)
    elif fold == 1:                                   # 3 pushes, K = 3*cin
        acc = jnp.zeros((rows, cout), jnp.float32)
        for ky in range(3):
            patch = jnp.concatenate([t(ky, 0), t(ky, 1), t(ky, 2)], axis=-1)
            acc = acc + jnp.dot(patch, w_ref[ky],
                                preferred_element_type=jnp.float32)
    else:                                             # 9 pushes, K = cin
        acc = jnp.zeros((rows, cout), jnp.float32)
        for ky in range(3):
            for kx in range(3):
                acc = acc + jnp.dot(t(ky, kx), w_ref[ky, kx],
                                    preferred_element_type=jnp.float32)
    return acc, center


def _tile_stats(v, rows):
    """Per-tile (mean, centered sum of squares) -- avoids E[x^2]-mean^2."""
    mu = jnp.sum(v, axis=0, keepdims=True) * (1.0 / rows)
    d = v - mu
    m2 = jnp.sum(d * d, axis=0, keepdims=True)
    return jnp.concatenate([mu, m2], axis=0)          # (2, C) float32


# --------------------------------------------------------------------------- #
# Stage kernels                                                                #
# --------------------------------------------------------------------------- #
def _stage1_kernel(*refs, tile_n, H, W, cin, planes, stride, has_sc, mm_dtype,
                   fold):
    if has_sc:
        (x_ref, w1_ref, ws_ref, c1_ref, st1_ref, sc_ref, sts_ref,
         xpad_ref) = refs
    else:
        x_ref, w1_ref, c1_ref, st1_ref, xpad_ref = refs
    h_out = (H - 1) // stride + 1
    w_out = (W - 1) // stride + 1
    rows = tile_n * h_out * w_out

    # Halo re-zeroed every grid step: cheap (4 thin strips) and safe under
    # megacore "parallel" partitioning (no reliance on program_id == 0).
    _zero_halo(xpad_ref, tile_n, H, W, cin)
    xpad_ref[:, 1:H + 1, 1:W + 1, :] = x_ref[...].astype(xpad_ref.dtype)

    acc, center = _conv3x3_from_padded_ref(xpad_ref, w1_ref, tile_n, h_out,
                                           w_out, stride, cin, planes,
                                           mm_dtype, fold)
    st1_ref[...] = _tile_stats(acc, rows).reshape(1, 2, planes)
    c1_ref[...] = acc.astype(c1_ref.dtype)

    if has_sc:
        # 1x1 shortcut conv reuses the conv1 centre tap (== strided x).
        sc = jnp.dot(center, ws_ref[...], preferred_element_type=jnp.float32)
        sts_ref[...] = _tile_stats(sc, rows).reshape(1, 2, planes)
        sc_ref[...] = sc.astype(sc_ref.dtype)


def _stage2_kernel(c1_ref, s1_ref, h1_ref, w2_ref, c2_ref, st2_ref, opad_ref,
                   *, tile_n, h_out, w_out, planes, mm_dtype, fold):
    rows = tile_n * h_out * w_out
    _zero_halo(opad_ref, tile_n, h_out, w_out, planes)

    o1 = jnp.maximum(
        c1_ref[...].astype(jnp.float32) * s1_ref[...] + h1_ref[...], 0.0)
    opad_ref[:, 1:h_out + 1, 1:w_out + 1, :] = (
        o1.astype(opad_ref.dtype).reshape(tile_n, h_out, w_out, planes))

    acc, _ = _conv3x3_from_padded_ref(opad_ref, w2_ref, tile_n, h_out, w_out,
                                      1, planes, planes, mm_dtype, fold)
    st2_ref[...] = _tile_stats(acc, rows).reshape(1, 2, planes)
    c2_ref[...] = acc.astype(c2_ref.dtype)


def _stage3_kernel(*refs, has_sc):
    # Purely elementwise; every operand is lane-dense (last dim = W_out*C).
    if has_sc:
        c2_ref, s2_ref, h2_ref, sc_ref, ss_ref, hs_ref, out_ref = refs
        shortcut = sc_ref[...].astype(jnp.float32) * ss_ref[...] + hs_ref[...]
    else:
        c2_ref, s2_ref, h2_ref, xid_ref, out_ref = refs
        shortcut = xid_ref[...].astype(jnp.float32)   # identity kept at f32
    main = c2_ref[...].astype(jnp.float32) * s2_ref[...] + h2_ref[...]
    out_ref[...] = jnp.maximum(main + shortcut, 0.0).astype(out_ref.dtype)


# --------------------------------------------------------------------------- #
# Wrapper-side sizing / statistics glue                                        #
# --------------------------------------------------------------------------- #
def _vmem_budget_bytes():
    try:
        cap = int(getattr(pltpu.get_tpu_info(), "vmem_capacity_bytes",
                          64 * _MIB))
    except Exception:
        cap = 64 * _MIB
    # Headroom for double-buffering + compiler scratch:
    # v7x (64 MiB) -> ~52 MiB, v5e/v6e (128 MiB) -> ~112 MiB.
    return cap - max(cap // 8, 12 * _MIB)


def _padded_bytes(shape, dtype):
    """Conservative VMEM footprint: lane dim padded to 128, sublane to 8."""
    dims = list(shape)
    dims[-1] = -(-dims[-1] // 128) * 128
    if len(dims) >= 2:
        dims[-2] = -(-dims[-2] // 8) * 8
    n = 1
    for d in dims:
        n *= d
    return n * jnp.dtype(dtype).itemsize


def _tile_bytes(t, H, W, cin, h_out, w_out, planes, has_sc, mm_dtype):
    rows = t * h_out * w_out
    conv_rt = (_padded_bytes((rows, 9 * max(cin, planes)), mm_dtype)
               + 3 * _padded_bytes((rows, planes), jnp.float32))
    s1 = (2 * _padded_bytes((t, H, W, cin), mm_dtype)
          + _padded_bytes((t, H + 2, W + 2, cin), mm_dtype)
          + (4 if has_sc else 2) * _padded_bytes((rows, planes), mm_dtype)
          + conv_rt)
    s2 = (2 * _padded_bytes((rows, planes), mm_dtype)
          + _padded_bytes((t, h_out + 2, w_out + 2, planes), mm_dtype)
          + 2 * _padded_bytes((rows, planes), mm_dtype)
          + conv_rt)
    s3 = ((6 if has_sc else 4)
          * _padded_bytes((t * h_out, w_out * planes), jnp.float32))
    return max(s1, s2, s3) + 2 * _MIB


def _pick_tile_n(N, H, W, cin, h_out, w_out, planes, has_sc, mm_dtype, budget):
    divisors = [d for d in range(N, 0, -1) if N % d == 0]
    for t in divisors:
        if t != N and ((t * h_out) % 8 != 0 or (t * h_out * w_out) % 8 != 0):
            continue
        if _tile_bytes(t, H, W, cin, h_out, w_out, planes, has_sc,
                       mm_dtype) <= budget:
            return t
    return divisors[-1]


def _bn_scale_shift(stats, gamma, beta, rows_per_tile):
    """Combine per-tile (mean, M2) partials (Chan) -> BN scale/shift rows."""
    mu_t = stats[:, 0, :].astype(jnp.float32)
    m2_t = stats[:, 1, :].astype(jnp.float32)
    num_tiles = stats.shape[0]
    mean = jnp.mean(mu_t, axis=0)
    m2 = jnp.sum(m2_t, axis=0) + rows_per_tile * jnp.sum(
        jnp.square(mu_t - mean), axis=0)
    var = m2 / (rows_per_tile * num_tiles)            # biased (BN training)
    scale = gamma.astype(jnp.float32) * lax.rsqrt(var + EPS)
    shift = beta.astype(jnp.float32) - mean * scale
    return scale.reshape(1, -1), shift.reshape(1, -1)


def _prep_w3x3(w_oihw, fold, mm_dtype):
    cout, cin = int(w_oihw.shape[0]), int(w_oihw.shape[1])
    w = jnp.transpose(w_oihw, (2, 3, 1, 0))           # (ky, kx, cin, cout)
    if fold == 2:
        w = w.reshape(9 * cin, cout)
    elif fold == 1:
        w = w.reshape(3, 3 * cin, cout)
    return w.astype(mm_dtype)


# --------------------------------------------------------------------------- #
# Forward                                                                      #
# --------------------------------------------------------------------------- #
def basic_block_forward_nhwc(x, params, stride, *, mm_dtype=jnp.bfloat16,
                             out_dtype=None, fold=None, tile_n=None):
    """BasicBlock forward, NHWC in/out.  mm_dtype = MXU / intermediate dtype."""
    N, H, W, cin = map(int, x.shape)
    planes = int(params["w1"].shape[0])
    h_out = (H - 1) // stride + 1
    w_out = (W - 1) // stride + 1
    has_sc = (stride != 1) or (cin != planes)
    mm_dtype = jnp.dtype(mm_dtype)
    idt = mm_dtype                                     # intermediate HBM dtype
    if out_dtype is None:
        out_dtype = (jnp.float32 if mm_dtype == jnp.dtype(jnp.float32)
                     else mm_dtype)

    fold1 = _pick_fold(cin, mm_dtype) if fold is None else fold
    fold2 = _pick_fold(planes, mm_dtype) if fold is None else fold

    budget = _vmem_budget_bytes()
    if tile_n is None:
        tile_n = _pick_tile_n(N, H, W, cin, h_out, w_out, planes, has_sc,
                              mm_dtype, budget)
    assert N % tile_n == 0, (N, tile_n)
    num_tiles = N // tile_n
    rows_t = tile_n * h_out * w_out
    rows_total = N * h_out * w_out
    vmem_limit = int(min(max(budget, 32 * _MIB), 128 * _MIB))

    w1 = _prep_w3x3(params["w1"], fold1, mm_dtype)
    w2 = _prep_w3x3(params["w2"], fold2, mm_dtype)

    cparams = pltpu.CompilerParams(dimension_semantics=("parallel",),
                                   vmem_limit_bytes=vmem_limit)

    def bcast_spec(shape):
        zeros = (0,) * len(shape)
        return pl.BlockSpec(tuple(int(s) for s in shape), lambda i: zeros)

    raw_spec = pl.BlockSpec((rows_t, planes), lambda i: (i, 0))
    stats_spec = pl.BlockSpec((1, 2, planes), lambda i: (i, 0, 0))
    raw_shape = jax.ShapeDtypeStruct((rows_total, planes), idt)
    stats_shape = jax.ShapeDtypeStruct((num_tiles, 2, planes), jnp.float32)

    # ---- stage 1: conv1 (+ 1x1 shortcut conv) + per-tile stats --------------
    x_mm = x.astype(mm_dtype)
    in1 = [x_mm, w1]
    in1_specs = [pl.BlockSpec((tile_n, H, W, cin), lambda i: (i, 0, 0, 0)),
                 bcast_spec(w1.shape)]
    out1_shape = [raw_shape, stats_shape]
    out1_specs = [raw_spec, stats_spec]
    if has_sc:
        ws = jnp.transpose(params["ws"][:, :, 0, 0]).astype(mm_dtype)
        in1.append(ws)
        in1_specs.append(bcast_spec(ws.shape))
        out1_shape += [raw_shape, stats_shape]
        out1_specs += [raw_spec, stats_spec]

    flops1 = 2 * rows_total * 9 * cin * planes
    if has_sc:
        flops1 += 2 * rows_total * cin * planes
    cost1 = pl.CostEstimate(
        flops=int(flops1), transcendentals=0,
        bytes_accessed=int(N * H * W * cin * mm_dtype.itemsize
                           + (2 if has_sc else 1) * rows_total * planes
                           * idt.itemsize))

    res1 = pl.pallas_call(
        functools.partial(_stage1_kernel, tile_n=tile_n, H=H, W=W, cin=cin,
                          planes=planes, stride=stride, has_sc=has_sc,
                          mm_dtype=mm_dtype, fold=fold1),
        grid=(num_tiles,),
        out_shape=tuple(out1_shape),
        in_specs=in1_specs,
        out_specs=tuple(out1_specs),
        scratch_shapes=[pltpu.VMEM((tile_n, H + 2, W + 2, cin), mm_dtype)],
        compiler_params=cparams,
        cost_estimate=cost1,
    )(*in1)
    if has_sc:
        c1, st1, sc_raw, st_s = res1
    else:
        c1, st1 = res1

    scale1, shift1 = _bn_scale_shift(st1, params["g1"], params["b1"], rows_t)

    # ---- stage 2: bn1 + relu + conv2 + per-tile stats ------------------------
    vec_p = pl.BlockSpec((1, planes), lambda i: (0, 0))
    cost2 = pl.CostEstimate(
        flops=int(2 * rows_total * 9 * planes * planes), transcendentals=0,
        bytes_accessed=int(2 * rows_total * planes * idt.itemsize))
    c2, st2 = pl.pallas_call(
        functools.partial(_stage2_kernel, tile_n=tile_n, h_out=h_out,
                          w_out=w_out, planes=planes, mm_dtype=mm_dtype,
                          fold=fold2),
        grid=(num_tiles,),
        out_shape=(raw_shape, stats_shape),
        in_specs=[raw_spec, vec_p, vec_p, bcast_spec(w2.shape)],
        out_specs=(raw_spec, stats_spec),
        scratch_shapes=[pltpu.VMEM((tile_n, h_out + 2, w_out + 2, planes),
                                   mm_dtype)],
        compiler_params=cparams,
        cost_estimate=cost2,
    )(c1, scale1, shift1, w2)

    scale2, shift2 = _bn_scale_shift(st2, params["g2"], params["b2"], rows_t)

    # ---- stage 3: bn2 + shortcut + residual add + relu (lane-dense) ----------
    # The reshapes below are free metadata changes on contiguous HBM arrays;
    # they make every stage-3 load/store unmasked even when planes < 128.
    dense_rows = N * h_out
    dense_cols = w_out * planes
    dense_spec = pl.BlockSpec((tile_n * h_out, dense_cols), lambda i: (i, 0))
    vec_d = pl.BlockSpec((1, dense_cols), lambda i: (0, 0))

    def widen(v):      # (1, planes) -> (1, W_out*planes) matching (w, c) lanes
        return jnp.tile(v, (1, w_out))

    in3 = [c2.reshape(dense_rows, dense_cols), widen(scale2), widen(shift2)]
    in3_specs = [dense_spec, vec_d, vec_d]
    if has_sc:
        scale_s, shift_s = _bn_scale_shift(st_s, params["gs"], params["bs"],
                                           rows_t)
        in3 += [sc_raw.reshape(dense_rows, dense_cols), widen(scale_s),
                widen(shift_s)]
        in3_specs += [dense_spec, vec_d, vec_d]
    else:
        in3.append(x.reshape(dense_rows, dense_cols))  # identity stays f32
        in3_specs.append(dense_spec)

    cost3 = pl.CostEstimate(
        flops=int((6 if has_sc else 4) * rows_total * planes),
        transcendentals=0,
        bytes_accessed=int((3 if has_sc else 2) * rows_total * planes
                           * idt.itemsize
                           + rows_total * planes
                           * jnp.dtype(out_dtype).itemsize))
    out_d = pl.pallas_call(
        functools.partial(_stage3_kernel, has_sc=has_sc),
        grid=(num_tiles,),
        out_shape=jax.ShapeDtypeStruct((dense_rows, dense_cols), out_dtype),
        in_specs=in3_specs,
        out_specs=dense_spec,
        compiler_params=cparams,
        cost_estimate=cost3,
    )(*in3)

    return out_d.reshape(N, h_out, w_out, planes)


def basic_block_forward(x_nchw, params, stride, **kwargs):
    """NCHW wrapper for PyTorch parity.  In a full NHWC network keep
    activations NHWC end-to-end and call basic_block_forward_nhwc directly
    (avoids a full HBM read+write per transpose per block)."""
    x = jnp.transpose(x_nchw, (0, 2, 3, 1))
    out = basic_block_forward_nhwc(x, params, stride, **kwargs)
    return jnp.transpose(out, (0, 3, 1, 2))


# ----------------------------- pure-JAX reference ----------------------------
def _ref_conv(x_nhwc, w_oihw, stride, pad):
    w = jnp.transpose(w_oihw, (2, 3, 1, 0))
    return lax.conv_general_dilated(
        x_nhwc, w, (stride, stride), ((pad, pad), (pad, pad)),
        dimension_numbers=("NHWC", "HWIO", "NHWC"))


def _ref_bn(x_nhwc, g, b):
    mean = jnp.mean(x_nhwc, axis=(0, 1, 2))
    var = jnp.mean(jnp.square(x_nhwc - mean), axis=(0, 1, 2))
    return (x_nhwc - mean) * lax.rsqrt(var + EPS) * g + b


def basic_block_reference(x_nchw, params, stride):
    x = jnp.transpose(x_nchw, (0, 2, 3, 1)).astype(jnp.float32)
    planes = params["w1"].shape[0]
    o = jax.nn.relu(_ref_bn(_ref_conv(x, params["w1"], stride, 1),
                            params["g1"], params["b1"]))
    o = _ref_bn(_ref_conv(o, params["w2"], 1, 1), params["g2"], params["b2"])
    if stride != 1 or x.shape[-1] != planes:
        sc = _ref_bn(_ref_conv(x, params["ws"], stride, 0),
                     params["gs"], params["bs"])
    else:
        sc = x
    return jnp.transpose(jax.nn.relu(o + sc), (0, 3, 1, 2))


if __name__ == "__main__":
    def make_params(key, cin, planes, need_sc):
        ks = jax.random.split(key, 9)
        p = {
            "w1": 0.3 * jax.random.normal(ks[0], (planes, cin, 3, 3),
                                          jnp.float32),
            "g1": 1.0 + 0.1 * jax.random.normal(ks[1], (planes,), jnp.float32),
            "b1": 0.1 * jax.random.normal(ks[2], (planes,), jnp.float32),
            "w2": 0.3 * jax.random.normal(ks[3], (planes, planes, 3, 3),
                                          jnp.float32),
            "g2": 1.0 + 0.1 * jax.random.normal(ks[4], (planes,), jnp.float32),
            "b2": 0.1 * jax.random.normal(ks[5], (planes,), jnp.float32),
        }
        if need_sc:
            p["ws"] = 0.3 * jax.random.normal(ks[6], (planes, cin, 1, 1),
                                              jnp.float32)
            p["gs"] = 1.0 + 0.1 * jax.random.normal(ks[7], (planes,),
                                                    jnp.float32)
            p["bs"] = 0.1 * jax.random.normal(ks[8], (planes,), jnp.float32)
        return p

    key = jax.random.PRNGKey(0)
    # (N, Cin, H, W, planes, stride, forced_tile_n)
    configs = [
        (2, 4, 16, 16, 8, 1, None),   # conv-1x1 + BN shortcut, auto tile
        (2, 8, 16, 16, 8, 1, 1),      # identity shortcut, forced 2-tile grid
    ]
    for idx, (N, cin, H, W, planes, stride, tile) in enumerate(configs):
        kp, kx_, key = jax.random.split(key, 3)
        need_sc = (stride != 1) or (cin != planes)
        params = make_params(kp, cin, planes, need_sc)
        x = jax.random.normal(kx_, (N, cin, H, W), jnp.float32)

        ref = jax.block_until_ready(basic_block_reference(x, params, stride))

        # Exact path (f32 everywhere): tight tolerance vs. reference.
        out_f32 = jax.block_until_ready(
            basic_block_forward(x, params, stride, mm_dtype=jnp.float32,
                                tile_n=tile))
        assert out_f32.shape == ref.shape, (out_f32.shape, ref.shape)
        err_f32 = float(jnp.max(jnp.abs(out_f32 - ref)))
        assert jnp.allclose(out_f32, ref, atol=1e-3, rtol=1e-3), (idx, err_f32)

        # Mixed-precision path (bf16 operands / intermediates, f32 BN stats).
        out_bf16 = jax.block_until_ready(
            basic_block_forward(x, params, stride, mm_dtype=jnp.bfloat16,
                                tile_n=tile)).astype(jnp.float32)
        err_bf16 = float(jnp.max(jnp.abs(out_bf16 - ref)))
        assert jnp.allclose(out_bf16, ref, atol=1e-1, rtol=1e-1), (idx,
                                                                   err_bf16)

    print("KERNEL_OK")
</pallas_src>

<mosaic_0001>
module attributes {stable_mosaic.version = 11 : i64} {
  func.func @_stage1_kernel(%arg0: i32, %arg1: memref<2x16x16x4xf32, #tpu.memory_space<vmem>>, %arg2: memref<3x3x4x8xf32, #tpu.memory_space<vmem>>, %arg3: memref<4x8xf32, #tpu.memory_space<vmem>>, %arg4: memref<512x8xf32, #tpu.memory_space<vmem>>, %arg5: memref<1x2x8xf32, #tpu.memory_space<vmem>>, %arg6: memref<512x8xf32, #tpu.memory_space<vmem>>, %arg7: memref<1x2x8xf32, #tpu.memory_space<vmem>>, %arg8: memref<2x18x18x4xf32, #tpu.memory_space<vmem>>) attributes {dimension_semantics = [#tpu.dimension_semantics<parallel>], iteration_bounds = array<i64: 1>, scalar_prefetch = 0 : i64, scratch_operands = 1 : i64, tpu.core_type = #tpu.core_type<tc>, window_params = [{transform_indices = @transform_0, window_bounds = array<i64: 2, 16, 16, 4>}, {pipeline_mode = #tpu.pipeline_mode<synchronous>, transform_indices = @transform_1, window_bounds = array<i64: 3, 3, 4, 8>}, {pipeline_mode = #tpu.pipeline_mode<synchronous>, transform_indices = @transform_2, window_bounds = array<i64: 4, 8>}, {transform_indices = @transform_3, window_bounds = array<i64: 512, 8>}, {transform_indices = @transform_4, window_bounds = array<i64: 1, 2, 8>}, {transform_indices = @transform_5, window_bounds = array<i64: 512, 8>}, {transform_indices = @transform_6, window_bounds = array<i64: 1, 2, 8>}]} {
    %cst = arith.constant 0.000000e+00 : f32
    %0 = vector.broadcast %cst : f32 to vector<2x1x18x4xf32>
    %c0 = arith.constant 0 : index
    %c0_0 = arith.constant 0 : index
    %c0_1 = arith.constant 0 : index
    %c0_2 = arith.constant 0 : index
    %1 = vector.load %arg8[%c0, %c0_0, %c0_1, %c0_2] : memref<2x18x18x4xf32, #tpu.memory_space<vmem>>, vector<2x1x18x4xf32>
    tpu.vector_store %arg8[%c0, %c0_0, %c0_1, %c0_2], %0 {strides = array<i32>} : memref<2x18x18x4xf32, #tpu.memory_space<vmem>>, vector<2x1x18x4xf32>,
    %cst_3 = arith.constant 0.000000e+00 : f32
    %2 = vector.broadcast %cst_3 : f32 to vector<2x1x18x4xf32>
    %c0_4 = arith.constant 0 : index
    %c17 = arith.constant 17 : index
    %c0_5 = arith.constant 0 : index
    %c0_6 = arith.constant 0 : index
    %3 = vector.load %arg8[%c0_4, %c17, %c0_5, %c0_6] : memref<2x18x18x4xf32, #tpu.memory_space<vmem>>, vector<2x1x18x4xf32>
    tpu.vector_store %arg8[%c0_4, %c17, %c0_5, %c0_6], %2 {strides = array<i32>} : memref<2x18x18x4xf32, #tpu.memory_space<vmem>>, vector<2x1x18x4xf32>,
    %cst_7 = arith.constant 0.000000e+00 : f32
    %4 = vector.broadcast %cst_7 : f32 to vector<2x18x1x4xf32>
    %c0_8 = arith.constant 0 : index
    %c0_9 = arith.constant 0 : index
    %c0_10 = arith.constant 0 : index
    %c0_11 = arith.constant 0 : index
    %5 = vector.load %arg8[%c0_8, %c0_9, %c0_10, %c0_11] : memref<2x18x18x4xf32, #tpu.memory_space<vmem>>, vector<2x18x1x4xf32>
    tpu.vector_store %arg8[%c0_8, %c0_9, %c0_10, %c0_11], %4 {strides = array<i32>} : memref<2x18x18x4xf32, #tpu.memory_space<vmem>>, vector<2x18x1x4xf32>,
    %cst_12 = arith.constant 0.000000e+00 : f32
    %6 = vector.broadcast %cst_12 : f32 to vector<2x18x1x4xf32>
    %c0_13 = arith.constant 0 : index
    %c0_14 = arith.constant 0 : index
    %c17_15 = arith.constant 17 : index
    %c0_16 = arith.constant 0 : index
    %7 = vector.load %arg8[%c0_13, %c0_14, %c17_15, %c0_16] : memref<2x18x18x4xf32, #tpu.memory_space<vmem>>, vector<2x18x1x4xf32>
    tpu.vector_store %arg8[%c0_13, %c0_14, %c17_15, %c0_16], %6 {strides = array<i32>} : memref<2x18x18x4xf32, #tpu.memory_space<vmem>>, vector<2x18x1x4xf32>,
    %c0_17 = arith.constant 0 : index
    %c0_18 = arith.constant 0 : index
    %c0_19 = arith.constant 0 : index
    %c0_20 = arith.constant 0 : index
    %8 = vector.load %arg1[%c0_17, %c0_18, %c0_19, %c0_20] : memref<2x16x16x4xf32, #tpu.memory_space<vmem>>, vector<2x16x16x4xf32>
    %c0_21 = arith.constant 0 : index
    %c1 = arith.constant 1 : index
    %c1_22 = arith.constant 1 : index
    %c0_23 = arith.constant 0 : index
    %9 = vector.load %arg8[%c0_21, %c1, %c1_22, %c0_23] : memref<2x18x18x4xf32, #tpu.memory_space<vmem>>, vector<2x16x16x4xf32>
    tpu.vector_store %arg8[%c0_21, %c1, %c1_22, %c0_23], %8 {strides = array<i32>} : memref<2x18x18x4xf32, #tpu.memory_space<vmem>>, vector<2x16x16x4xf32>,
    %c0_24 = arith.constant 0 : index
    %c1_25 = arith.constant 1 : index
    %c1_26 = arith.constant 1 : index
    %c0_27 = arith.constant 0 : index
    %10 = vector.load %arg8[%c0_24, %c1_25, %c1_26, %c0_27] : memref<2x18x18x4xf32, #tpu.memory_space<vmem>>, vector<2x16x16x4xf32>
    %11 = vector.shape_cast %10 : vector<2x16x16x4xf32> to vector<512x4xf32>
    %cst_28 = arith.constant 0.000000e+00 : f32
    %12 = vector.broadcast %cst_28 : f32 to vector<512x8xf32>
    %c0_29 = arith.constant 0 : index
    %c0_30 = arith.constant 0 : index
    %c0_31 = arith.constant 0 : index
    %c0_32 = arith.constant 0 : index
    %13 = vector.load %arg8[%c0_29, %c0_30, %c0_31, %c0_32] : memref<2x18x18x4xf32, #tpu.memory_space<vmem>>, vector<2x16x16x4xf32>
    %14 = vector.shape_cast %13 : vector<2x16x16x4xf32> to vector<512x4xf32>
    %c0_33 = arith.constant 0 : index
    %c0_34 = arith.constant 0 : index
    %c0_35 = arith.constant 0 : index
    %c0_36 = arith.constant 0 : index
    %15 = vector.load %arg2[%c0_33, %c0_34, %c0_35, %c0_36] : memref<3x3x4x8xf32, #tpu.memory_space<vmem>>, vector<1x1x4x8xf32>
    %16 = vector.shape_cast %15 : vector<1x1x4x8xf32> to vector<4x8xf32>
    %cst_37 = arith.constant dense<0.000000e+00> : vector<512x8xf32>
    %17 = tpu.matmul %14, %16, %cst_37 {dimension_numbers = #tpu.dot_dimension_numbers<[1], [0], [0], [1], [0, 0, 1, 1], [], []>} : vector<512x4xf32>, vector<4x8xf32>, vector<512x8xf32> -> vector<512x8xf32>
    %18 = arith.addf %12, %17 : vector<512x8xf32>
    %c0_38 = arith.constant 0 : index
    %c0_39 = arith.constant 0 : index
    %c1_40 = arith.constant 1 : index
    %c0_41 = arith.constant 0 : index
    %19 = vector.load %arg8[%c0_38, %c0_39, %c1_40, %c0_41] : memref<2x18x18x4xf32, #tpu.memory_space<vmem>>, vector<2x16x16x4xf32>
    %20 = vector.shape_cast %19 : vector<2x16x16x4xf32> to vector<512x4xf32>
    %c0_42 = arith.constant 0 : index
    %c1_43 = arith.constant 1 : index
    %c0_44 = arith.constant 0 : index
    %c0_45 = arith.constant 0 : index
    %21 = vector.load %arg2[%c0_42, %c1_43, %c0_44, %c0_45] : memref<3x3x4x8xf32, #tpu.memory_space<vmem>>, vector<1x1x4x8xf32>
    %22 = vector.shape_cast %21 : vector<1x1x4x8xf32> to vector<4x8xf32>
    %cst_46 = arith.constant dense<0.000000e+00> : vector<512x8xf32>
    %23 = tpu.matmul %20, %22, %cst_46 {dimension_numbers = #tpu.dot_dimension_numbers<[1], [0], [0], [1], [0, 0, 1, 1], [], []>} : vector<512x4xf32>, vector<4x8xf32>, vector<512x8xf32> -> vector<512x8xf32>
    %24 = arith.addf %18, %23 : vector<512x8xf32>
    %c0_47 = arith.constant 0 : index
    %c0_48 = arith.constant 0 : index
    %c2 = arith.constant 2 : index
    %c0_49 = arith.constant 0 : index
    %25 = vector.load %arg8[%c0_47, %c0_48, %c2, %c0_49] : memref<2x18x18x4xf32, #tpu.memory_space<vmem>>, vector<2x16x16x4xf32>
    %26 = vector.shape_cast %25 : vector<2x16x16x4xf32> to vector<512x4xf32>
    %c0_50 = arith.constant 0 : index
    %c2_51 = arith.constant 2 : index
    %c0_52 = arith.constant 0 : index
    %c0_53 = arith.constant 0 : index
    %27 = vector.load %arg2[%c0_50, %c2_51, %c0_52, %c0_53] : memref<3x3x4x8xf32, #tpu.memory_space<vmem>>, vector<1x1x4x8xf32>
    %28 = vector.shape_cast %27 : vector<1x1x4x8xf32> to vector<4x8xf32>
    %cst_54 = arith.constant dense<0.000000e+00> : vector<512x8xf32>
    %29 = tpu.matmul %26, %28, %cst_54 {dimension_numbers = #tpu.dot_dimension_numbers<[1], [0], [0], [1], [0, 0, 1, 1], [], []>} : vector<512x4xf32>, vector<4x8xf32>, vector<512x8xf32> -> vector<512x8xf32>
    %30 = arith.addf %24, %29 : vector<512x8xf32>
    %c0_55 = arith.constant 0 : index
    %c1_56 = arith.constant 1 : index
    %c0_57 = arith.constant 0 : index
    %c0_58 = arith.constant 0 : index
    %31 = vector.load %arg8[%c0_55, %c1_56, %c0_57, %c0_58] : memref<2x18x18x4xf32, #tpu.memory_space<vmem>>, vector<2x16x16x4xf32>
    %32 = vector.shape_cast %31 : vector<2x16x16x4xf32> to vector<512x4xf32>
    %c1_59 = arith.constant 1 : index
    %c0_60 = arith.constant 0 : index
    %c0_61 = arith.constant 0 : index
    %c0_62 = arith.constant 0 : index
    %33 = vector.load %arg2[%c1_59, %c0_60, %c0_61, %c0_62] : memref<3x3x4x8xf32, #tpu.memory_space<vmem>>, vector<1x1x4x8xf32>
    %34 = vector.shape_cast %33 : vector<1x1x4x8xf32> to vector<4x8xf32>
    %cst_63 = arith.constant dense<0.000000e+00> : vector<512x8xf32>
    %35 = tpu.matmul %32, %34, %cst_63 {dimension_numbers = #tpu.dot_dimension_numbers<[1], [0], [0], [1], [0, 0, 1, 1], [], []>} : vector<512x4xf32>, vector<4x8xf32>, vector<512x8xf32> -> vector<512x8xf32>
    %36 = arith.addf %30, %35 : vector<512x8xf32>
    %c1_64 = arith.constant 1 : index
    %c1_65 = arith.constant 1 : index
    %c0_66 = arith.constant 0 : index
    %c0_67 = arith.constant 0 : index
    %37 = vector.load %arg2[%c1_64, %c1_65, %c0_66, %c0_67] : memref<3x3x4x8xf32, #tpu.memory_space<vmem>>, vector<1x1x4x8xf32>
    %38 = vector.shape_cast %37 : vector<1x1x4x8xf32> to vector<4x8xf32>
    %cst_68 = arith.constant dense<0.000000e+00> : vector<512x8xf32>
    %39 = tpu.matmul %11, %38, %cst_68 {dimension_numbers = #tpu.dot_dimension_numbers<[1], [0], [0], [1], [0, 0, 1, 1], [], []>} : vector<512x4xf32>, vector<4x8xf32>, vector<512x8xf32> -> vector<512x8xf32>
    %40 = arith.addf %36, %39 : vector<512x8xf32>
    %c0_69 = arith.constant 0 : index
    %c1_70 = arith.constant 1 : index
    %c2_71 = arith.constant 2 : index
    %c0_72 = arith.constant 0 : index
    %41 = vector.load %arg8[%c0_69, %c1_70, %c2_71, %c0_72] : memref<2x18x18x4xf32, #tpu.memory_space<vmem>>, vector<2x16x16x4xf32>
    %42 = vector.shape_cast %41 : vector<2x16x16x4xf32> to vector<512x4xf32>
    %c1_73 = arith.constant 1 : index
    %c2_74 = arith.constant 2 : index
    %c0_75 = arith.constant 0 : index
    %c0_76 = arith.constant 0 : index
    %43 = vector.load %arg2[%c1_73, %c2_74, %c0_75, %c0_76] : memref<3x3x4x8xf32, #tpu.memory_space<vmem>>, vector<1x1x4x8xf32>
    %44 = vector.shape_cast %43 : vector<1x1x4x8xf32> to vector<4x8xf32>
    %cst_77 = arith.constant dense<0.000000e+00> : vector<512x8xf32>
    %45 = tpu.matmul %42, %44, %cst_77 {dimension_numbers = #tpu.dot_dimension_numbers<[1], [0], [0], [1], [0, 0, 1, 1], [], []>} : vector<512x4xf32>, vector<4x8xf32>, vector<512x8xf32> -> vector<512x8xf32>
    %46 = arith.addf %40, %45 : vector<512x8xf32>
    %c0_78 = arith.constant 0 : index
    %c2_79 = arith.constant 2 : index
    %c0_80 = arith.constant 0 : index
    %c0_81 = arith.constant 0 : index
    %47 = vector.load %arg8[%c0_78, %c2_79, %c0_80, %c0_81] : memref<2x18x18x4xf32, #tpu.memory_space<vmem>>, vector<2x16x16x4xf32>
    %48 = vector.shape_cast %47 : vector<2x16x16x4xf32> to vector<512x4xf32>
    %c2_82 = arith.constant 2 : index
    %c0_83 = arith.constant 0 : index
    %c0_84 = arith.constant 0 : index
    %c0_85 = arith.constant 0 : index
    %49 = vector.load %arg2[%c2_82, %c0_83, %c0_84, %c0_85] : memref<3x3x4x8xf32, #tpu.memory_space<vmem>>, vector<1x1x4x8xf32>
    %50 = vector.shape_cast %49 : vector<1x1x4x8xf32> to vector<4x8xf32>
    %cst_86 = arith.constant dense<0.000000e+00> : vector<512x8xf32>
    %51 = tpu.matmul %48, %50, %cst_86 {dimension_numbers = #tpu.dot_dimension_numbers<[1], [0], [0], [1], [0, 0, 1, 1], [], []>} : vector<512x4xf32>, vector<4x8xf32>, vector<512x8xf32> -> vector<512x8xf32>
    %52 = arith.addf %46, %51 : vector<512x8xf32>
    %c0_87 = arith.constant 0 : index
    %c2_88 = arith.constant 2 : index
    %c1_89 = arith.constant 1 : index
    %c0_90 = arith.constant 0 : index
    %53 = vector.load %arg8[%c0_87, %c2_88, %c1_89, %c0_90] : memref<2x18x18x4xf32, #tpu.memory_space<vmem>>, vector<2x16x16x4xf32>
    %54 = vector.shape_cast %53 : vector<2x16x16x4xf32> to vector<512x4xf32>
    %c2_91 = arith.constant 2 : index
    %c1_92 = arith.constant 1 : index
    %c0_93 = arith.constant 0 : index
    %c0_94 = arith.constant 0 : index
    %55 = vector.load %arg2[%c2_91, %c1_92, %c0_93, %c0_94] : memref<3x3x4x8xf32, #tpu.memory_space<vmem>>, vector<1x1x4x8xf32>
    %56 = vector.shape_cast %55 : vector<1x1x4x8xf32> to vector<4x8xf32>
    %cst_95 = arith.constant dense<0.000000e+00> : vector<512x8xf32>
    %57 = tpu.matmul %54, %56, %cst_95 {dimension_numbers = #tpu.dot_dimension_numbers<[1], [0], [0], [1], [0, 0, 1, 1], [], []>} : vector<512x4xf32>, vector<4x8xf32>, vector<512x8xf32> -> vector<512x8xf32>
    %58 = arith.addf %52, %57 : vector<512x8xf32>
    %c0_96 = arith.constant 0 : index
    %c2_97 = arith.constant 2 : index
    %c2_98 = arith.constant 2 : index
    %c0_99 = arith.constant 0 : index
    %59 = vector.load %arg8[%c0_96, %c2_97, %c2_98, %c0_99] : memref<2x18x18x4xf32, #tpu.memory_space<vmem>>, vector<2x16x16x4xf32>
    %60 = vector.shape_cast %59 : vector<2x16x16x4xf32> to vector<512x4xf32>
    %c2_100 = arith.constant 2 : index
    %c2_101 = arith.constant 2 : index
    %c0_102 = arith.constant 0 : index
    %c0_103 = arith.constant 0 : index
    %61 = vector.load %arg2[%c2_100, %c2_101, %c0_102, %c0_103] : memref<3x3x4x8xf32, #tpu.memory_space<vmem>>, vector<1x1x4x8xf32>
    %62 = vector.shape_cast %61 : vector<1x1x4x8xf32> to vector<4x8xf32>
    %cst_104 = arith.constant dense<0.000000e+00> : vector<512x8xf32>
    %63 = tpu.matmul %60, %62, %cst_104 {dimension_numbers = #tpu.dot_dimension_numbers<[1], [0], [0], [1], [0, 0, 1, 1], [], []>} : vector<512x4xf32>, vector<4x8xf32>, vector<512x8xf32> -> vector<512x8xf32>
    %64 = arith.addf %58, %63 : vector<512x8xf32>
    %cst_105 = arith.constant dense<0.000000e+00> : vector<8xf32>
    %65 = vector.multi_reduction <add>, %64, %cst_105 [0] : vector<512x8xf32> to vector<8xf32>
    %66 = vector.shape_cast %65 : vector<8xf32> to vector<1x8xf32>
    %cst_106 = arith.constant 0.001953125 : f32
    %67 = vector.broadcast %cst_106 : f32 to vector<1x8xf32>
    %68 = arith.mulf %66, %67 : vector<1x8xf32>
    %69 = vector.broadcast %68 : vector<1x8xf32> to vector<512x8xf32>
    %70 = arith.subf %64, %69 : vector<512x8xf32>
    %71 = arith.mulf %70, %70 : vector<512x8xf32>
    %cst_107 = arith.constant dense<0.000000e+00> : vector<8xf32>
    %72 = vector.multi_reduction <add>, %71, %cst_107 [0] : vector<512x8xf32> to vector<8xf32>
    %73 = vector.shape_cast %72 : vector<8xf32> to vector<1x8xf32>
    %74 = tpu.concatenate %68, %73 in 0 : vector<1x8xf32>, vector<1x8xf32> -> vector<2x8xf32>
    %75 = vector.shape_cast %74 : vector<2x8xf32> to vector<1x2x8xf32>
    %c0_108 = arith.constant 0 : index
    %c0_109 = arith.constant 0 : index
    %c0_110 = arith.constant 0 : index
    %76 = vector.load %arg5[%c0_108, %c0_109, %c0_110] : memref<1x2x8xf32, #tpu.memory_space<vmem>>, vector<1x2x8xf32>
    tpu.vector_store %arg5[%c0_108, %c0_109, %c0_110], %75 {strides = array<i32>} : memref<1x2x8xf32, #tpu.memory_space<vmem>>, vector<1x2x8xf32>,
    %c0_111 = arith.constant 0 : index
    %c0_112 = arith.constant 0 : index
    %77 = vector.load %arg4[%c0_111, %c0_112] : memref<512x8xf32, #tpu.memory_space<vmem>>, vector<512x8xf32>
    tpu.vector_store %arg4[%c0_111, %c0_112], %64 {strides = array<i32>} : memref<512x8xf32, #tpu.memory_space<vmem>>, vector<512x8xf32>,
    %c0_113 = arith.constant 0 : index
    %c0_114 = arith.constant 0 : index
    %78 = vector.load %arg3[%c0_113, %c0_114] : memref<4x8xf32, #tpu.memory_space<vmem>>, vector<4x8xf32>
    %cst_115 = arith.constant dense<0.000000e+00> : vector<512x8xf32>
    %79 = tpu.matmul %11, %78, %cst_115 {dimension_numbers = #tpu.dot_dimension_numbers<[1], [0], [0], [1], [0, 0, 1, 1], [], []>} : vector<512x4xf32>, vector<4x8xf32>, vector<512x8xf32> -> vector<512x8xf32>
    %cst_116 = arith.constant dense<0.000000e+00> : vector<8xf32>
    %80 = vector.multi_reduction <add>, %79, %cst_116 [0] : vector<512x8xf32> to vector<8xf32>
    %81 = vector.shape_cast %80 : vector<8xf32> to vector<1x8xf32>
    %cst_117 = arith.constant 0.001953125 : f32
    %82 = vector.broadcast %cst_117 : f32 to vector<1x8xf32>
    %83 = arith.mulf %81, %82 : vector<1x8xf32>
    %84 = vector.broadcast %83 : vector<1x8xf32> to vector<512x8xf32>
    %85 = arith.subf %79, %84 : vector<512x8xf32>
    %86 = arith.mulf %85, %85 : vector<512x8xf32>
    %cst_118 = arith.constant dense<0.000000e+00> : vector<8xf32>
    %87 = vector.multi_reduction <add>, %86, %cst_118 [0] : vector<512x8xf32> to vector<8xf32>
    %88 = vector.shape_cast %87 : vector<8xf32> to vector<1x8xf32>
    %89 = tpu.concatenate %83, %88 in 0 : vector<1x8xf32>, vector<1x8xf32> -> vector<2x8xf32>
    %90 = vector.shape_cast %89 : vector<2x8xf32> to vector<1x2x8xf32>
    %c0_119 = arith.constant 0 : index
    %c0_120 = arith.constant 0 : index
    %c0_121 = arith.constant 0 : index
    %91 = vector.load %arg7[%c0_119, %c0_120, %c0_121] : memref<1x2x8xf32, #tpu.memory_space<vmem>>, vector<1x2x8xf32>
    tpu.vector_store %arg7[%c0_119, %c0_120, %c0_121], %90 {strides = array<i32>} : memref<1x2x8xf32, #tpu.memory_space<vmem>>, vector<1x2x8xf32>,
    %c0_122 = arith.constant 0 : index
    %c0_123 = arith.constant 0 : index
    %92 = vector.load %arg6[%c0_122, %c0_123] : memref<512x8xf32, #tpu.memory_space<vmem>>, vector<512x8xf32>
    tpu.vector_store %arg6[%c0_122, %c0_123], %79 {strides = array<i32>} : memref<512x8xf32, #tpu.memory_space<vmem>>, vector<512x8xf32>,
    return
  }
  func.func @transform_0(%arg0: i32) -> (i32, i32, i32, i32) {
    %c0_i32 = arith.constant 0 : i32
    %c0_i32_0 = arith.constant 0 : i32
    %c0_i32_1 = arith.constant 0 : i32
    %c0_i32_2 = arith.constant 0 : i32
    return %arg0, %c0_i32, %c0_i32_0, %c0_i32_1 : i32, i32, i32, i32
  }
  func.func @transform_1(%arg0: i32) -> (i32, i32, i32, i32) {
    %c0_i32 = arith.constant 0 : i32
    %c0_i32_0 = arith.constant 0 : i32
    %c0_i32_1 = arith.constant 0 : i32
    %c0_i32_2 = arith.constant 0 : i32
    %c0_i32_3 = arith.constant 0 : i32
    return %c0_i32, %c0_i32_0, %c0_i32_1, %c0_i32_2 : i32, i32, i32, i32
  }
  func.func @transform_2(%arg0: i32) -> (i32, i32) {
    %c0_i32 = arith.constant 0 : i32
    %c0_i32_0 = arith.constant 0 : i32
    %c0_i32_1 = arith.constant 0 : i32
    return %c0_i32, %c0_i32_0 : i32, i32
  }
  func.func @transform_3(%arg0: i32) -> (i32, i32) {
    %c0_i32 = arith.constant 0 : i32
    %c0_i32_0 = arith.constant 0 : i32
    return %arg0, %c0_i32 : i32, i32
  }
  func.func @transform_4(%arg0: i32) -> (i32, i32, i32) {
    %c0_i32 = arith.constant 0 : i32
    %c0_i32_0 = arith.constant 0 : i32
    %c0_i32_1 = arith.constant 0 : i32
    return %arg0, %c0_i32, %c0_i32_0 : i32, i32, i32
  }
  func.func @transform_5(%arg0: i32) -> (i32, i32) {
    %c0_i32 = arith.constant 0 : i32
    %c0_i32_0 = arith.constant 0 : i32
    return %arg0, %c0_i32 : i32, i32
  }
  func.func @transform_6(%arg0: i32) -> (i32, i32, i32) {
    %c0_i32 = arith.constant 0 : i32
    %c0_i32_0 = arith.constant 0 : i32
    %c0_i32_1 = arith.constant 0 : i32
    return %arg0, %c0_i32, %c0_i32_0 : i32, i32, i32
  }
}

</mosaic_0001>

<bundles_post_ra>
// kernel: tpu_custom_call.1
= control target key start
LH: loop header
LB: loop body
LE: loop exit
PB: predicated region body
PF: predicated region fallthrough
CT: control target
= control target key end

     0   :  { %12 = vsyncpa [#allocation4], 0  ;;  %vm624_vm0 = vcmask 1043456   ;;  %vm20_vm1 = vcmask 31744   ;;  %vm23_vm2 = vcmask 25600   ;;  %vm35_vm3 = vcmask 24576   ;;  %s14199_s0 = inlined_call_operand.vmem [shape: f32[2,16,16,4], index: 0, kind: input, shape index: {}]   ;;  %s14200_s1 = inlined_call_operand.vmem [shape: f32[3,3,4,8], index: 1, kind: input, shape index: {}]   ;;  %s14201_s2 = inlined_call_operand.vmem [shape: f32[4,8], index: 2, kind: input, shape index: {}]   ;;  %s14202_s3 = inlined_call_operand.vmem [shape: f32[512,8], index: 3, kind: output, shape index: {0}]   ;;  %s14203_s4 = inlined_call_operand.hbm [shape: f32[1,2,8], index: 4, kind: output, shape index: {1}]   ;;  %s14204_s5 = inlined_call_operand.vmem [shape: f32[512,8], index: 5, kind: output, shape index: {2}]   ;;  %s14205_s6 = inlined_call_operand.hbm [shape: f32[1,2,8], index: 6, kind: output, shape index: {3}]  }
   0x1   :  { %v8113_v0 = vld [vmem:[%s14200_s1 + $0x10] sm:$0xf]  ;;  %v7850_v1 = vld [vmem:[%s14200_s1 + $0x4] sm:$0xf]  ;;  %v10817_v3 = vld [vmem:[%s14200_s1 + $0x14] sm:$0xf] }
   0x2   :  { %9550 = vmatprep.subr.msk.mxu0 %vm624_vm0, %v8113_v0  ;;  %9158 = vmatprep.subr.msk.mxu1 %vm624_vm0, %v7850_v1  ;;  %v108_v2 = vld [vmem:[%s14199_s0] sm:$0xff]  ;;  %v10765_v4 = vmov 0.0   ;;  %v109_v5 = vld [vmem:[%s14199_s0 + $0x8] sm:$0xff]  ;;  %v110_v7 = vld [vmem:[%s14199_s0 + $0x10] sm:$0xff] }
   0x3   :  { %9551 = vmatpush3.msk.msra.mxu0 %vm624_vm0, %v8113_v0  ;;  %9159 = vmatpush3.msk.msra.mxu1 %vm624_vm0, %v7850_v1  ;;  %21 = vst.msk [vmem:[#allocation2] sm:$0xff] %vm20_vm1, %v10765_v4  ;;  %22 = vst.msk [vmem:[#allocation2 + $0x8] sm:$0xff] %vm20_vm1, %v10765_v4  ;;  %v365_v6 = vld [vmem:[%s14200_s1] sm:$0xf]  ;;  %v111_v8 = vld [vmem:[%s14199_s0 + $0x18] sm:$0xff] }
   0x4   :  { %25 = vst.msk [vmem:[#allocation2 + $0x1b0] sm:$0xff] %vm20_vm1, %v10765_v4  ;;  %26 = vst.msk [vmem:[#allocation2 + $0x1b8] sm:$0xff] %vm20_vm1, %v10765_v4  ;;  %9648 = vmatprep.subr.msk.mxu0 %vm624_vm0, %v10817_v3  ;;  %9256 = vmatprep.subr.msk.mxu1 %vm624_vm0, %v365_v6  ;;  %v112_v9 = vld [vmem:[%s14199_s0 + $0x20] sm:$0xff]  ;;  %v113_v10 = vld [vmem:[%s14199_s0 + $0x28] sm:$0xff] }
   0x5   :  { %29 = vst.msk [vmem:[#allocation2 + $0x198] sm:$0xff] %vm20_vm1, %v10765_v4  ;;  %30 = vst.msk [vmem:[#allocation2 + $0x1a0] sm:$0xff] %vm20_vm1, %v10765_v4  ;;  %v114_v11 = vld [vmem:[%s14199_s0 + $0x30] sm:$0xff]  ;;  %v115_v12 = vld [vmem:[%s14199_s0 + $0x38] sm:$0xff] }
   0x6   :  { %32 = vst.msk [vmem:[#allocation2 + $0x348] sm:$0xff] %vm20_vm1, %v10765_v4  ;;  %33 = vst.msk [vmem:[#allocation2 + $0x350] sm:$0xff] %vm20_vm1, %v10765_v4  ;;  %v116_v13 = vld [vmem:[%s14199_s0 + $0x40] sm:$0xff]  ;;  %v117_v14 = vld [vmem:[%s14199_s0 + $0x48] sm:$0xff] }
   0x7   :  { %173 = vst.msk [vmem:[#allocation2 + $0x19] sm:$0xff] %vm20_vm1, %v108_v2  ;;  %174 = vst.msk [vmem:[#allocation2 + $0x21] sm:$0xff] %vm20_vm1, %v109_v5  ;;  %v118_v15 = vld [vmem:[%s14199_s0 + $0x50] sm:$0xff]  ;;  %v119_v16 = vld [vmem:[%s14199_s0 + $0x58] sm:$0xff] }
   0x8   :  { %24 = vst.msk [vmem:[#allocation2 + $0x10] sm:$0x3] %vm23_vm2, %v10765_v4  ;;  %27 = vst.msk [vmem:[#allocation2 + $0x1c0] sm:$0x3] %vm23_vm2, %v10765_v4  ;;  %v120_v17 = vld [vmem:[%s14199_s0 + $0x60] sm:$0xff]  ;;  %v121_v18 = vld [vmem:[%s14199_s0 + $0x68] sm:$0xff] }
   0x9   :  { %31 = vst.msk [vmem:[#allocation2 + $0x1a8] sm:$0x3] %vm23_vm2, %v10765_v4  ;;  %34 = vst.msk [vmem:[#allocation2 + $0x358] sm:$0x3] %vm23_vm2, %v10765_v4  ;;  %v122_v19 = vld [vmem:[%s14199_s0 + $0x70] sm:$0xff]  ;;  %v123_v20 = vld [vmem:[%s14199_s0 + $0x78] sm:$0xff] }
   0xa   :  { %37 = vst.msk [vmem:[#allocation2 + $0x18] sm:$0x1] %vm35_vm3, %v10765_v4  ;;  %38 = vst.msk [vmem:[#allocation2 + $0x30] sm:$0x1] %vm35_vm3, %v10765_v4  ;;  %v124_v21 = vld [vmem:[%s14199_s0 + $0x80] sm:$0xff]  ;;  %v125_v22 = vld [vmem:[%s14199_s0 + $0x88] sm:$0xff] }
   0xb   :  { %39 = vst.msk [vmem:[#allocation2 + $0x48] sm:$0x1] %vm35_vm3, %v10765_v4  ;;  %40 = vst.msk [vmem:[#allocation2 + $0x60] sm:$0x1] %vm35_vm3, %v10765_v4  ;;  %v126_v23 = vld [vmem:[%s14199_s0 + $0x90] sm:$0xff]  ;;  %v127_v24 = vld [vmem:[%s14199_s0 + $0x98] sm:$0xff] }
   0xc   :  { %41 = vst.msk [vmem:[#allocation2 + $0x78] sm:$0x1] %vm35_vm3, %v10765_v4  ;;  %42 = vst.msk [vmem:[#allocation2 + $0x90] sm:$0x1] %vm35_vm3, %v10765_v4  ;;  %v128_v25 = vld [vmem:[%s14199_s0 + $0xa0] sm:$0xff]  ;;  %v129_v31 = vld [vmem:[%s14199_s0 + $0xa8] sm:$0xff] }
   0xd   :  { %43 = vst.msk [vmem:[#allocation2 + $0xa8] sm:$0x1] %vm35_vm3, %v10765_v4  ;;  %44 = vst.msk [vmem:[#allocation2 + $0xc0] sm:$0x1] %vm35_vm3, %v10765_v4  ;;  %v366_v26 = vld [vmem:[#allocation2 + $0x1] sm:$0xff]  ;;  %v130_v36 = vld [vmem:[%s14199_s0 + $0xb0] sm:$0xff] }
   0xe   :  { %45 = vst.msk [vmem:[#allocation2 + $0xd8] sm:$0x1] %vm35_vm3, %v10765_v4  ;;  %46 = vst.msk [vmem:[#allocation2 + $0xf0] sm:$0x1] %vm35_vm3, %v10765_v4  ;;  %v237_v27 = vld [vmem:[#allocation2 + $0x19] sm:$0xff]  ;;  %9160 = vmatprep.mubr.msk.f32.mxu1 %vm20_vm1, %v366_v26  ;;  %v238_v29 = vld [vmem:[#allocation2 + $0x21] sm:$0xff] }
   0xf   :  { %47 = vst.msk [vmem:[#allocation2 + $0x108] sm:$0x1] %vm35_vm3, %v10765_v4  ;;  %48 = vst.msk [vmem:[#allocation2 + $0x120] sm:$0x1] %vm35_vm3, %v10765_v4  ;;  %v367_v28 = vld [vmem:[#allocation2 + $0x9] sm:$0xff]  ;;  %9552 = vmatprep.mubr.msk.f32.mxu0 %vm20_vm1, %v237_v27  ;;  %v131_v37 = vld [vmem:[%s14199_s0 + $0xb8] sm:$0xff] }
  0x10   :  { %49 = vst.msk [vmem:[#allocation2 + $0x138] sm:$0x1] %vm35_vm3, %v10765_v4  ;;  %50 = vst.msk [vmem:[#allocation2 + $0x150] sm:$0x1] %vm35_vm3, %v10765_v4  ;;  %9161 = vmatmul.mubr.msk.f32.vlgmr.msra.gmra.mrb[0].mxu1 %vm20_vm1, %v367_v28  ;;  %9553 = vmatmul.mubr.msk.f32.vlgmr.msra.gmra.mrb[0].mxu0 %vm20_vm1, %v238_v29  ;;  %v132_v38 = vld [vmem:[%s14199_s0 + $0xc0] sm:$0xff]  ;;  %v133_v39 = vld [vmem:[%s14199_s0 + $0xc8] sm:$0xff] }
  0x11   :  { %51 = vst.msk [vmem:[#allocation2 + $0x168] sm:$0x1] %vm35_vm3, %v10765_v4  ;;  %52 = vst.msk [vmem:[#allocation2 + $0x180] sm:$0x1] %vm35_vm3, %v10765_v4  ;;  %9649 = vmatpush3.msk.msra.mxu0 %vm624_vm0, %v10817_v3  ;;  %9257 = vmatpush3.msk.msra.mxu1 %vm624_vm0, %v365_v6  ;;  %v134_v40 = vld [vmem:[%s14199_s0 + $0xd0] sm:$0xff]  ;;  %v135_v41 = vld [vmem:[%s14199_s0 + $0xd8] sm:$0xff] }
  0x12   :  { %55 = vst.msk [vmem:[#allocation2 + $0x1c8] sm:$0x1] %vm35_vm3, %v10765_v4  ;;  %56 = vst.msk [vmem:[#allocation2 + $0x1e0] sm:$0x1] %vm35_vm3, %v10765_v4  ;;  %9163 = vmatprep.mubr.msk.f32.mxu1 %vm20_vm1, %v237_v27  ;;  %v136_v42 = vld [vmem:[%s14199_s0 + $0xe0] sm:$0xff]  ;;  %v137_v43 = vld [vmem:[%s14199_s0 + $0xe8] sm:$0xff] }
  0x13   :  { %57 = vst.msk [vmem:[#allocation2 + $0x1f8] sm:$0x1] %vm35_vm3, %v10765_v4  ;;  %58 = vst.msk [vmem:[#allocation2 + $0x210] sm:$0x1] %vm35_vm3, %v10765_v4  ;;  %v138_v45 = vld [vmem:[%s14199_s0 + $0xf0] sm:$0xff]  ;;  %v139_v46 = vld [vmem:[%s14199_s0 + $0xf8] sm:$0xff] }
  0x14   :  { %59 = vst.msk [vmem:[#allocation2 + $0x228] sm:$0x1] %vm35_vm3, %v10765_v4  ;;  %60 = vst.msk [vmem:[#allocation2 + $0x240] sm:$0x1] %vm35_vm3, %v10765_v4  ;;  %9164 = vmatmul.mubr.msk.f32.gmra.mrb[2].mxu1 %vm20_vm1, %v238_v29  ;;  %v140_v48 = vld [vmem:[%s14199_s0 + $0x100] sm:$0xff]  ;;  %v141_v49 = vld [vmem:[%s14199_s0 + $0x108] sm:$0xff] }
  0x15   :  { %61 = vst.msk [vmem:[#allocation2 + $0x258] sm:$0x1] %vm35_vm3, %v10765_v4  ;;  %62 = vst.msk [vmem:[#allocation2 + $0x270] sm:$0x1] %vm35_vm3, %v10765_v4  ;;  %v142_v51 = vld [vmem:[%s14199_s0 + $0x110] sm:$0xff]  ;;  %v143_v52 = vld [vmem:[%s14199_s0 + $0x118] sm:$0xff] }
  0x16   :  { %63 = vst.msk [vmem:[#allocation2 + $0x288] sm:$0x1] %vm35_vm3, %v10765_v4  ;;  %64 = vst.msk [vmem:[#allocation2 + $0x2a0] sm:$0x1] %vm35_vm3, %v10765_v4  ;;  %v144_v53 = vld [vmem:[%s14199_s0 + $0x120] sm:$0xff]  ;;  %v145_v54 = vld [vmem:[%s14199_s0 + $0x128] sm:$0xff] }
  0x17   :  { %65 = vst.msk [vmem:[#allocation2 + $0x2b8] sm:$0x1] %vm35_vm3, %v10765_v4  ;;  %66 = vst.msk [vmem:[#allocation2 + $0x2d0] sm:$0x1] %vm35_vm3, %v10765_v4  ;;  %v146_v55 = vld [vmem:[%s14199_s0 + $0x130] sm:$0xff]  ;;  %v147_v56 = vld [vmem:[%s14199_s0 + $0x138] sm:$0xff] }
  0x18   :  { %67 = vst.msk [vmem:[#allocation2 + $0x2e8] sm:$0x1] %vm35_vm3, %v10765_v4  ;;  %68 = vst.msk [vmem:[#allocation2 + $0x300] sm:$0x1] %vm35_vm3, %v10765_v4  ;;  %v148_v57 = vld [vmem:[%s14199_s0 + $0x140] sm:$0xff]  ;;  %v149_v58 = vld [vmem:[%s14199_s0 + $0x148] sm:$0xff] }
  0x19   :  { %69 = vst.msk [vmem:[#allocation2 + $0x318] sm:$0x1] %vm35_vm3, %v10765_v4  ;;  %70 = vst.msk [vmem:[#allocation2 + $0x330] sm:$0x1] %vm35_vm3, %v10765_v4  ;;  %v150_v59 = vld [vmem:[%s14199_s0 + $0x150] sm:$0xff]  ;;  %v151_v61 = vld [vmem:[%s14199_s0 + $0x158] sm:$0xff] }
  0x1a   :  { %73 = vst.msk [vmem:[#allocation2 + $0x29] sm:$0x1] %vm35_vm3, %v10765_v4  ;;  %74 = vst.msk [vmem:[#allocation2 + $0x41] sm:$0x1] %vm35_vm3, %v10765_v4  ;;  %v152_v63 = vld [vmem:[%s14199_s0 + $0x160] sm:$0xff]  ;;  %v153_v1 = vld [vmem:[%s14199_s0 + $0x168] sm:$0xff] }
  0x1b   :  { %75 = vst.msk [vmem:[#allocation2 + $0x59] sm:$0x1] %vm35_vm3, %v10765_v4  ;;  %76 = vst.msk [vmem:[#allocation2 + $0x71] sm:$0x1] %vm35_vm3, %v10765_v4  ;;  %v155_v5 = vld [vmem:[%s14199_s0 + $0x178] sm:$0xff]  ;;  %v156_v6 = vld [vmem:[%s14199_s0 + $0x180] sm:$0xff] }
  0x1c   :  { %77 = vst.msk [vmem:[#allocation2 + $0x89] sm:$0x1] %vm35_vm3, %v10765_v4  ;;  %78 = vst.msk [vmem:[#allocation2 + $0xa1] sm:$0x1] %vm35_vm3, %v10765_v4  ;;  %v11299_v29 = vld [vmem:[%s14200_s1 + $0x8] sm:$0xf] }
  0x1d   :  { %79 = vst.msk [vmem:[#allocation2 + $0xb9] sm:$0x1] %vm35_vm3, %v10765_v4  ;;  %80 = vst.msk [vmem:[#allocation2 + $0xd1] sm:$0x1] %vm35_vm3, %v10765_v4  ;;  %9354 = vmatprep.subr.msk.mxu1 %vm624_vm0, %v11299_v29 }
  0x1e   :  { %81 = vst.msk [vmem:[#allocation2 + $0xe9] sm:$0x1] %vm35_vm3, %v10765_v4  ;;  %82 = vst.msk [vmem:[#allocation2 + $0x101] sm:$0x1] %vm35_vm3, %v10765_v4 }
  0x1f   :  { %83 = vst.msk [vmem:[#allocation2 + $0x119] sm:$0x1] %vm35_vm3, %v10765_v4  ;;  %84 = vst.msk [vmem:[#allocation2 + $0x131] sm:$0x1] %vm35_vm3, %v10765_v4 }
  0x20   :  { %85 = vst.msk [vmem:[#allocation2 + $0x149] sm:$0x1] %vm35_vm3, %v10765_v4  ;;  %86 = vst.msk [vmem:[#allocation2 + $0x161] sm:$0x1] %vm35_vm3, %v10765_v4 }
  0x21   :  { %87 = vst.msk [vmem:[#allocation2 + $0x179] sm:$0x1] %vm35_vm3, %v10765_v4  ;;  %88 = vst.msk [vmem:[#allocation2 + $0x191] sm:$0x1] %vm35_vm3, %v10765_v4 }
  0x22   :  { %91 = vst.msk [vmem:[#allocation2 + $0x1d9] sm:$0x1] %vm35_vm3, %v10765_v4  ;;  %92 = vst.msk [vmem:[#allocation2 + $0x1f1] sm:$0x1] %vm35_vm3, %v10765_v4 }
  0x23   :  { %93 = vst.msk [vmem:[#allocation2 + $0x209] sm:$0x1] %vm35_vm3, %v10765_v4  ;;  %94 = vst.msk [vmem:[#allocation2 + $0x221] sm:$0x1] %vm35_vm3, %v10765_v4 }
  0x24   :  { %95 = vst.msk [vmem:[#allocation2 + $0x239] sm:$0x1] %vm35_vm3, %v10765_v4  ;;  %96 = vst.msk [vmem:[#allocation2 + $0x251] sm:$0x1] %vm35_vm3, %v10765_v4 }
  0x25   :  { %97 = vst.msk [vmem:[#allocation2 + $0x269] sm:$0x1] %vm35_vm3, %v10765_v4  ;;  %98 = vst.msk [vmem:[#allocation2 + $0x281] sm:$0x1] %vm35_vm3, %v10765_v4 }
  0x26   :  { %99 = vst.msk [vmem:[#allocation2 + $0x299] sm:$0x1] %vm35_vm3, %v10765_v4  ;;  %100 = vst.msk [vmem:[#allocation2 + $0x2b1] sm:$0x1] %vm35_vm3, %v10765_v4 }
  0x27   :  { %101 = vst.msk [vmem:[#allocation2 + $0x2c9] sm:$0x1] %vm35_vm3, %v10765_v4  ;;  %102 = vst.msk [vmem:[#allocation2 + $0x2e1] sm:$0x1] %vm35_vm3, %v10765_v4 }
  0x28   :  { %103 = vst.msk [vmem:[#allocation2 + $0x2f9] sm:$0x1] %vm35_vm3, %v10765_v4  ;;  %104 = vst.msk [vmem:[#allocation2 + $0x311] sm:$0x1] %vm35_vm3, %v10765_v4 }
  0x29   :  { %105 = vst.msk [vmem:[#allocation2 + $0x329] sm:$0x1] %vm35_vm3, %v10765_v4  ;;  %106 = vst.msk [vmem:[#allocation2 + $0x341] sm:$0x1] %vm35_vm3, %v10765_v4 }
  0x2a   :  { %72 = vst.msk [vmem:[#allocation2 + $0x11] sm:$0x1] %vm35_vm3, %v10765_v4  ;;  %36 = vst.msk [vmem:[#allocation2] sm:$0x1] %vm35_vm3, %v10765_v4 }
  0x2b   :  { %53 = vst.msk [vmem:[#allocation2 + $0x198] sm:$0x1] %vm35_vm3, %v10765_v4  ;;  %54 = vst.msk [vmem:[#allocation2 + $0x1b0] sm:$0x1] %vm35_vm3, %v10765_v4 }
  0x2c   :  { %71 = vst.msk [vmem:[#allocation2 + $0x348] sm:$0x1] %vm35_vm3, %v10765_v4  ;;  %89 = vst.msk [vmem:[#allocation2 + $0x1a9] sm:$0x1] %vm35_vm3, %v10765_v4 }
  0x2d   :  { %90 = vst.msk [vmem:[#allocation2 + $0x1c1] sm:$0x1] %vm35_vm3, %v10765_v4  ;;  %107 = vst.msk [vmem:[#allocation2 + $0x359] sm:$0x1] %vm35_vm3, %v10765_v4  ;;  %v154_v4 = vld [vmem:[%s14199_s0 + $0x170] sm:$0xff] }
  0x2e   :  { %175 = vst.msk [vmem:[#allocation2 + $0x31] sm:$0xff] %vm20_vm1, %v110_v7  ;;  %176 = vst.msk [vmem:[#allocation2 + $0x39] sm:$0xff] %vm20_vm1, %v111_v8  ;;  %v157_v7 = vld [vmem:[%s14199_s0 + $0x188] sm:$0xff]  ;;  %v158_v8 = vld [vmem:[%s14199_s0 + $0x190] sm:$0xff] }
  0x2f   :  { %177 = vst.msk [vmem:[#allocation2 + $0x49] sm:$0xff] %vm20_vm1, %v112_v9  ;;  %178 = vst.msk [vmem:[#allocation2 + $0x51] sm:$0xff] %vm20_vm1, %v113_v10  ;;  %v159_v9 = vld [vmem:[%s14199_s0 + $0x198] sm:$0xff]  ;;  %v160_v10 = vld [vmem:[%s14199_s0 + $0x1a0] sm:$0xff] }
  0x30   :  { %179 = vst.msk [vmem:[#allocation2 + $0x61] sm:$0xff] %vm20_vm1, %v114_v11  ;;  %180 = vst.msk [vmem:[#allocation2 + $0x69] sm:$0xff] %vm20_vm1, %v115_v12  ;;  %v161_v11 = vld [vmem:[%s14199_s0 + $0x1a8] sm:$0xff] }
  0x31   :  { %181 = vst.msk [vmem:[#allocation2 + $0x79] sm:$0xff] %vm20_vm1, %v116_v13  ;;  %182 = vst.msk [vmem:[#allocation2 + $0x81] sm:$0xff] %vm20_vm1, %v117_v14  ;;  %v162_v13 = vld [vmem:[%s14199_s0 + $0x1b0] sm:$0xff]  ;;  %v163_v14 = vld [vmem:[%s14199_s0 + $0x1b8] sm:$0xff] }
  0x32   :  { %183 = vst.msk [vmem:[#allocation2 + $0x91] sm:$0xff] %vm20_vm1, %v118_v15  ;;  %184 = vst.msk [vmem:[#allocation2 + $0x99] sm:$0xff] %vm20_vm1, %v119_v16  ;;  %v164_v16 = vld [vmem:[%s14199_s0 + $0x1c0] sm:$0xff] }
  0x33   :  { %185 = vst.msk [vmem:[#allocation2 + $0xa9] sm:$0xff] %vm20_vm1, %v120_v17  ;;  %186 = vst.msk [vmem:[#allocation2 + $0xb1] sm:$0xff] %vm20_vm1, %v121_v18  ;;  %v165_v17 = vld [vmem:[%s14199_s0 + $0x1c8] sm:$0xff]  ;;  %v166_v18 = vld [vmem:[%s14199_s0 + $0x1d0] sm:$0xff] }
  0x34   :  { %187 = vst.msk [vmem:[#allocation2 + $0xc1] sm:$0xff] %vm20_vm1, %v122_v19  ;;  %188 = vst.msk [vmem:[#allocation2 + $0xc9] sm:$0xff] %vm20_vm1, %v123_v20  ;;  %v167_v19 = vld [vmem:[%s14199_s0 + $0x1d8] sm:$0xff]  ;;  %v168_v20 = vld [vmem:[%s14199_s0 + $0x1e0] sm:$0xff] }
  0x35   :  { %189 = vst.msk [vmem:[#allocation2 + $0xd9] sm:$0xff] %vm20_vm1, %v124_v21  ;;  %190 = vst.msk [vmem:[#allocation2 + $0xe1] sm:$0xff] %vm20_vm1, %v125_v22  ;;  %v239_v30 = vld [vmem:[#allocation2 + $0x31] sm:$0xff]  ;;  %v240_v32 = vld [vmem:[#allocation2 + $0x39] sm:$0xff] }
  0x36   :  { %191 = vst.msk [vmem:[#allocation2 + $0xf1] sm:$0xff] %vm20_vm1, %v126_v23  ;;  %192 = vst.msk [vmem:[#allocation2 + $0xf9] sm:$0xff] %vm20_vm1, %v127_v24  ;;  %9555 = vmatprep.mubr.msk.f32.mxu0 %vm20_vm1, %v239_v30  ;;  %v241_v33 = vld [vmem:[#allocation2 + $0x49] sm:$0xff]  ;;  %9166 = vmatprep.mubr.msk.f32.mxu1 %vm20_vm1, %v239_v30  ;;  %v242_v34 = vld [vmem:[#allocation2 + $0x51] sm:$0xff] }
  0x37   :  { %193 = vst.msk [vmem:[#allocation2 + $0x109] sm:$0xff] %vm20_vm1, %v128_v25  ;;  %194 = vst.msk [vmem:[#allocation2 + $0x111] sm:$0xff] %vm20_vm1, %v129_v31  ;;  %9556 = vmatmul.mubr.msk.f32.gmra.mrb[2].mxu0 %vm20_vm1, %v240_v32  ;;  %v243_v35 = vld [vmem:[#allocation2 + $0x61] sm:$0xff]  ;;  %9167 = vmatmul.mubr.msk.f32.gmra.mrb[4].mxu1 %vm20_vm1, %v240_v32  ;;  %v244_v44 = vld [vmem:[#allocation2 + $0x69] sm:$0xff] }
  0x38   :  { %9558 = vmatprep.mubr.msk.f32.mxu0 %vm20_vm1, %v241_v33  ;;  %195 = vst.msk [vmem:[#allocation2 + $0x121] sm:$0xff] %vm20_vm1, %v130_v36  ;;  %196 = vst.msk [vmem:[#allocation2 + $0x129] sm:$0xff] %vm20_vm1, %v131_v37  ;;  %9169 = vmatprep.mubr.msk.f32.mxu1 %vm20_vm1, %v241_v33  ;;  %v245_v47 = vld [vmem:[#allocation2 + $0x79] sm:$0xff]  ;;  %v246_v50 = vld [vmem:[#allocation2 + $0x81] sm:$0xff] }
  0x39   :  { %197 = vst.msk [vmem:[#allocation2 + $0x139] sm:$0xff] %vm20_vm1, %v132_v38  ;;  %198 = vst.msk [vmem:[#allocation2 + $0x141] sm:$0xff] %vm20_vm1, %v133_v39  ;;  %v247_v60 = vld [vmem:[#allocation2 + $0x91] sm:$0xff]  ;;  %v248_v62 = vld [vmem:[#allocation2 + $0x99] sm:$0xff] }
  0x3a   :  { %199 = vst.msk [vmem:[#allocation2 + $0x151] sm:$0xff] %vm20_vm1, %v134_v40  ;;  %200 = vst.msk [vmem:[#allocation2 + $0x159] sm:$0xff] %vm20_vm1, %v135_v41  ;;  %v249_v0 = vld [vmem:[#allocation2 + $0xa9] sm:$0xff]  ;;  %v250_v2 = vld [vmem:[#allocation2 + $0xb1] sm:$0xff] }
  0x3b   :  { %9559 = vmatmul.mubr.msk.f32.gmra.mrb[4].mxu0 %vm20_vm1, %v242_v34  ;;  %201 = vst.msk [vmem:[#allocation2 + $0x169] sm:$0xff] %vm20_vm1, %v136_v42  ;;  %202 = vst.msk [vmem:[#allocation2 + $0x171] sm:$0xff] %vm20_vm1, %v137_v43  ;;  %9170 = vmatmul.mubr.msk.f32.gmra.mrb[6].mxu1 %vm20_vm1, %v242_v34  ;;  %v251_v3 = vld [vmem:[#allocation2 + $0xc1] sm:$0xff]  ;;  %v252_v12 = vld [vmem:[#allocation2 + $0xc9] sm:$0xff] }
  0x3c   :  { %9561 = vmatprep.mubr.msk.f32.mxu0 %vm20_vm1, %v243_v35  ;;  %203 = vst.msk [vmem:[#allocation2 + $0x181] sm:$0xff] %vm20_vm1, %v138_v45  ;;  %204 = vst.msk [vmem:[#allocation2 + $0x189] sm:$0xff] %vm20_vm1, %v139_v46  ;;  %9172 = vmatprep.mubr.msk.f32.mxu1 %vm20_vm1, %v243_v35  ;;  %v253_v15 = vld [vmem:[#allocation2 + $0xd9] sm:$0xff]  ;;  %v169_v21 = vld [vmem:[%s14199_s0 + $0x1e8] sm:$0xff] }
  0x3d   :  { %205 = vst.msk [vmem:[#allocation2 + $0x1c9] sm:$0xff] %vm20_vm1, %v140_v48  ;;  %206 = vst.msk [vmem:[#allocation2 + $0x1d1] sm:$0xff] %vm20_vm1, %v141_v49  ;;  %v170_v22 = vld [vmem:[%s14199_s0 + $0x1f0] sm:$0xff]  ;;  %v171_v23 = vld [vmem:[%s14199_s0 + $0x1f8] sm:$0xff] }
  0x3e   :  { %207 = vst.msk [vmem:[#allocation2 + $0x1e1] sm:$0xff] %vm20_vm1, %v142_v51  ;;  %208 = vst.msk [vmem:[#allocation2 + $0x1e9] sm:$0xff] %vm20_vm1, %v143_v52  ;;  %v254_v24 = vld [vmem:[#allocation2 + $0xe1] sm:$0xff]  ;;  %v11288_v25 = vld [vmem:[%s14200_s1 + $0x18] sm:$0xf] }
  0x3f   :  { %9562 = vmatmul.mubr.msk.f32.gmra.mrb[6].mxu0 %vm20_vm1, %v244_v44  ;;  %209 = vst.msk [vmem:[#allocation2 + $0x1f9] sm:$0xff] %vm20_vm1, %v144_v53  ;;  %210 = vst.msk [vmem:[#allocation2 + $0x201] sm:$0xff] %vm20_vm1, %v145_v54  ;;  %9173 = vmatmul.mubr.msk.f32.gmra.mrb[8].mxu1 %vm20_vm1, %v244_v44  ;;  %v255_v26 = vld [vmem:[#allocation2 + $0xf1] sm:$0xff]  ;;  %v256_v27 = vld [vmem:[#allocation2 + $0xf9] sm:$0xff] }
  0x40   :  { %9564 = vmatprep.mubr.msk.f32.mxu0 %vm20_vm1, %v245_v47  ;;  %211 = vst.msk [vmem:[#allocation2 + $0x211] sm:$0xff] %vm20_vm1, %v146_v55  ;;  %212 = vst.msk [vmem:[#allocation2 + $0x219] sm:$0xff] %vm20_vm1, %v147_v56  ;;  %9175 = vmatprep.mubr.msk.f32.mxu1 %vm20_vm1, %v245_v47  ;;  %v257_v28 = vld [vmem:[#allocation2 + $0x109] sm:$0xff]  ;;  %v258_v30 = vld [vmem:[#allocation2 + $0x111] sm:$0xff] }
  0x41   :  { %213 = vst.msk [vmem:[#allocation2 + $0x229] sm:$0xff] %vm20_vm1, %v148_v57  ;;  %214 = vst.msk [vmem:[#allocation2 + $0x231] sm:$0xff] %vm20_vm1, %v149_v58  ;;  %9746 = vmatprep.subr.msk.mxu0 %vm624_vm0, %v11288_v25  ;;  %v259_v31 = vld [vmem:[#allocation2 + $0x121] sm:$0xff]  ;;  %v260_v32 = vld [vmem:[#allocation2 + $0x129] sm:$0xff] }
  0x42   :  { %215 = vst.msk [vmem:[#allocation2 + $0x241] sm:$0xff] %vm20_vm1, %v150_v59  ;;  %216 = vst.msk [vmem:[#allocation2 + $0x249] sm:$0xff] %vm20_vm1, %v151_v61  ;;  %v261_v33 = vld [vmem:[#allocation2 + $0x139] sm:$0xff]  ;;  %v262_v34 = vld [vmem:[#allocation2 + $0x141] sm:$0xff] }
  0x43   :  { %9565 = vmatmul.mubr.msk.f32.gmra.mrb[8].mxu0 %vm20_vm1, %v246_v50  ;;  %217 = vst.msk [vmem:[#allocation2 + $0x259] sm:$0xff] %vm20_vm1, %v152_v63  ;;  %218 = vst.msk [vmem:[#allocation2 + $0x261] sm:$0xff] %vm20_vm1, %v153_v1  ;;  %9176 = vmatmul.mubr.msk.f32.gmra.mrb[10].mxu1 %vm20_vm1, %v246_v50  ;;  %v263_v35 = vld [vmem:[#allocation2 + $0x151] sm:$0xff]  ;;  %v264_v36 = vld [vmem:[#allocation2 + $0x159] sm:$0xff] }
  0x44   :  { %9567 = vmatprep.mubr.msk.f32.mxu0 %vm20_vm1, %v247_v60  ;;  %9178 = vmatprep.mubr.msk.f32.mxu1 %vm20_vm1, %v247_v60  ;;  %219 = vst.msk [vmem:[#allocation2 + $0x271] sm:$0xff] %vm20_vm1, %v154_v4  ;;  %220 = vst.msk [vmem:[#allocation2 + $0x279] sm:$0xff] %vm20_vm1, %v155_v5  ;;  %v265_v37 = vld [vmem:[#allocation2 + $0x169] sm:$0xff]  ;;  %v266_v38 = vld [vmem:[#allocation2 + $0x171] sm:$0xff] }
  0x45   :  { %221 = vst.msk [vmem:[#allocation2 + $0x289] sm:$0xff] %vm20_vm1, %v156_v6  ;;  %222 = vst.msk [vmem:[#allocation2 + $0x291] sm:$0xff] %vm20_vm1, %v157_v7  ;;  %v267_v39 = vld [vmem:[#allocation2 + $0x181] sm:$0xff] }
  0x46   :  { %223 = vst.msk [vmem:[#allocation2 + $0x2a1] sm:$0xff] %vm20_vm1, %v158_v8  ;;  %224 = vst.msk [vmem:[#allocation2 + $0x2a9] sm:$0xff] %vm20_vm1, %v159_v9 }
  0x47   :  { %9568 = vmatmul.mubr.msk.f32.gmra.mrb[10].mxu0 %vm20_vm1, %v248_v62  ;;  %9179 = vmatmul.mubr.msk.f32.gmra.mrb[12].mxu1 %vm20_vm1, %v248_v62  ;;  %225 = vst.msk [vmem:[#allocation2 + $0x2b9] sm:$0xff] %vm20_vm1, %v160_v10  ;;  %226 = vst.msk [vmem:[#allocation2 + $0x2c1] sm:$0xff] %vm20_vm1, %v161_v11 }
  0x48   :  { %9570 = vmatprep.mubr.msk.f32.mxu0 %vm20_vm1, %v249_v0  ;;  %9181 = vmatprep.mubr.msk.f32.mxu1 %vm20_vm1, %v249_v0  ;;  %227 = vst.msk [vmem:[#allocation2 + $0x2d1] sm:$0xff] %vm20_vm1, %v162_v13  ;;  %228 = vst.msk [vmem:[#allocation2 + $0x2d9] sm:$0xff] %vm20_vm1, %v163_v14 }
  0x49   :  { %229 = vst.msk [vmem:[#allocation2 + $0x2e9] sm:$0xff] %vm20_vm1, %v164_v16  ;;  %230 = vst.msk [vmem:[#allocation2 + $0x2f1] sm:$0xff] %vm20_vm1, %v165_v17 }
  0x4a   :  { %231 = vst.msk [vmem:[#allocation2 + $0x301] sm:$0xff] %vm20_vm1, %v166_v18  ;;  %232 = vst.msk [vmem:[#allocation2 + $0x309] sm:$0xff] %vm20_vm1, %v167_v19 }
  0x4b   :  { %9571 = vmatmul.mubr.msk.f32.gmra.mrb[12].mxu0 %vm20_vm1, %v250_v2  ;;  %9182 = vmatmul.mubr.msk.f32.gmra.mrb[14].mxu1 %vm20_vm1, %v250_v2  ;;  %233 = vst.msk [vmem:[#allocation2 + $0x319] sm:$0xff] %vm20_vm1, %v168_v20  ;;  %234 = vst.msk [vmem:[#allocation2 + $0x321] sm:$0xff] %vm20_vm1, %v169_v21 }
  0x4c   :  { %9573 = vmatprep.mubr.msk.f32.mxu0 %vm20_vm1, %v251_v3  ;;  %9184 = vmatprep.mubr.msk.f32.mxu1 %vm20_vm1, %v251_v3  ;;  %235 = vst.msk [vmem:[#allocation2 + $0x331] sm:$0xff] %vm20_vm1, %v170_v22  ;;  %236 = vst.msk [vmem:[#allocation2 + $0x339] sm:$0xff] %vm20_vm1, %v171_v23 }
  0x4f   :  { %9574 = vmatmul.mubr.msk.f32.gmra.mrb[14].mxu0 %vm20_vm1, %v252_v12  ;;  %9185 = vmatmul.mubr.msk.f32.gmra.mrb[16].mxu1 %vm20_vm1, %v252_v12 }
  0x50   :  { %9576 = vmatprep.mubr.msk.f32.mxu0 %vm20_vm1, %v253_v15  ;;  %9187 = vmatprep.mubr.msk.f32.mxu1 %vm20_vm1, %v253_v15 }
  0x53   :  { %9577 = vmatmul.mubr.msk.f32.gmra.mrb[16].mxu0 %vm20_vm1, %v254_v24  ;;  %9188 = vmatmul.mubr.msk.f32.gmra.mrb[18].mxu1 %vm20_vm1, %v254_v24 }
  0x54   :  { %9579 = vmatprep.mubr.msk.f32.mxu0 %vm20_vm1, %v255_v26  ;;  %9190 = vmatprep.mubr.msk.f32.mxu1 %vm20_vm1, %v255_v26 }
  0x57   :  { %9580 = vmatmul.mubr.msk.f32.gmra.mrb[18].mxu0 %vm20_vm1, %v256_v27  ;;  %9191 = vmatmul.mubr.msk.f32.gmra.mrb[20].mxu1 %vm20_vm1, %v256_v27 }
  0x58   :  { %9582 = vmatprep.mubr.msk.f32.mxu0 %vm20_vm1, %v257_v28  ;;  %9193 = vmatprep.mubr.msk.f32.mxu1 %vm20_vm1, %v257_v28 }
  0x5b   :  { %9583 = vmatmul.mubr.msk.f32.gmra.mrb[20].mxu0 %vm20_vm1, %v258_v30  ;;  %9194 = vmatmul.mubr.msk.f32.gmra.mrb[22].mxu1 %vm20_vm1, %v258_v30 }
  0x5c   :  { %9585 = vmatprep.mubr.msk.f32.mxu0 %vm20_vm1, %v259_v31  ;;  %9196 = vmatprep.mubr.msk.f32.mxu1 %vm20_vm1, %v259_v31 }
  0x5f   :  { %9586 = vmatmul.mubr.msk.f32.gmra.mrb[22].mxu0 %vm20_vm1, %v260_v32  ;;  %9197 = vmatmul.mubr.msk.f32.gmra.mrb[24].mxu1 %vm20_vm1, %v260_v32 }
  0x60   :  { %9588 = vmatprep.mubr.msk.f32.mxu0 %vm20_vm1, %v261_v33  ;;  %9199 = vmatprep.mubr.msk.f32.mxu1 %vm20_vm1, %v261_v33 }
  0x63   :  { %9589 = vmatmul.mubr.msk.f32.gmra.mrb[24].mxu0 %vm20_vm1, %v262_v34  ;;  %9200 = vmatmul.mubr.msk.f32.gmra.mrb[26].mxu1 %vm20_vm1, %v262_v34 }
  0x64   :  { %9591 = vmatprep.mubr.msk.f32.mxu0 %vm20_vm1, %v263_v35  ;;  %9202 = vmatprep.mubr.msk.f32.mxu1 %vm20_vm1, %v263_v35 }
  0x67   :  { %9592 = vmatmul.mubr.msk.f32.gmra.mrb[26].mxu0 %vm20_vm1, %v264_v36 }
  0x68   :  { %9594 = vmatprep.mubr.msk.f32.mxu0 %vm20_vm1, %v265_v37 }
  0x69   :  { %13 = vsyncpa [#allocation6], 0  ;;  %9203 = vmatmul.mubr.msk.f32.gmra.mrb[28].mxu1 %vm20_vm1, %v264_v36  ;;  %v268_v40 = vld [vmem:[#allocation2 + $0x189] sm:$0xff]  ;;  %v398_v41 = vld [vmem:[#allocation2 + $0x1b1] sm:$0xff]  ;;  %vm6500_vm4 = vcmask 64512   ;;  %vm6896_vm5 = vcmask 1040384  }
  0x6a   :  { %9205 = vmatprep.mubr.msk.f32.mxu1 %vm20_vm1, %v265_v37  ;;  %v269_v42 = vld [vmem:[#allocation2 + $0x1c9] sm:$0xff]  ;;  %v399_v43 = vld [vmem:[#allocation2 + $0x1b9] sm:$0xff]  ;;  %v270_v44 = vld [vmem:[#allocation2 + $0x1d1] sm:$0xff]  ;;  %vm6898_vm6 = vcmask 58368  }
  0x6b   :  { %9595 = vmatmul.mubr.msk.f32.gmra.mrb[28].mxu0 %vm20_vm1, %v266_v38  ;;  %v271_v45 = vld [vmem:[#allocation2 + $0x1e1] sm:$0xff]  ;;  %v272_v46 = vld [vmem:[#allocation2 + $0x1e9] sm:$0xff]  ;;  %v273_v47 = vld [vmem:[#allocation2 + $0x1f9] sm:$0xff] }
  0x6c   :  { %9597 = vmatprep.mubr.msk.f32.mxu0 %vm20_vm1, %v267_v39  ;;  %v274_v48 = vld [vmem:[#allocation2 + $0x201] sm:$0xff]  ;;  %v275_v49 = vld [vmem:[#allocation2 + $0x211] sm:$0xff]  ;;  %v276_v50 = vld [vmem:[#allocation2 + $0x219] sm:$0xff] }
  0x6d   :  { %9206 = vmatmul.mubr.msk.f32.gmra.mrb[30].mxu1 %vm20_vm1, %v266_v38  ;;  %v277_v51 = vld [vmem:[#allocation2 + $0x229] sm:$0xff]  ;;  %v278_v52 = vld [vmem:[#allocation2 + $0x231] sm:$0xff]  ;;  %v279_v53 = vld [vmem:[#allocation2 + $0x241] sm:$0xff] }
  0x6e   :  { %9208 = vmatprep.mubr.msk.f32.mxu1 %vm20_vm1, %v398_v41  ;;  %v280_v54 = vld [vmem:[#allocation2 + $0x249] sm:$0xff]  ;;  %v281_v55 = vld [vmem:[#allocation2 + $0x259] sm:$0xff]  ;;  %v282_v56 = vld [vmem:[#allocation2 + $0x261] sm:$0xff] }
  0x6f   :  { %9598 = vmatmul.mubr.msk.f32.gmra.mrb[30].mxu0 %vm20_vm1, %v268_v40  ;;  %v283_v57 = vld [vmem:[#allocation2 + $0x271] sm:$0xff]  ;;  %v284_v58 = vld [vmem:[#allocation2 + $0x279] sm:$0xff]  ;;  %v285_v59 = vld [vmem:[#allocation2 + $0x289] sm:$0xff] }
  0x70   :  { %9600 = vmatprep.mubr.msk.f32.mxu0 %vm20_vm1, %v269_v42  ;;  %v286_v60 = vld [vmem:[#allocation2 + $0x291] sm:$0xff]  ;;  %v287_v61 = vld [vmem:[#allocation2 + $0x2a1] sm:$0xff]  ;;  %v288_v62 = vld [vmem:[#allocation2 + $0x2a9] sm:$0xff] }
  0x71   :  { %9209 = vmatmul.mubr.msk.f32.gmra.mrb[32].mxu1 %vm20_vm1, %v399_v43  ;;  %v289_v63 = vld [vmem:[#allocation2 + $0x2b9] sm:$0xff]  ;;  %v290_v0 = vld [vmem:[#allocation2 + $0x2c1] sm:$0xff]  ;;  %v291_v1 = vld [vmem:[#allocation2 + $0x2d1] sm:$0xff] }
  0x72   :  { %9211 = vmatprep.mubr.msk.f32.mxu1 %vm20_vm1, %v269_v42  ;;  %v292_v2 = vld [vmem:[#allocation2 + $0x2d9] sm:$0xff]  ;;  %v293_v3 = vld [vmem:[#allocation2 + $0x2e9] sm:$0xff]  ;;  %v294_v4 = vld [vmem:[#allocation2 + $0x2f1] sm:$0xff] }
  0x73   :  { %9601 = vmatmul.mubr.msk.f32.gmra.mrb[32].mxu0 %vm20_vm1, %v270_v44  ;;  %v295_v5 = vld [vmem:[#allocation2 + $0x301] sm:$0xff]  ;;  %v296_v6 = vld [vmem:[#allocation2 + $0x309] sm:$0xff]  ;;  %v297_v7 = vld [vmem:[#allocation2 + $0x319] sm:$0xff] }
  0x74   :  { %9603 = vmatprep.mubr.msk.f32.mxu0 %vm20_vm1, %v271_v45  ;;  %v298_v8 = vld [vmem:[#allocation2 + $0x321] sm:$0xff]  ;;  %v299_v9 = vld [vmem:[#allocation2 + $0x331] sm:$0xff]  ;;  %v300_v10 = vld [vmem:[#allocation2 + $0x339] sm:$0xff] }
  0x75   :  { %9212 = vmatmul.mubr.msk.f32.gmra.mrb[34].mxu1 %vm20_vm1, %v270_v44  ;;  %v301_v11 = vld [vmem:[#allocation2] sm:$0xff]  ;;  %v302_v13 = vld [vmem:[#allocation2 + $0x8] sm:$0xff]  ;;  %v11400_v15 = vld [vmem:[#allocation2 + $0x18] sm:$0xff] }
  0x76   :  { %9214 = vmatprep.mubr.msk.f32.mxu1 %vm20_vm1, %v271_v45  ;;  %v11391_v12 = vld [vmem:[#allocation2 + $0x1a] sm:$0xff]  ;;  %v11398_v14 = vld [vmem:[#allocation2 + $0x22] sm:$0xff]  ;;  %14348 = vst [vmem:[#allocation9_spill] sm:$0xff] %v11400_v15  ;;  %v11402_v16 = vld [vmem:[#allocation2 + $0x32] sm:$0xff] }
  0x77   :  { %9604 = vmatmul.mubr.msk.f32.gmra.mrb[34].mxu0 %vm20_vm1, %v272_v46  ;;  %v11410_v17 = vld [vmem:[%s14200_s1 + $0x1c] sm:$0xf]  ;;  %v11416_v18 = vld [vmem:[#allocation2 + $0x20] sm:$0xff]  ;;  %v11423_v20 = vld [vmem:[%s14200_s1 + $0xc] sm:$0xf] }
  0x78   :  { %9606 = vmatprep.mubr.msk.f32.mxu0 %vm20_vm1, %v273_v47  ;;  %14349 = vst [vmem:[#allocation10_spill] sm:$0xff] %v11416_v18  ;;  %v11418_v19 = vld [vmem:[#allocation2 + $0x3a] sm:$0xff]  ;;  %v11429_v21 = vld [vmem:[#allocation2 + $0x30] sm:$0xff]  ;;  %v11451_v26 = vld [vmem:[#allocation2 + $0x62] sm:$0xff] }
  0x79   :  { %9215 = vmatmul.mubr.msk.f32.gmra.mrb[36].mxu1 %vm20_vm1, %v272_v46  ;;  %v11431_v22 = vld [vmem:[#allocation2 + $0x4a] sm:$0xff]  ;;  %v11445_v23 = vld [vmem:[#allocation2 + $0x38] sm:$0xff]  ;;  %v11479_v32 = vld [vmem:[#allocation2 + $0x82] sm:$0xff] }
  0x7a   :  { %9217 = vmatprep.mubr.msk.f32.mxu1 %vm20_vm1, %v273_v47  ;;  %v11447_v24 = vld [vmem:[#allocation2 + $0x52] sm:$0xff]  ;;  %v11463_v28 = vld [vmem:[#allocation2 + $0x6a] sm:$0xff]  ;;  %v11467_v30 = vld [vmem:[#allocation2 + $0x7a] sm:$0xff] }
  0x7b   :  { %9607 = vmatmul.mubr.msk.f32.gmra.mrb[36].mxu0 %vm20_vm1, %v274_v48  ;;  %v11461_v27 = vld [vmem:[#allocation2 + $0x50] sm:$0xff]  ;;  %v11477_v31 = vld [vmem:[#allocation2 + $0x68] sm:$0xff]  ;;  %v11481_v33 = vld [vmem:[#allocation2 + $0x78] sm:$0xff] }
  0x7c   :  { %9609 = vmatprep.mubr.msk.f32.mxu0 %vm20_vm1, %v275_v49  ;;  %v11483_v34 = vld [vmem:[#allocation2 + $0x92] sm:$0xff]  ;;  %v11493_v35 = vld [vmem:[#allocation2 + $0x80] sm:$0xff]  ;;  %v11499_v38 = vld [vmem:[#allocation2 + $0xaa] sm:$0xff] }
  0x7d   :  { %9218 = vmatmul.mubr.msk.f32.gmra.mrb[38].mxu1 %vm20_vm1, %v274_v48  ;;  %v11495_v36 = vld [vmem:[#allocation2 + $0x9a] sm:$0xff]  ;;  %v11497_v37 = vld [vmem:[#allocation2 + $0x90] sm:$0xff]  ;;  %v11513_v41 = vld [vmem:[#allocation2 + $0xa8] sm:$0xff] }
  0x7e   :  { %9220 = vmatprep.mubr.msk.f32.mxu1 %vm20_vm1, %v275_v49  ;;  %v11509_v39 = vld [vmem:[#allocation2 + $0x98] sm:$0xff]  ;;  %v11515_v42 = vld [vmem:[#allocation2 + $0xc2] sm:$0xff]  ;;  %v11525_v43 = vld [vmem:[#allocation2 + $0xb0] sm:$0xff] }
  0x7f   :  { %9610 = vmatmul.mubr.msk.f32.gmra.mrb[38].mxu0 %vm20_vm1, %v276_v50  ;;  %v11511_v40 = vld [vmem:[#allocation2 + $0xb2] sm:$0xff]  ;;  %v11527_v44 = vld [vmem:[#allocation2 + $0xca] sm:$0xff]  ;;  %v11529_v45 = vld [vmem:[#allocation2 + $0xc0] sm:$0xff] }
  0x80   :  { %9612 = vmatprep.mubr.msk.f32.mxu0 %vm20_vm1, %v277_v51  ;;  %v11531_v46 = vld [vmem:[#allocation2 + $0xda] sm:$0xff]  ;;  %v11541_v47 = vld [vmem:[#allocation2 + $0xc8] sm:$0xff] }
  0x81   :  { %9221 = vmatmul.mubr.msk.f32.gmra.mrb[40].mxu1 %vm20_vm1, %v276_v50  ;;  %v11543_v48 = vld [vmem:[#allocation2 + $0xe2] sm:$0xff]  ;;  %v11545_v49 = vld [vmem:[#allocation2 + $0xd8] sm:$0xff] }
  0x82   :  { %9223 = vmatprep.mubr.msk.f32.mxu1 %vm20_vm1, %v277_v51  ;;  %v11547_v50 = vld [vmem:[#allocation2 + $0xf2] sm:$0xff]  ;;  %v11557_v51 = vld [vmem:[#allocation2 + $0xe0] sm:$0xff] }
  0x83   :  { %9613 = vmatmul.mubr.msk.f32.gmra.mrb[40].mxu0 %vm20_vm1, %v278_v52 }
  0x84   :  { %9615 = vmatprep.mubr.msk.f32.mxu0 %vm20_vm1, %v279_v53 }
  0x85   :  { %9224 = vmatmul.mubr.msk.f32.gmra.mrb[42].mxu1 %vm20_vm1, %v278_v52  ;;  %v11559_v52 = vld [vmem:[#allocation2 + $0xfa] sm:$0xff] }
  0x86   :  { %9226 = vmatprep.mubr.msk.f32.mxu1 %vm20_vm1, %v279_v53  ;;  %v11561_v53 = vld [vmem:[#allocation2 + $0xf0] sm:$0xff] }
  0x87   :  { %9616 = vmatmul.mubr.msk.f32.gmra.mrb[42].mxu0 %vm20_vm1, %v280_v54 }
  0x88   :  { %9618 = vmatprep.mubr.msk.f32.mxu0 %vm20_vm1, %v281_v55 }
  0x89   :  { %9227 = vmatmul.mubr.msk.f32.gmra.mrb[44].mxu1 %vm20_vm1, %v280_v54  ;;  %v11563_v54 = vld [vmem:[#allocation2 + $0x10a] sm:$0xff] }
  0x8a   :  { %9229 = vmatprep.mubr.msk.f32.mxu1 %vm20_vm1, %v281_v55  ;;  %v11573_v55 = vld [vmem:[#allocation2 + $0xf8] sm:$0xff] }
  0x8b   :  { %9619 = vmatmul.mubr.msk.f32.gmra.mrb[44].mxu0 %vm20_vm1, %v282_v56 }
  0x8c   :  { %9621 = vmatprep.mubr.msk.f32.mxu0 %vm20_vm1, %v283_v57 }
  0x8d   :  { %9230 = vmatmul.mubr.msk.f32.gmra.mrb[46].mxu1 %vm20_vm1, %v282_v56  ;;  %v11575_v56 = vld [vmem:[#allocation2 + $0x112] sm:$0xff] }
  0x8e   :  { %9232 = vmatprep.mubr.msk.f32.mxu1 %vm20_vm1, %v283_v57  ;;  %v11577_v57 = vld [vmem:[#allocation2 + $0x108] sm:$0xff] }
  0x8f   :  { %9622 = vmatmul.mubr.msk.f32.gmra.mrb[46].mxu0 %vm20_vm1, %v284_v58 }
  0x90   :  { %9624 = vmatprep.mubr.msk.f32.mxu0 %vm20_vm1, %v285_v59 }
  0x91   :  { %9233 = vmatmul.mubr.msk.f32.gmra.mrb[48].mxu1 %vm20_vm1, %v284_v58  ;;  %v11579_v58 = vld [vmem:[#allocation2 + $0x122] sm:$0xff] }
  0x92   :  { %9235 = vmatprep.mubr.msk.f32.mxu1 %vm20_vm1, %v285_v59  ;;  %v11589_v59 = vld [vmem:[#allocation2 + $0x110] sm:$0xff] }
  0x93   :  { %9625 = vmatmul.mubr.msk.f32.gmra.mrb[48].mxu0 %vm20_vm1, %v286_v60 }
  0x94   :  { %9627 = vmatprep.mubr.msk.f32.mxu0 %vm20_vm1, %v287_v61 }
  0x95   :  { %9236 = vmatmul.mubr.msk.f32.gmra.mrb[50].mxu1 %vm20_vm1, %v286_v60  ;;  %v11591_v60 = vld [vmem:[#allocation2 + $0x12a] sm:$0xff] }
  0x96   :  { %9238 = vmatprep.mubr.msk.f32.mxu1 %vm20_vm1, %v287_v61  ;;  %v11593_v61 = vld [vmem:[#allocation2 + $0x120] sm:$0xff] }
  0x97   :  { %9628 = vmatmul.mubr.msk.f32.gmra.mrb[50].mxu0 %vm20_vm1, %v288_v62 }
  0x98   :  { %9630 = vmatprep.mubr.msk.f32.mxu0 %vm20_vm1, %v289_v63 }
  0x99   :  { %9239 = vmatmul.mubr.msk.f32.gmra.mrb[52].mxu1 %vm20_vm1, %v288_v62  ;;  %v11595_v62 = vld [vmem:[#allocation2 + $0x13a] sm:$0xff] }
  0x9a   :  { %9241 = vmatprep.mubr.msk.f32.mxu1 %vm20_vm1, %v289_v63  ;;  %v11605_v63 = vld [vmem:[#allocation2 + $0x128] sm:$0xff] }
  0x9b   :  { %9631 = vmatmul.mubr.msk.f32.gmra.mrb[52].mxu0 %vm20_vm1, %v290_v0 }
  0x9c   :  { %9633 = vmatprep.mubr.msk.f32.mxu0 %vm20_vm1, %v291_v1 }
  0x9d   :  { %9242 = vmatmul.mubr.msk.f32.gmra.mrb[54].mxu1 %vm20_vm1, %v290_v0  ;;  %v11607_v0 = vld [vmem:[#allocation2 + $0x142] sm:$0xff] }
  0x9e   :  { %9244 = vmatprep.mubr.msk.f32.mxu1 %vm20_vm1, %v291_v1  ;;  %v11609_v1 = vld [vmem:[#allocation2 + $0x138] sm:$0xff] }
  0x9f   :  { %9634 = vmatmul.mubr.msk.f32.gmra.mrb[54].mxu0 %vm20_vm1, %v292_v2 }
  0xa0   :  { %9636 = vmatprep.mubr.msk.f32.mxu0 %vm20_vm1, %v293_v3 }
  0xa1   :  { %9245 = vmatmul.mubr.msk.f32.gmra.mrb[56].mxu1 %vm20_vm1, %v292_v2  ;;  %v11611_v2 = vld [vmem:[#allocation2 + $0x152] sm:$0xff] }
  0xa2   :  { %9247 = vmatprep.mubr.msk.f32.mxu1 %vm20_vm1, %v293_v3  ;;  %14350 = vst [vmem:[#allocation11_spill] sm:$0xff] %v11611_v2  ;;  %v11621_v3 = vld [vmem:[#allocation2 + $0x140] sm:$0xff] }
  0xa3   :  { %9637 = vmatmul.mubr.msk.f32.gmra.mrb[56].mxu0 %vm20_vm1, %v294_v4 }
  0xa4   :  { %9639 = vmatprep.mubr.msk.f32.mxu0 %vm20_vm1, %v295_v5 }
  0xa5   :  { %9248 = vmatmul.mubr.msk.f32.gmra.mrb[58].mxu1 %vm20_vm1, %v294_v4  ;;  %v11623_v4 = vld [vmem:[#allocation2 + $0x15a] sm:$0xff] }
  0xa6   :  { %9250 = vmatprep.mubr.msk.f32.mxu1 %vm20_vm1, %v295_v5  ;;  %14351 = vst [vmem:[#allocation12_spill] sm:$0xff] %v11623_v4  ;;  %v11625_v5 = vld [vmem:[#allocation2 + $0x150] sm:$0xff] }
  0xa7   :  { %9640 = vmatmul.mubr.msk.f32.gmra.mrb[58].mxu0 %vm20_vm1, %v296_v6 }
  0xa8   :  { %9642 = vmatprep.mubr.msk.f32.mxu0 %vm20_vm1, %v297_v7 }
  0xa9   :  { %9251 = vmatmul.mubr.msk.f32.gmra.mrb[60].mxu1 %vm20_vm1, %v296_v6  ;;  %v11627_v6 = vld [vmem:[#allocation2 + $0x16a] sm:$0xff] }
  0xaa   :  { %9253 = vmatprep.mubr.msk.f32.mxu1 %vm20_vm1, %v297_v7  ;;  %14352 = vst [vmem:[#allocation13_spill] sm:$0xff] %v11627_v6  ;;  %v11637_v7 = vld [vmem:[#allocation2 + $0x158] sm:$0xff] }
  0xab   :  { %9643 = vmatmul.mubr.msk.f32.gmra.mrb[60].mxu0 %vm20_vm1, %v298_v8 }
  0xac   :  { %9645 = vmatprep.mubr.msk.f32.mxu0 %vm20_vm1, %v299_v9  ;;  %v11641_v9 = vld [vmem:[#allocation2 + $0x168] sm:$0xff] }
  0xad   :  { %9254 = vmatmul.mubr.msk.f32.gmra.mrb[62].mxu1 %vm20_vm1, %v298_v8  ;;  %v11639_v8 = vld [vmem:[#allocation2 + $0x172] sm:$0xff] }
  0xae   :  { %9258 = vmatprep.mubr.msk.f32.mxu1 %vm20_vm1, %v301_v11  ;;  %14353 = vst [vmem:[#allocation14_spill] sm:$0xff] %v11639_v8  ;;  %v11650_v11 = vld [vmem:[#allocation2 + $0x170] sm:$0xff] }
  0xaf   :  { %9646 = vmatmul.mubr.msk.f32.gmra.mrb[62].mxu0 %vm20_vm1, %v300_v10  ;;  %v3689_v10 = vld [vmem:[#allocation2 + $0x182] sm:$0xff] }
  0xb0   :  { %9650 = vmatprep.mubr.msk.f32.mxu0 %vm20_vm1, %v11391_v12 }
  0xb1   :  { %9259 = vmatmul.mubr.msk.f32.vlgmr.msra.gmra.mrb[0].mxu1 %vm20_vm1, %v302_v13  ;;  %v3690_v13 = vld [vmem:[#allocation2 + $0x18a] sm:$0xff] }
  0xb2   :  { %9355 = vmatpush3.msk.msra.mxu1 %vm624_vm0, %v11299_v29  ;;  %9261 = vmatprep.mubr.msk.f32.mxu1 %vm20_vm1, %v11400_v15  ;;  %v11465_v29 = vld [vmem:[#allocation2 + $0x60] sm:$0xff]  ;;  %v11652_v15 = vld [vmem:[#allocation2 + $0x1ca] sm:$0xff] }
  0xb3   :  { %9651 = vmatmul.mubr.msk.f32.vlgmr.msra.gmra.mrb[0].mxu0 %vm20_vm1, %v11398_v14  ;;  %9452 = vmatprep.subr.msk.mxu1 %vm624_vm0, %v11423_v20  ;;  %14354 = vst [vmem:[#allocation15_spill] sm:$0xff] %v11652_v15 }
  0xb4   :  { %9747 = vmatpush3.msk.msra.mxu0 %vm624_vm0, %v11288_v25  ;;  %9653 = vmatprep.mubr.msk.f32.mxu0 %vm20_vm1, %v11402_v16  ;;  %v11449_v25 = vld [vmem:[#allocation2 + $0x48] sm:$0xff] }
  0xb5   :  { %9844 = vmatprep.subr.msk.mxu0 %vm624_vm0, %v11410_v17  ;;  %9262 = vmatmul.mubr.msk.f32.gmra.mrb[2].mxu1 %vm20_vm1, %v11416_v18  ;;  %v333_v18 = vld [vmem:[#allocation2 + $0x1b0] sm:$0xff] }
  0xb6   :  { %9264 = vmatprep.mubr.msk.f32.mxu1 %vm20_vm1, %v11429_v21 }
  0xb7   :  { %9654 = vmatmul.mubr.msk.f32.gmra.mrb[2].mxu0 %vm20_vm1, %v11418_v19 }
  0xb8   :  { %9656 = vmatprep.mubr.msk.f32.mxu0 %vm20_vm1, %v11431_v22 }
  0xb9   :  { %9265 = vmatmul.mubr.msk.f32.gmra.mrb[4].mxu1 %vm20_vm1, %v11445_v23 }
  0xba   :  { %9267 = vmatprep.mubr.msk.f32.mxu1 %vm20_vm1, %v11449_v25 }
  0xbb   :  { %9657 = vmatmul.mubr.msk.f32.gmra.mrb[4].mxu0 %vm20_vm1, %v11447_v24 }
  0xbc   :  { %9659 = vmatprep.mubr.msk.f32.mxu0 %vm20_vm1, %v11451_v26 }
  0xbd   :  { %9268 = vmatmul.mubr.msk.f32.gmra.mrb[6].mxu1 %vm20_vm1, %v11461_v27 }
  0xbe   :  { %9270 = vmatprep.mubr.msk.f32.mxu1 %vm20_vm1, %v11465_v29 }
  0xbf   :  { %9660 = vmatmul.mubr.msk.f32.gmra.mrb[6].mxu0 %vm20_vm1, %v11463_v28 }
  0xc0   :  { %9662 = vmatprep.mubr.msk.f32.mxu0 %vm20_vm1, %v11467_v30 }
  0xc1   :  { %9271 = vmatmul.mubr.msk.f32.gmra.mrb[8].mxu1 %vm20_vm1, %v11477_v31 }
  0xc2   :  { %9273 = vmatprep.mubr.msk.f32.mxu1 %vm20_vm1, %v11481_v33 }
  0xc3   :  { %9663 = vmatmul.mubr.msk.f32.gmra.mrb[8].mxu0 %vm20_vm1, %v11479_v32 }
  0xc4   :  { %9665 = vmatprep.mubr.msk.f32.mxu0 %vm20_vm1, %v11483_v34 }
  0xc5   :  { %9274 = vmatmul.mubr.msk.f32.gmra.mrb[10].mxu1 %vm20_vm1, %v11493_v35 }
  0xc6   :  { %9276 = vmatprep.mubr.msk.f32.mxu1 %vm20_vm1, %v11497_v37 }
  0xc7   :  { %9666 = vmatmul.mubr.msk.f32.gmra.mrb[10].mxu0 %vm20_vm1, %v11495_v36 }
  0xc8   :  { %9668 = vmatprep.mubr.msk.f32.mxu0 %vm20_vm1, %v11499_v38 }
  0xc9   :  { %9277 = vmatmul.mubr.msk.f32.gmra.mrb[12].mxu1 %vm20_vm1, %v11509_v39 }
  0xca   :  { %9279 = vmatprep.mubr.msk.f32.mxu1 %vm20_vm1, %v11513_v41 }
  0xcb   :  { %9669 = vmatmul.mubr.msk.f32.gmra.mrb[12].mxu0 %vm20_vm1, %v11511_v40 }
  0xcc   :  { %9671 = vmatprep.mubr.msk.f32.mxu0 %vm20_vm1, %v11515_v42 }
  0xcd   :  { %9280 = vmatmul.mubr.msk.f32.gmra.mrb[14].mxu1 %vm20_vm1, %v11525_v43 }
  0xce   :  { %9282 = vmatprep.mubr.msk.f32.mxu1 %vm20_vm1, %v11529_v45 }
  0xcf   :  { %9672 = vmatmul.mubr.msk.f32.gmra.mrb[14].mxu0 %vm20_vm1, %v11527_v44 }
  0xd0   :  { %9674 = vmatprep.mubr.msk.f32.mxu0 %vm20_vm1, %v11531_v46 }
  0xd1   :  { %9283 = vmatmul.mubr.msk.f32.gmra.mrb[16].mxu1 %vm20_vm1, %v11541_v47 }
  0xd2   :  { %9285 = vmatprep.mubr.msk.f32.mxu1 %vm20_vm1, %v11545_v49 }
  0xd3   :  { %9675 = vmatmul.mubr.msk.f32.gmra.mrb[16].mxu0 %vm20_vm1, %v11543_v48 }
  0xd4   :  { %9677 = vmatprep.mubr.msk.f32.mxu0 %vm20_vm1, %v11547_v50 }
  0xd5   :  { %9286 = vmatmul.mubr.msk.f32.gmra.mrb[18].mxu1 %vm20_vm1, %v11557_v51 }
  0xd6   :  { %9288 = vmatprep.mubr.msk.f32.mxu1 %vm20_vm1, %v11561_v53 }
  0xd7   :  { %9678 = vmatmul.mubr.msk.f32.gmra.mrb[18].mxu0 %vm20_vm1, %v11559_v52 }
  0xd8   :  { %9680 = vmatprep.mubr.msk.f32.mxu0 %vm20_vm1, %v11563_v54 }
  0xd9   :  { %9289 = vmatmul.mubr.msk.f32.gmra.mrb[20].mxu1 %vm20_vm1, %v11573_v55 }
  0xda   :  { %9291 = vmatprep.mubr.msk.f32.mxu1 %vm20_vm1, %v11577_v57 }
  0xdb   :  { %9681 = vmatmul.mubr.msk.f32.gmra.mrb[20].mxu0 %vm20_vm1, %v11575_v56 }
  0xdc   :  { %9683 = vmatprep.mubr.msk.f32.mxu0 %vm20_vm1, %v11579_v58 }
  0xdd   :  { %9292 = vmatmul.mubr.msk.f32.gmra.mrb[22].mxu1 %vm20_vm1, %v11589_v59 }
  0xde   :  { %9294 = vmatprep.mubr.msk.f32.mxu1 %vm20_vm1, %v11593_v61 }
  0xdf   :  { %9684 = vmatmul.mubr.msk.f32.gmra.mrb[22].mxu0 %vm20_vm1, %v11591_v60 }
  0xe0   :  { %9686 = vmatprep.mubr.msk.f32.mxu0 %vm20_vm1, %v11595_v62 }
  0xe1   :  { %9295 = vmatmul.mubr.msk.f32.gmra.mrb[24].mxu1 %vm20_vm1, %v11605_v63 }
  0xe2   :  { %9297 = vmatprep.mubr.msk.f32.mxu1 %vm20_vm1, %v11609_v1 }
  0xe3   :  { %9687 = vmatmul.mubr.msk.f32.gmra.mrb[24].mxu0 %vm20_vm1, %v11607_v0 }
  0xe4   :  { %9689 = vmatprep.mubr.msk.f32.mxu0 %vm20_vm1, %v11611_v2  ;;  %v11674_v2 = vld [vmem:[#allocation2 + $0x1fa] sm:$0xff] }
  0xe5   :  { %9298 = vmatmul.mubr.msk.f32.gmra.mrb[26].mxu1 %vm20_vm1, %v11621_v3  ;;  %14359 = vst [vmem:[#allocation20_spill] sm:$0xff] %v11674_v2 }
  0xe6   :  { %9300 = vmatprep.mubr.msk.f32.mxu1 %vm20_vm1, %v11625_v5 }
  0xe7   :  { %9690 = vmatmul.mubr.msk.f32.gmra.mrb[26].mxu0 %vm20_vm1, %v11623_v4  ;;  %v11662_v4 = vld [vmem:[#allocation2 + $0x1e2] sm:$0xff] }
  0xe8   :  { %9692 = vmatprep.mubr.msk.f32.mxu0 %vm20_vm1, %v11627_v6  ;;  %v11660_v6 = vld [vmem:[#allocation2 + $0x1d2] sm:$0xff]  ;;  %14356 = vst [vmem:[#allocation17_spill] sm:$0xff] %v11662_v4 }
  0xe9   :  { %9301 = vmatmul.mubr.msk.f32.gmra.mrb[28].mxu1 %vm20_vm1, %v11637_v7  ;;  %14355 = vst [vmem:[#allocation16_spill] sm:$0xff] %v11660_v6 }
  0xea   :  { %9303 = vmatprep.mubr.msk.f32.mxu1 %vm20_vm1, %v11641_v9 }
  0xeb   :  { %9693 = vmatmul.mubr.msk.f32.gmra.mrb[28].mxu0 %vm20_vm1, %v11639_v8  ;;  %v334_v8 = vld [vmem:[#allocation2 + $0x1b8] sm:$0xff] }
  0xec   :  { %9695 = vmatprep.mubr.msk.f32.mxu0 %vm20_vm1, %v3689_v10  ;;  %v335_v10 = vld [vmem:[#allocation2 + $0x1c8] sm:$0xff] }
  0xed   :  { %9304 = vmatmul.mubr.msk.f32.gmra.mrb[30].mxu1 %vm20_vm1, %v11650_v11 }
  0xee   :  { %9306 = vmatprep.mubr.msk.f32.mxu1 %vm20_vm1, %v333_v18  ;;  %v336_v18 = vld [vmem:[#allocation2 + $0x1d0] sm:$0xff] }
  0xef   :  { %9696 = vmatmul.mubr.msk.f32.gmra.mrb[30].mxu0 %vm20_vm1, %v3690_v13  ;;  %v11670_v13 = vld [vmem:[#allocation2 + $0x1ea] sm:$0xff] }
  0xf0   :  { %9698 = vmatprep.mubr.msk.f32.mxu0 %vm20_vm1, %v11652_v15  ;;  %14357 = vst [vmem:[#allocation18_spill] sm:$0xff] %v11670_v13  ;;  %v11672_v15 = vld [vmem:[#allocation2 + $0x1e0] sm:$0xff] }
  0xf1   :  { %9307 = vmatmul.mubr.msk.f32.gmra.mrb[32].mxu1 %vm20_vm1, %v334_v8  ;;  %14358 = vst [vmem:[#allocation19_spill] sm:$0xff] %v11672_v15  ;;  %v11683_v8 = vld [vmem:[#allocation2 + $0x1e8] sm:$0xff] }
  0xf2   :  { %9309 = vmatprep.mubr.msk.f32.mxu1 %vm20_vm1, %v335_v10  ;;  %14360 = vst [vmem:[#allocation21_spill] sm:$0xff] %v11683_v8  ;;  %v11685_v10 = vld [vmem:[#allocation2 + $0x202] sm:$0xff] }
  0xf3   :  { %9699 = vmatmul.mubr.msk.f32.gmra.mrb[32].mxu0 %vm20_vm1, %v11660_v6  ;;  %14361 = vst [vmem:[#allocation22_spill] sm:$0xff] %v11685_v10  ;;  %v11689_v6 = vld [vmem:[#allocation2 + $0x212] sm:$0xff] }
  0xf4   :  { %9701 = vmatprep.mubr.msk.f32.mxu0 %vm20_vm1, %v11662_v4  ;;  %v11687_v4 = vld [vmem:[#allocation2 + $0x1f8] sm:$0xff]  ;;  %14363 = vst [vmem:[#allocation24_spill] sm:$0xff] %v11689_v6 }
  0xf5   :  { %9310 = vmatmul.mubr.msk.f32.gmra.mrb[34].mxu1 %vm20_vm1, %v336_v18  ;;  %14362 = vst [vmem:[#allocation23_spill] sm:$0xff] %v11687_v4  ;;  %v11699_v18 = vld [vmem:[#allocation2 + $0x200] sm:$0xff] }
  0xf6   :  { %9312 = vmatprep.mubr.msk.f32.mxu1 %vm20_vm1, %v11672_v15  ;;  %14364 = vst [vmem:[#allocation25_spill] sm:$0xff] %v11699_v18  ;;  %v11705_v15 = vld [vmem:[#allocation2 + $0x22a] sm:$0xff] }
  0xf7   :  { %9702 = vmatmul.mubr.msk.f32.gmra.mrb[34].mxu0 %vm20_vm1, %v11670_v13  ;;  %v11703_v13 = vld [vmem:[#allocation2 + $0x210] sm:$0xff]  ;;  %14367 = vst [vmem:[#allocation28_spill] sm:$0xff] %v11705_v15 }
  0xf8   :  { %9704 = vmatprep.mubr.msk.f32.mxu0 %vm20_vm1, %v11674_v2  ;;  %v11701_v2 = vld [vmem:[#allocation2 + $0x21a] sm:$0xff]  ;;  %14366 = vst [vmem:[#allocation27_spill] sm:$0xff] %v11703_v13 }
  0xf9   :  { %9313 = vmatmul.mubr.msk.f32.gmra.mrb[36].mxu1 %vm20_vm1, %v11683_v8  ;;  %14365 = vst [vmem:[#allocation26_spill] sm:$0xff] %v11701_v2  ;;  %v11721_v8 = vld [vmem:[#allocation2 + $0x242] sm:$0xff] }
  0xfa   :  { %9315 = vmatprep.mubr.msk.f32.mxu1 %vm20_vm1, %v11687_v4  ;;  %v11719_v4 = vld [vmem:[#allocation2 + $0x228] sm:$0xff]  ;;  %14371 = vst [vmem:[#allocation32_spill] sm:$0xff] %v11721_v8 }
  0xfb   :  { %9705 = vmatmul.mubr.msk.f32.gmra.mrb[36].mxu0 %vm20_vm1, %v11685_v10  ;;  %v11717_v10 = vld [vmem:[#allocation2 + $0x232] sm:$0xff]  ;;  %14370 = vst [vmem:[#allocation31_spill] sm:$0xff] %v11719_v4 }
  0xfc   :  { %9707 = vmatprep.mubr.msk.f32.mxu0 %vm20_vm1, %v11689_v6  ;;  %v11715_v6 = vld [vmem:[#allocation2 + $0x218] sm:$0xff]  ;;  %14369 = vst [vmem:[#allocation30_spill] sm:$0xff] %v11717_v10 }
  0xfd   :  { %9316 = vmatmul.mubr.msk.f32.gmra.mrb[38].mxu1 %vm20_vm1, %v11699_v18  ;;  %14368 = vst [vmem:[#allocation29_spill] sm:$0xff] %v11715_v6  ;;  %v11737_v18 = vld [vmem:[#allocation2 + $0x25a] sm:$0xff] }
  0xfe   :  { %9318 = vmatprep.mubr.msk.f32.mxu1 %vm20_vm1, %v11703_v13  ;;  %v11735_v13 = vld [vmem:[#allocation2 + $0x240] sm:$0xff]  ;;  %14375 = vst [vmem:[#allocation36_spill] sm:$0xff] %v11737_v18 }
  0xff   :  { %9708 = vmatmul.mubr.msk.f32.gmra.mrb[38].mxu0 %vm20_vm1, %v11701_v2  ;;  %v11733_v2 = vld [vmem:[#allocation2 + $0x24a] sm:$0xff]  ;;  %14374 = vst [vmem:[#allocation35_spill] sm:$0xff] %v11735_v13 }
 0x100   :  { %9710 = vmatprep.mubr.msk.f32.mxu0 %vm20_vm1, %v11705_v15  ;;  %v11731_v15 = vld [vmem:[#allocation2 + $0x230] sm:$0xff]  ;;  %14373 = vst [vmem:[#allocation34_spill] sm:$0xff] %v11733_v2 }
 0x101   :  { %9319 = vmatmul.mubr.msk.f32.gmra.mrb[40].mxu1 %vm20_vm1, %v11715_v6  ;;  %14372 = vst [vmem:[#allocation33_spill] sm:$0xff] %v11731_v15  ;;  %v11753_v6 = vld [vmem:[#allocation2 + $0x272] sm:$0xff] }
 0x102   :  { %9321 = vmatprep.mubr.msk.f32.mxu1 %vm20_vm1, %v11719_v4  ;;  %v11751_v4 = vld [vmem:[#allocation2 + $0x258] sm:$0xff]  ;;  %14379 = vst [vmem:[#allocation40_spill] sm:$0xff] %v11753_v6 }
 0x103   :  { %9711 = vmatmul.mubr.msk.f32.gmra.mrb[40].mxu0 %vm20_vm1, %v11717_v10  ;;  %v11749_v10 = vld [vmem:[#allocation2 + $0x262] sm:$0xff]  ;;  %14378 = vst [vmem:[#allocation39_spill] sm:$0xff] %v11751_v4 }
 0x104   :  { %9713 = vmatprep.mubr.msk.f32.mxu0 %vm20_vm1, %v11721_v8  ;;  %v11747_v8 = vld [vmem:[#allocation2 + $0x248] sm:$0xff]  ;;  %14377 = vst [vmem:[#allocation38_spill] sm:$0xff] %v11749_v10 }
 0x105   :  { %9322 = vmatmul.mubr.msk.f32.gmra.mrb[42].mxu1 %vm20_vm1, %v11731_v15  ;;  %14376 = vst [vmem:[#allocation37_spill] sm:$0xff] %v11747_v8  ;;  %v11769_v15 = vld [vmem:[#allocation2 + $0x28a] sm:$0xff] }
 0x106   :  { %9324 = vmatprep.mubr.msk.f32.mxu1 %vm20_vm1, %v11735_v13  ;;  %v11767_v13 = vld [vmem:[#allocation2 + $0x270] sm:$0xff]  ;;  %14383 = vst [vmem:[#allocation44_spill] sm:$0xff] %v11769_v15 }
 0x107   :  { %9714 = vmatmul.mubr.msk.f32.gmra.mrb[42].mxu0 %vm20_vm1, %v11733_v2  ;;  %v11765_v2 = vld [vmem:[#allocation2 + $0x27a] sm:$0xff]  ;;  %14382 = vst [vmem:[#allocation43_spill] sm:$0xff] %v11767_v13 }
 0x108   :  { %9716 = vmatprep.mubr.msk.f32.mxu0 %vm20_vm1, %v11737_v18  ;;  %v11763_v18 = vld [vmem:[#allocation2 + $0x260] sm:$0xff]  ;;  %14381 = vst [vmem:[#allocation42_spill] sm:$0xff] %v11765_v2 }
 0x109   :  { %9325 = vmatmul.mubr.msk.f32.gmra.mrb[44].mxu1 %vm20_vm1, %v11747_v8  ;;  %14380 = vst [vmem:[#allocation41_spill] sm:$0xff] %v11763_v18  ;;  %v11785_v8 = vld [vmem:[#allocation2 + $0x2a2] sm:$0xff] }
 0x10a   :  { %9327 = vmatprep.mubr.msk.f32.mxu1 %vm20_vm1, %v11751_v4  ;;  %v11783_v4 = vld [vmem:[#allocation2 + $0x288] sm:$0xff]  ;;  %14387 = vst [vmem:[#allocation48_spill] sm:$0xff] %v11785_v8 }
 0x10b   :  { %9717 = vmatmul.mubr.msk.f32.gmra.mrb[44].mxu0 %vm20_vm1, %v11749_v10  ;;  %v11781_v10 = vld [vmem:[#allocation2 + $0x292] sm:$0xff]  ;;  %14386 = vst [vmem:[#allocation47_spill] sm:$0xff] %v11783_v4 }
 0x10c   :  { %9719 = vmatprep.mubr.msk.f32.mxu0 %vm20_vm1, %v11753_v6  ;;  %v11779_v6 = vld [vmem:[#allocation2 + $0x278] sm:$0xff]  ;;  %14385 = vst [vmem:[#allocation46_spill] sm:$0xff] %v11781_v10 }
 0x10d   :  { %9328 = vmatmul.mubr.msk.f32.gmra.mrb[46].mxu1 %vm20_vm1, %v11763_v18  ;;  %14384 = vst [vmem:[#allocation45_spill] sm:$0xff] %v11779_v6  ;;  %v11801_v18 = vld [vmem:[#allocation2 + $0x2ba] sm:$0xff] }
 0x10e   :  { %9330 = vmatprep.mubr.msk.f32.mxu1 %vm20_vm1, %v11767_v13  ;;  %v11799_v13 = vld [vmem:[#allocation2 + $0x2a0] sm:$0xff]  ;;  %14391 = vst [vmem:[#allocation52_spill] sm:$0xff] %v11801_v18 }
 0x10f   :  { %9720 = vmatmul.mubr.msk.f32.gmra.mrb[46].mxu0 %vm20_vm1, %v11765_v2  ;;  %v11797_v2 = vld [vmem:[#allocation2 + $0x2aa] sm:$0xff]  ;;  %14390 = vst [vmem:[#allocation51_spill] sm:$0xff] %v11799_v13 }
 0x110   :  { %9722 = vmatprep.mubr.msk.f32.mxu0 %vm20_vm1, %v11769_v15  ;;  %v11795_v15 = vld [vmem:[#allocation2 + $0x290] sm:$0xff]  ;;  %14389 = vst [vmem:[#allocation50_spill] sm:$0xff] %v11797_v2 }
 0x111   :  { %9331 = vmatmul.mubr.msk.f32.gmra.mrb[48].mxu1 %vm20_vm1, %v11779_v6  ;;  %14388 = vst [vmem:[#allocation49_spill] sm:$0xff] %v11795_v15  ;;  %v11817_v6 = vld [vmem:[#allocation2 + $0x2d2] sm:$0xff] }
 0x112   :  { %9333 = vmatprep.mubr.msk.f32.mxu1 %vm20_vm1, %v11783_v4  ;;  %v11815_v4 = vld [vmem:[#allocation2 + $0x2b8] sm:$0xff]  ;;  %14395 = vst [vmem:[#allocation56_spill] sm:$0xff] %v11817_v6 }
 0x113   :  { %9723 = vmatmul.mubr.msk.f32.gmra.mrb[48].mxu0 %vm20_vm1, %v11781_v10  ;;  %v11813_v10 = vld [vmem:[#allocation2 + $0x2c2] sm:$0xff]  ;;  %14394 = vst [vmem:[#allocation55_spill] sm:$0xff] %v11815_v4 }
 0x114   :  { %9725 = vmatprep.mubr.msk.f32.mxu0 %vm20_vm1, %v11785_v8  ;;  %v11811_v8 = vld [vmem:[#allocation2 + $0x2a8] sm:$0xff]  ;;  %14393 = vst [vmem:[#allocation54_spill] sm:$0xff] %v11813_v10 }
 0x115   :  { %9334 = vmatmul.mubr.msk.f32.gmra.mrb[50].mxu1 %vm20_vm1, %v11795_v15  ;;  %14392 = vst [vmem:[#allocation53_spill] sm:$0xff] %v11811_v8  ;;  %v11833_v15 = vld [vmem:[#allocation2 + $0x2ea] sm:$0xff] }
 0x116   :  { %9336 = vmatprep.mubr.msk.f32.mxu1 %vm20_vm1, %v11799_v13  ;;  %v11831_v13 = vld [vmem:[#allocation2 + $0x2d0] sm:$0xff]  ;;  %14399 = vst [vmem:[#allocation60_spill] sm:$0xff] %v11833_v15 }
 0x117   :  { %9726 = vmatmul.mubr.msk.f32.gmra.mrb[50].mxu0 %vm20_vm1, %v11797_v2  ;;  %v11829_v2 = vld [vmem:[#allocation2 + $0x2da] sm:$0xff]  ;;  %14398 = vst [vmem:[#allocation59_spill] sm:$0xff] %v11831_v13 }
 0x118   :  { %9728 = vmatprep.mubr.msk.f32.mxu0 %vm20_vm1, %v11801_v18  ;;  %v11827_v18 = vld [vmem:[#allocation2 + $0x2c0] sm:$0xff]  ;;  %14397 = vst [vmem:[#allocation58_spill] sm:$0xff] %v11829_v2 }
 0x119   :  { %9337 = vmatmul.mubr.msk.f32.gmra.mrb[52].mxu1 %vm20_vm1, %v11811_v8  ;;  %14396 = vst [vmem:[#allocation57_spill] sm:$0xff] %v11827_v18  ;;  %v11849_v8 = vld [vmem:[#allocation2 + $0x302] sm:$0xff] }
 0x11a   :  { %9339 = vmatprep.mubr.msk.f32.mxu1 %vm20_vm1, %v11815_v4  ;;  %v11847_v4 = vld [vmem:[#allocation2 + $0x2e8] sm:$0xff]  ;;  %14403 = vst [vmem:[#allocation64_spill] sm:$0xff] %v11849_v8 }
 0x11b   :  { %9729 = vmatmul.mubr.msk.f32.gmra.mrb[52].mxu0 %vm20_vm1, %v11813_v10  ;;  %v11845_v10 = vld [vmem:[#allocation2 + $0x2f2] sm:$0xff]  ;;  %14402 = vst [vmem:[#allocation63_spill] sm:$0xff] %v11847_v4 }
 0x11c   :  { %9731 = vmatprep.mubr.msk.f32.mxu0 %vm20_vm1, %v11817_v6  ;;  %v11843_v6 = vld [vmem:[#allocation2 + $0x2d8] sm:$0xff]  ;;  %14401 = vst [vmem:[#allocation62_spill] sm:$0xff] %v11845_v10 }
 0x11d   :  { %9340 = vmatmul.mubr.msk.f32.gmra.mrb[54].mxu1 %vm20_vm1, %v11827_v18  ;;  %14400 = vst [vmem:[#allocation61_spill] sm:$0xff] %v11843_v6  ;;  %v11865_v18 = vld [vmem:[#allocation2 + $0x31a] sm:$0xff] }
 0x11e   :  { %9342 = vmatprep.mubr.msk.f32.mxu1 %vm20_vm1, %v11831_v13  ;;  %v11863_v13 = vld [vmem:[#allocation2 + $0x300] sm:$0xff]  ;;  %14406 = vst [vmem:[#allocation67_spill] sm:$0xff] %v11865_v18 }
 0x11f   :  { %9732 = vmatmul.mubr.msk.f32.gmra.mrb[54].mxu0 %vm20_vm1, %v11829_v2  ;;  %v11861_v2 = vld [vmem:[#allocation2 + $0x30a] sm:$0xff]  ;;  %14405 = vst [vmem:[#allocation66_spill] sm:$0xff] %v11863_v13 }
 0x120   :  { %9734 = vmatprep.mubr.msk.f32.mxu0 %vm20_vm1, %v11833_v15  ;;  %v11859_v15 = vld [vmem:[#allocation2 + $0x2f0] sm:$0xff]  ;;  %14404 = vst [vmem:[#allocation65_spill] sm:$0xff] %v11861_v2 }
 0x121   :  { %9343 = vmatmul.mubr.msk.f32.gmra.mrb[56].mxu1 %vm20_vm1, %v11843_v6  ;;  %v3721_v6 = vld [vmem:[#allocation2 + $0x332] sm:$0xff] }
 0x122   :  { %9345 = vmatprep.mubr.msk.f32.mxu1 %vm20_vm1, %v11847_v4  ;;  %v11879_v4 = vld [vmem:[#allocation2 + $0x318] sm:$0xff] }
 0x123   :  { %9735 = vmatmul.mubr.msk.f32.gmra.mrb[56].mxu0 %vm20_vm1, %v11845_v10  ;;  %v11877_v10 = vld [vmem:[#allocation2 + $0x322] sm:$0xff] }
 0x124   :  { %9737 = vmatprep.mubr.msk.f32.mxu0 %vm20_vm1, %v11849_v8  ;;  %v11875_v8 = vld [vmem:[#allocation2 + $0x308] sm:$0xff]  ;;  %14407 = vst [vmem:[#allocation68_spill] sm:$0xff] %v11877_v10 }
 0x125   :  { %9346 = vmatmul.mubr.msk.f32.gmra.mrb[58].mxu1 %vm20_vm1, %v11859_v15 }
 0x126   :  { %9348 = vmatprep.mubr.msk.f32.mxu1 %vm20_vm1, %v11863_v13  ;;  %v1593_v13 = vld [vmem:[#allocation2 + $0x2] sm:$0xff] }
 0x127   :  { %9738 = vmatmul.mubr.msk.f32.gmra.mrb[58].mxu0 %vm20_vm1, %v11861_v2  ;;  %v11888_v2 = vld [vmem:[#allocation2 + $0x320] sm:$0xff] }
 0x128   :  { %9740 = vmatprep.mubr.msk.f32.mxu0 %vm20_vm1, %v11865_v18  ;;  %v3722_v18 = vld [vmem:[#allocation2 + $0x33a] sm:$0xff] }
 0x129   :  { %9349 = vmatmul.mubr.msk.f32.gmra.mrb[60].mxu1 %vm20_vm1, %v11875_v8 }
 0x12a   :  { %9351 = vmatprep.mubr.msk.f32.mxu1 %vm20_vm1, %v11879_v4 }
 0x12b   :  { %9741 = vmatmul.mubr.msk.f32.gmra.mrb[60].mxu0 %vm20_vm1, %v11877_v10  ;;  %v1594_v10 = vld [vmem:[#allocation2 + $0xa] sm:$0xff] }
 0x12c   :  { %9743 = vmatprep.mubr.msk.f32.mxu0 %vm20_vm1, %v3721_v6  ;;  %v11902_v6 = vld [vmem:[%s14200_s1 + $0x20] sm:$0xf] }
 0x12d   :  { %9352 = vmatmul.mubr.msk.f32.gmra.mrb[62].mxu1 %vm20_vm1, %v11888_v2 }
 0x12e   :  { %9356 = vmatprep.mubr.msk.f32.mxu1 %vm20_vm1, %v1593_v13  ;;  %v14457_v13 = vld [vmem:[#allocation56_spill] sm:$0xff] }
 0x12f   :  { %9744 = vmatmul.mubr.msk.f32.gmra.mrb[62].mxu0 %vm20_vm1, %v3722_v18  ;;  %v14459_v18 = vld [vmem:[#allocation58_spill] sm:$0xff] }
 0x130   :  { %9748 = vmatprep.mubr.msk.f32.mxu0 %vm20_vm1, %v11429_v21  ;;  %v11911_v21 = vld [vmem:[%s14201_s2] sm:$0xf] }
 0x131   :  { %9357 = vmatmul.mubr.msk.f32.vlgmr.msra.gmra.mrb[0].mxu1 %vm20_vm1, %v1594_v10  ;;  %v14458_v10 = vld [vmem:[#allocation66_spill] sm:$0xff] }
 0x132   :  { %9453 = vmatpush3.msk.msra.mxu1 %vm624_vm0, %v11423_v20  ;;  %9359 = vmatprep.mubr.msk.f32.mxu1 %vm20_vm1, %v11391_v12  ;;  %v12017_v12 = vld [vmem:[#allocation2 + $0x180] sm:$0xff] }
 0x133   :  { %9749 = vmatmul.mubr.msk.f32.vlgmr.msra.gmra.mrb[0].mxu0 %vm20_vm1, %v11445_v23  ;;  %10040 = vmatprep.subr.msk.mxu1 %vm624_vm0, %v11911_v21  ;;  %v14410_v20 = vld [vmem:[#allocation13_spill] sm:$0xff]  ;;  %v1625_v23 = vld [vmem:[#allocation2 + $0x1b2] sm:$0xff] }
 0x134   :  { %9845 = vmatpush3.msk.msra.mxu0 %vm624_vm0, %v11410_v17  ;;  %9751 = vmatprep.mubr.msk.f32.mxu0 %vm20_vm1, %v11449_v25  ;;  %v4400_v17 = vld [vmem:[#allocation2 + $0x198] sm:$0xff] }
 0x135   :  { %9942 = vmatprep.subr.msk.mxu0 %vm624_vm0, %v11902_v6  ;;  %9360 = vmatmul.mubr.msk.f32.gmra.mrb[2].mxu1 %vm20_vm1, %v11398_v14  ;;  %v14408_v14 = vld [vmem:[#allocation11_spill] sm:$0xff] }
 0x136   :  { %9362 = vmatprep.mubr.msk.f32.mxu1 %vm20_vm1, %v11402_v16  ;;  %v12027_v16 = vld [vmem:[#allocation2 + $0x188] sm:$0xff]  ;;  %v14412_v25 = vld [vmem:[#allocation19_spill] sm:$0xff] }
 0x137   :  { %9752 = vmatmul.mubr.msk.f32.gmra.mrb[2].mxu0 %vm20_vm1, %v11461_v27  ;;  %v14413_v27 = vld [vmem:[#allocation21_spill] sm:$0xff] }
 0x138   :  { %9754 = vmatprep.mubr.msk.f32.mxu0 %vm20_vm1, %v11465_v29  ;;  %v14415_v29 = vld [vmem:[#allocation23_spill] sm:$0xff] }
 0x139   :  { %9363 = vmatmul.mubr.msk.f32.gmra.mrb[4].mxu1 %vm20_vm1, %v11418_v19  ;;  %v14409_v19 = vld [vmem:[#allocation12_spill] sm:$0xff] }
 0x13a   :  { %9365 = vmatprep.mubr.msk.f32.mxu1 %vm20_vm1, %v11431_v22  ;;  %v4401_v22 = vld [vmem:[#allocation2 + $0x1a0] sm:$0xff] }
 0x13b   :  { %9755 = vmatmul.mubr.msk.f32.gmra.mrb[4].mxu0 %vm20_vm1, %v11477_v31  ;;  %v14417_v31 = vld [vmem:[#allocation25_spill] sm:$0xff] }
 0x13c   :  { %9757 = vmatprep.mubr.msk.f32.mxu0 %vm20_vm1, %v11481_v33  ;;  %v14419_v33 = vld [vmem:[#allocation27_spill] sm:$0xff] }
 0x13d   :  { %9366 = vmatmul.mubr.msk.f32.gmra.mrb[6].mxu1 %vm20_vm1, %v11447_v24  ;;  %v14411_v24 = vld [vmem:[#allocation14_spill] sm:$0xff] }
 0x13e   :  { %9368 = vmatprep.mubr.msk.f32.mxu1 %vm20_vm1, %v11451_v26  ;;  %v1626_v26 = vld [vmem:[#allocation2 + $0x1ba] sm:$0xff] }
 0x13f   :  { %9758 = vmatmul.mubr.msk.f32.gmra.mrb[6].mxu0 %vm20_vm1, %v11493_v35  ;;  %v14421_v35 = vld [vmem:[#allocation29_spill] sm:$0xff] }
 0x140   :  { %9760 = vmatprep.mubr.msk.f32.mxu0 %vm20_vm1, %v11497_v37  ;;  %v14423_v37 = vld [vmem:[#allocation31_spill] sm:$0xff] }
 0x141   :  { %9369 = vmatmul.mubr.msk.f32.gmra.mrb[8].mxu1 %vm20_vm1, %v11463_v28  ;;  %v14414_v28 = vld [vmem:[#allocation15_spill] sm:$0xff] }
 0x142   :  { %9371 = vmatprep.mubr.msk.f32.mxu1 %vm20_vm1, %v11467_v30  ;;  %v14416_v30 = vld [vmem:[#allocation16_spill] sm:$0xff] }
 0x143   :  { %9761 = vmatmul.mubr.msk.f32.gmra.mrb[8].mxu0 %vm20_vm1, %v11509_v39  ;;  %v14425_v39 = vld [vmem:[#allocation33_spill] sm:$0xff] }
 0x144   :  { %9763 = vmatprep.mubr.msk.f32.mxu0 %vm20_vm1, %v11513_v41  ;;  %v14427_v41 = vld [vmem:[#allocation35_spill] sm:$0xff] }
 0x145   :  { %9372 = vmatmul.mubr.msk.f32.gmra.mrb[10].mxu1 %vm20_vm1, %v11479_v32  ;;  %v14418_v32 = vld [vmem:[#allocation17_spill] sm:$0xff] }
 0x146   :  { %9374 = vmatprep.mubr.msk.f32.mxu1 %vm20_vm1, %v11483_v34  ;;  %v14420_v34 = vld [vmem:[#allocation18_spill] sm:$0xff] }
 0x147   :  { %9764 = vmatmul.mubr.msk.f32.gmra.mrb[10].mxu0 %vm20_vm1, %v11525_v43  ;;  %v14429_v43 = vld [vmem:[#allocation37_spill] sm:$0xff] }
 0x148   :  { %9766 = vmatprep.mubr.msk.f32.mxu0 %vm20_vm1, %v11529_v45  ;;  %v14431_v45 = vld [vmem:[#allocation39_spill] sm:$0xff] }
 0x149   :  { %9375 = vmatmul.mubr.msk.f32.gmra.mrb[12].mxu1 %vm20_vm1, %v11495_v36  ;;  %v14422_v36 = vld [vmem:[#allocation20_spill] sm:$0xff] }
 0x14a   :  { %9377 = vmatprep.mubr.msk.f32.mxu1 %vm20_vm1, %v11499_v38  ;;  %v14424_v38 = vld [vmem:[#allocation22_spill] sm:$0xff] }
 0x14b   :  { %9767 = vmatmul.mubr.msk.f32.gmra.mrb[12].mxu0 %vm20_vm1, %v11541_v47  ;;  %v14433_v47 = vld [vmem:[#allocation41_spill] sm:$0xff] }
 0x14c   :  { %9769 = vmatprep.mubr.msk.f32.mxu0 %vm20_vm1, %v11545_v49  ;;  %v14435_v49 = vld [vmem:[#allocation43_spill] sm:$0xff] }
 0x14d   :  { %9378 = vmatmul.mubr.msk.f32.gmra.mrb[14].mxu1 %vm20_vm1, %v11511_v40  ;;  %v14426_v40 = vld [vmem:[#allocation24_spill] sm:$0xff] }
 0x14e   :  { %9380 = vmatprep.mubr.msk.f32.mxu1 %vm20_vm1, %v11515_v42  ;;  %v14428_v42 = vld [vmem:[#allocation26_spill] sm:$0xff] }
 0x14f   :  { %9770 = vmatmul.mubr.msk.f32.gmra.mrb[14].mxu0 %vm20_vm1, %v11557_v51  ;;  %v14437_v51 = vld [vmem:[#allocation45_spill] sm:$0xff] }
 0x150   :  { %9772 = vmatprep.mubr.msk.f32.mxu0 %vm20_vm1, %v11561_v53  ;;  %v14439_v53 = vld [vmem:[#allocation47_spill] sm:$0xff] }
 0x151   :  { %9381 = vmatmul.mubr.msk.f32.gmra.mrb[16].mxu1 %vm20_vm1, %v11527_v44  ;;  %v14430_v44 = vld [vmem:[#allocation28_spill] sm:$0xff] }
 0x152   :  { %9383 = vmatprep.mubr.msk.f32.mxu1 %vm20_vm1, %v11531_v46  ;;  %v14432_v46 = vld [vmem:[#allocation30_spill] sm:$0xff] }
 0x153   :  { %9773 = vmatmul.mubr.msk.f32.gmra.mrb[16].mxu0 %vm20_vm1, %v11573_v55  ;;  %v14441_v55 = vld [vmem:[#allocation49_spill] sm:$0xff] }
 0x154   :  { %9775 = vmatprep.mubr.msk.f32.mxu0 %vm20_vm1, %v11577_v57  ;;  %v14443_v57 = vld [vmem:[#allocation51_spill] sm:$0xff] }
 0x155   :  { %9384 = vmatmul.mubr.msk.f32.gmra.mrb[18].mxu1 %vm20_vm1, %v11543_v48  ;;  %v14434_v48 = vld [vmem:[#allocation32_spill] sm:$0xff] }
 0x156   :  { %9386 = vmatprep.mubr.msk.f32.mxu1 %vm20_vm1, %v11547_v50  ;;  %v14436_v50 = vld [vmem:[#allocation34_spill] sm:$0xff] }
 0x157   :  { %9776 = vmatmul.mubr.msk.f32.gmra.mrb[18].mxu0 %vm20_vm1, %v11589_v59  ;;  %v14445_v59 = vld [vmem:[#allocation53_spill] sm:$0xff] }
 0x158   :  { %9778 = vmatprep.mubr.msk.f32.mxu0 %vm20_vm1, %v11593_v61  ;;  %v14447_v61 = vld [vmem:[#allocation55_spill] sm:$0xff] }
 0x159   :  { %9387 = vmatmul.mubr.msk.f32.gmra.mrb[20].mxu1 %vm20_vm1, %v11559_v52  ;;  %v14438_v52 = vld [vmem:[#allocation36_spill] sm:$0xff] }
 0x15a   :  { %9389 = vmatprep.mubr.msk.f32.mxu1 %vm20_vm1, %v11563_v54  ;;  %v14440_v54 = vld [vmem:[#allocation38_spill] sm:$0xff] }
 0x15b   :  { %9779 = vmatmul.mubr.msk.f32.gmra.mrb[20].mxu0 %vm20_vm1, %v11605_v63  ;;  %v14449_v63 = vld [vmem:[#allocation57_spill] sm:$0xff] }
 0x15c   :  { %9781 = vmatprep.mubr.msk.f32.mxu0 %vm20_vm1, %v11609_v1  ;;  %v14451_v1 = vld [vmem:[#allocation59_spill] sm:$0xff] }
 0x15d   :  { %9390 = vmatmul.mubr.msk.f32.gmra.mrb[22].mxu1 %vm20_vm1, %v11575_v56  ;;  %v14442_v56 = vld [vmem:[#allocation40_spill] sm:$0xff] }
 0x15e   :  { %9392 = vmatprep.mubr.msk.f32.mxu1 %vm20_vm1, %v11579_v58  ;;  %v14444_v58 = vld [vmem:[#allocation42_spill] sm:$0xff] }
 0x15f   :  { %9782 = vmatmul.mubr.msk.f32.gmra.mrb[22].mxu0 %vm20_vm1, %v11621_v3  ;;  %v14452_v3 = vld [vmem:[#allocation50_spill] sm:$0xff] }
 0x160   :  { %9784 = vmatprep.mubr.msk.f32.mxu0 %vm20_vm1, %v11625_v5  ;;  %v14453_v5 = vld [vmem:[#allocation61_spill] sm:$0xff] }
 0x161   :  { %9393 = vmatmul.mubr.msk.f32.gmra.mrb[24].mxu1 %vm20_vm1, %v11591_v60  ;;  %v14446_v60 = vld [vmem:[#allocation44_spill] sm:$0xff] }
 0x162   :  { %9395 = vmatprep.mubr.msk.f32.mxu1 %vm20_vm1, %v11595_v62  ;;  %v14448_v62 = vld [vmem:[#allocation46_spill] sm:$0xff] }
 0x163   :  { %9785 = vmatmul.mubr.msk.f32.gmra.mrb[24].mxu0 %vm20_vm1, %v11637_v7  ;;  %v14454_v7 = vld [vmem:[#allocation52_spill] sm:$0xff] }
 0x164   :  { %9787 = vmatprep.mubr.msk.f32.mxu0 %vm20_vm1, %v11641_v9  ;;  %v14455_v9 = vld [vmem:[#allocation63_spill] sm:$0xff] }
 0x165   :  { %9396 = vmatmul.mubr.msk.f32.gmra.mrb[26].mxu1 %vm20_vm1, %v11607_v0  ;;  %v14450_v0 = vld [vmem:[#allocation48_spill] sm:$0xff] }
 0x166   :  { %9398 = vmatprep.mubr.msk.f32.mxu1 %vm20_vm1, %v14408_v14  ;;  %v14460_v14 = vld [vmem:[#allocation60_spill] sm:$0xff] }
 0x167   :  { %9788 = vmatmul.mubr.msk.f32.gmra.mrb[26].mxu0 %vm20_vm1, %v11650_v11  ;;  %v14456_v11 = vld [vmem:[#allocation54_spill] sm:$0xff] }
 0x168   :  { %9790 = vmatprep.mubr.msk.f32.mxu0 %vm20_vm1, %v12017_v12 }
 0x169   :  { %9399 = vmatmul.mubr.msk.f32.gmra.mrb[28].mxu1 %vm20_vm1, %v14409_v19  ;;  %v14462_v19 = vld [vmem:[#allocation64_spill] sm:$0xff] }
 0x16a   :  { %9401 = vmatprep.mubr.msk.f32.mxu1 %vm20_vm1, %v14410_v20  ;;  %v4432_v20 = vld [vmem:[#allocation2 + $0x348] sm:$0xff] }
 0x16b   :  { %9791 = vmatmul.mubr.msk.f32.gmra.mrb[28].mxu0 %vm20_vm1, %v12027_v16 }
 0x16c   :  { %9793 = vmatprep.mubr.msk.f32.mxu0 %vm20_vm1, %v4400_v17  ;;  %v12145_v17 = vld [vmem:[#allocation2 + $0x330] sm:$0xff] }
 0x16d   :  { %9402 = vmatmul.mubr.msk.f32.gmra.mrb[30].mxu1 %vm20_vm1, %v14411_v24  ;;  %v14465_v24 = vld [vmem:[#allocation68_spill] sm:$0xff] }
 0x16e   :  { %9404 = vmatprep.mubr.msk.f32.mxu1 %vm20_vm1, %v1625_v23  ;;  %v5080_v23 = vld [vmem:[#allocation2 + $0x31] sm:$0xff] }
 0x16f   :  { %9794 = vmatmul.mubr.msk.f32.gmra.mrb[30].mxu0 %vm20_vm1, %v4401_v22  ;;  %v14463_v22 = vld [vmem:[#allocation65_spill] sm:$0xff] }
 0x170   :  { %9796 = vmatprep.mubr.msk.f32.mxu0 %vm20_vm1, %v14412_v25  ;;  %v14466_v25 = vld [vmem:[#allocation9_spill] sm:$0xff] }
 0x171   :  { %9405 = vmatmul.mubr.msk.f32.gmra.mrb[32].mxu1 %vm20_vm1, %v1626_v26  ;;  %v5081_v26 = vld [vmem:[#allocation2 + $0x39] sm:$0xff] }
 0x172   :  { %9407 = vmatprep.mubr.msk.f32.mxu1 %vm20_vm1, %v14414_v28  ;;  %v5082_v28 = vld [vmem:[#allocation2 + $0x49] sm:$0xff] }
 0x173   :  { %9797 = vmatmul.mubr.msk.f32.gmra.mrb[32].mxu0 %vm20_vm1, %v14413_v27  ;;  %v2305_v27 = vld [vmem:[#allocation2 + $0x30] sm:$0xff] }
 0x174   :  { %9799 = vmatprep.mubr.msk.f32.mxu0 %vm20_vm1, %v14415_v29  ;;  %v14467_v29 = vld [vmem:[#allocation10_spill] sm:$0xff] }
 0x175   :  { %9408 = vmatmul.mubr.msk.f32.gmra.mrb[34].mxu1 %vm20_vm1, %v14416_v30  ;;  %v2306_v30 = vld [vmem:[#allocation2 + $0x38] sm:$0xff] }
 0x176   :  { %9410 = vmatprep.mubr.msk.f32.mxu1 %vm20_vm1, %v14418_v32  ;;  %v2307_v32 = vld [vmem:[#allocation2 + $0x48] sm:$0xff] }
 0x177   :  { %9800 = vmatmul.mubr.msk.f32.gmra.mrb[34].mxu0 %vm20_vm1, %v14417_v31  ;;  %v5083_v31 = vld [vmem:[#allocation2 + $0x51] sm:$0xff] }
 0x178   :  { %9802 = vmatprep.mubr.msk.f32.mxu0 %vm20_vm1, %v14419_v33  ;;  %v5084_v33 = vld [vmem:[#allocation2 + $0x61] sm:$0xff] }
 0x179   :  { %9411 = vmatmul.mubr.msk.f32.gmra.mrb[36].mxu1 %vm20_vm1, %v14420_v34  ;;  %v5085_v34 = vld [vmem:[#allocation2 + $0x69] sm:$0xff] }
 0x17a   :  { %9413 = vmatprep.mubr.msk.f32.mxu1 %vm20_vm1, %v14422_v36  ;;  %v2310_v36 = vld [vmem:[#allocation2 + $0x68] sm:$0xff] }
 0x17b   :  { %9803 = vmatmul.mubr.msk.f32.gmra.mrb[36].mxu0 %vm20_vm1, %v14421_v35  ;;  %v2309_v35 = vld [vmem:[#allocation2 + $0x60] sm:$0xff] }
 0x17c   :  { %9805 = vmatprep.mubr.msk.f32.mxu0 %vm20_vm1, %v14423_v37  ;;  %v5087_v37 = vld [vmem:[#allocation2 + $0x81] sm:$0xff] }
 0x17d   :  { %9414 = vmatmul.mubr.msk.f32.gmra.mrb[38].mxu1 %vm20_vm1, %v14424_v38  ;;  %v2311_v38 = vld [vmem:[#allocation2 + $0x78] sm:$0xff] }
 0x17e   :  { %9416 = vmatprep.mubr.msk.f32.mxu1 %vm20_vm1, %v14426_v40  ;;  %v2312_v40 = vld [vmem:[#allocation2 + $0x80] sm:$0xff] }
 0x17f   :  { %9806 = vmatmul.mubr.msk.f32.gmra.mrb[38].mxu0 %vm20_vm1, %v14425_v39  ;;  %v5088_v39 = vld [vmem:[#allocation2 + $0x91] sm:$0xff] }
 0x180   :  { %9808 = vmatprep.mubr.msk.f32.mxu0 %vm20_vm1, %v14427_v41  ;;  %v5089_v41 = vld [vmem:[#allocation2 + $0x99] sm:$0xff] }
 0x181   :  { %9417 = vmatmul.mubr.msk.f32.gmra.mrb[40].mxu1 %vm20_vm1, %v14428_v42  ;;  %v2313_v42 = vld [vmem:[#allocation2 + $0x90] sm:$0xff] }
 0x182   :  { %9419 = vmatprep.mubr.msk.f32.mxu1 %vm20_vm1, %v14430_v44  ;;  %v2314_v44 = vld [vmem:[#allocation2 + $0x98] sm:$0xff] }
 0x183   :  { %9809 = vmatmul.mubr.msk.f32.gmra.mrb[40].mxu0 %vm20_vm1, %v14429_v43  ;;  %v5090_v43 = vld [vmem:[#allocation2 + $0xa9] sm:$0xff] }
 0x184   :  { %9811 = vmatprep.mubr.msk.f32.mxu0 %vm20_vm1, %v14431_v45  ;;  %v5091_v45 = vld [vmem:[#allocation2 + $0xb1] sm:$0xff] }
 0x185   :  { %9420 = vmatmul.mubr.msk.f32.gmra.mrb[42].mxu1 %vm20_vm1, %v14432_v46  ;;  %v2315_v46 = vld [vmem:[#allocation2 + $0xa8] sm:$0xff] }
 0x186   :  { %9422 = vmatprep.mubr.msk.f32.mxu1 %vm20_vm1, %v14434_v48  ;;  %v2316_v48 = vld [vmem:[#allocation2 + $0xb0] sm:$0xff] }
 0x187   :  { %9812 = vmatmul.mubr.msk.f32.gmra.mrb[42].mxu0 %vm20_vm1, %v14433_v47  ;;  %v5092_v47 = vld [vmem:[#allocation2 + $0xc1] sm:$0xff] }
 0x188   :  { %9814 = vmatprep.mubr.msk.f32.mxu0 %vm20_vm1, %v14435_v49  ;;  %v5093_v49 = vld [vmem:[#allocation2 + $0xc9] sm:$0xff] }
 0x189   :  { %9423 = vmatmul.mubr.msk.f32.gmra.mrb[44].mxu1 %vm20_vm1, %v14436_v50  ;;  %v2317_v50 = vld [vmem:[#allocation2 + $0xc0] sm:$0xff] }
 0x18a   :  { %9425 = vmatprep.mubr.msk.f32.mxu1 %vm20_vm1, %v14438_v52  ;;  %v2318_v52 = vld [vmem:[#allocation2 + $0xc8] sm:$0xff] }
 0x18b   :  { %9815 = vmatmul.mubr.msk.f32.gmra.mrb[44].mxu0 %vm20_vm1, %v14437_v51  ;;  %v5094_v51 = vld [vmem:[#allocation2 + $0xd9] sm:$0xff] }
 0x18c   :  { %9817 = vmatprep.mubr.msk.f32.mxu0 %vm20_vm1, %v14439_v53  ;;  %v5095_v53 = vld [vmem:[#allocation2 + $0xe1] sm:$0xff] }
 0x18d   :  { %9426 = vmatmul.mubr.msk.f32.gmra.mrb[46].mxu1 %vm20_vm1, %v14440_v54  ;;  %v2319_v54 = vld [vmem:[#allocation2 + $0xd8] sm:$0xff] }
 0x18e   :  { %9428 = vmatprep.mubr.msk.f32.mxu1 %vm20_vm1, %v14442_v56  ;;  %v2320_v56 = vld [vmem:[#allocation2 + $0xe0] sm:$0xff] }
 0x18f   :  { %9818 = vmatmul.mubr.msk.f32.gmra.mrb[46].mxu0 %vm20_vm1, %v14441_v55  ;;  %v5096_v55 = vld [vmem:[#allocation2 + $0xf1] sm:$0xff] }
 0x190   :  { %9820 = vmatprep.mubr.msk.f32.mxu0 %vm20_vm1, %v14443_v57  ;;  %v5097_v57 = vld [vmem:[#allocation2 + $0xf9] sm:$0xff] }
 0x191   :  { %9429 = vmatmul.mubr.msk.f32.gmra.mrb[48].mxu1 %vm20_vm1, %v14444_v58  ;;  %v2321_v58 = vld [vmem:[#allocation2 + $0xf0] sm:$0xff] }
 0x192   :  { %9431 = vmatprep.mubr.msk.f32.mxu1 %vm20_vm1, %v14446_v60  ;;  %v2322_v60 = vld [vmem:[#allocation2 + $0xf8] sm:$0xff] }
 0x193   :  { %9821 = vmatmul.mubr.msk.f32.gmra.mrb[48].mxu0 %vm20_vm1, %v14445_v59  ;;  %v5098_v59 = vld [vmem:[#allocation2 + $0x109] sm:$0xff] }
 0x194   :  { %9823 = vmatprep.mubr.msk.f32.mxu0 %vm20_vm1, %v14447_v61  ;;  %v5099_v61 = vld [vmem:[#allocation2 + $0x111] sm:$0xff] }
 0x195   :  { %9432 = vmatmul.mubr.msk.f32.gmra.mrb[50].mxu1 %vm20_vm1, %v14448_v62  ;;  %v2323_v62 = vld [vmem:[#allocation2 + $0x108] sm:$0xff] }
 0x196   :  { %9434 = vmatprep.mubr.msk.f32.mxu1 %vm20_vm1, %v14450_v0  ;;  %v2324_v0 = vld [vmem:[#allocation2 + $0x110] sm:$0xff] }
 0x197   :  { %9824 = vmatmul.mubr.msk.f32.gmra.mrb[50].mxu0 %vm20_vm1, %v14449_v63  ;;  %v5100_v63 = vld [vmem:[#allocation2 + $0x121] sm:$0xff] }
 0x198   :  { %9826 = vmatprep.mubr.msk.f32.mxu0 %vm20_vm1, %v14451_v1  ;;  %v5101_v1 = vld [vmem:[#allocation2 + $0x129] sm:$0xff] }
 0x199   :  { %9435 = vmatmul.mubr.msk.f32.gmra.mrb[52].mxu1 %vm20_vm1, %v14452_v3  ;;  %v2325_v3 = vld [vmem:[#allocation2 + $0x120] sm:$0xff] }
 0x19a   :  { %9437 = vmatprep.mubr.msk.f32.mxu1 %vm20_vm1, %v14454_v7  ;;  %v2326_v7 = vld [vmem:[#allocation2 + $0x128] sm:$0xff] }
 0x19b   :  { %9827 = vmatmul.mubr.msk.f32.gmra.mrb[52].mxu0 %vm20_vm1, %v14453_v5  ;;  %v5102_v5 = vld [vmem:[#allocation2 + $0x139] sm:$0xff] }
 0x19c   :  { %9829 = vmatprep.mubr.msk.f32.mxu0 %vm20_vm1, %v14455_v9  ;;  %v5103_v9 = vld [vmem:[#allocation2 + $0x141] sm:$0xff] }
 0x19d   :  { %9438 = vmatmul.mubr.msk.f32.gmra.mrb[54].mxu1 %vm20_vm1, %v14456_v11  ;;  %v2327_v11 = vld [vmem:[#allocation2 + $0x138] sm:$0xff] }
 0x19e   :  { %9440 = vmatprep.mubr.msk.f32.mxu1 %vm20_vm1, %v14457_v13  ;;  %v5104_v13 = vld [vmem:[#allocation2 + $0x151] sm:$0xff] }
 0x19f   :  { %9830 = vmatmul.mubr.msk.f32.gmra.mrb[54].mxu0 %vm20_vm1, %v11859_v15  ;;  %v14461_v15 = vld [vmem:[#allocation62_spill] sm:$0xff] }
 0x1a0   :  { %9832 = vmatprep.mubr.msk.f32.mxu0 %vm20_vm1, %v14458_v10  ;;  %v2328_v10 = vld [vmem:[#allocation2 + $0x140] sm:$0xff] }
 0x1a1   :  { %9441 = vmatmul.mubr.msk.f32.gmra.mrb[56].mxu1 %vm20_vm1, %v14459_v18  ;;  %v5105_v18 = vld [vmem:[#allocation2 + $0x159] sm:$0xff] }
 0x1a2   :  { %9443 = vmatprep.mubr.msk.f32.mxu1 %vm20_vm1, %v14460_v14  ;;  %v2329_v14 = vld [vmem:[#allocation2 + $0x150] sm:$0xff] }
 0x1a3   :  { %9833 = vmatmul.mubr.msk.f32.gmra.mrb[56].mxu0 %vm20_vm1, %v11875_v8  ;;  %v12155_v8 = vld [vmem:[#allocation2 + $0x338] sm:$0xff] }
 0x1a4   :  { %9835 = vmatprep.mubr.msk.f32.mxu0 %vm20_vm1, %v11879_v4  ;;  %v14464_v4 = vld [vmem:[#allocation67_spill] sm:$0xff] }
 0x1a5   :  { %9444 = vmatmul.mubr.msk.f32.gmra.mrb[58].mxu1 %vm20_vm1, %v14461_v15  ;;  %v5106_v15 = vld [vmem:[#allocation2 + $0x169] sm:$0xff] }
 0x1a6   :  { %9446 = vmatprep.mubr.msk.f32.mxu1 %vm20_vm1, %v14462_v19  ;;  %v2330_v19 = vld [vmem:[#allocation2 + $0x158] sm:$0xff] }
 0x1a7   :  { %9836 = vmatmul.mubr.msk.f32.gmra.mrb[58].mxu0 %vm20_vm1, %v11888_v2  ;;  %v4433_v2 = vld [vmem:[#allocation2 + $0x350] sm:$0xff] }
 0x1a8   :  { %9838 = vmatprep.mubr.msk.f32.mxu0 %vm20_vm1, %v12145_v17 }
 0x1a9   :  { %9447 = vmatmul.mubr.msk.f32.gmra.mrb[60].mxu1 %vm20_vm1, %v14463_v22  ;;  %v2331_v22 = vld [vmem:[#allocation2 + $0x168] sm:$0xff] }
 0x1aa   :  { %9449 = vmatprep.mubr.msk.f32.mxu1 %vm20_vm1, %v14464_v4  ;;  %v5108_v4 = vld [vmem:[#allocation2 + $0x181] sm:$0xff] }
 0x1ab   :  { %9839 = vmatmul.mubr.msk.f32.gmra.mrb[60].mxu0 %vm20_vm1, %v12155_v8 }
 0x1ac   :  { %9841 = vmatprep.mubr.msk.f32.mxu0 %vm20_vm1, %v4432_v20  ;;  %v5107_v20 = vld [vmem:[#allocation2 + $0x171] sm:$0xff] }
 0x1ad   :  { %9450 = vmatmul.mubr.msk.f32.gmra.mrb[62].mxu1 %vm20_vm1, %v14465_v24  ;;  %v5110_v24 = vld [vmem:[#allocation2 + $0x199] sm:$0xff] }
 0x1ae   :  { %9454 = vmatprep.mubr.msk.f32.mxu1 %vm20_vm1, %v14466_v25  ;;  %v5111_v25 = vld [vmem:[#allocation2 + $0x1a1] sm:$0xff] }
 0x1af   :  { %9842 = vmatmul.mubr.msk.f32.gmra.mrb[62].mxu0 %vm20_vm1, %v4433_v2  ;;  %v2332_v2 = vld [vmem:[#allocation2 + $0x170] sm:$0xff] }
 0x1b0   :  { %9846 = vmatprep.mubr.msk.f32.mxu0 %vm20_vm1, %v5080_v23  ;;  %v5109_v23 = vld [vmem:[#allocation2 + $0x189] sm:$0xff] }
 0x1b1   :  { %9455 = vmatmul.mubr.msk.f32.vlgmr.msra.gmra.mrb[0].mxu1 %vm20_vm1, %v14467_v29  ;;  %v5113_v29 = vld [vmem:[#allocation2 + $0x1e9] sm:$0xff] }
 0x1b2   :  { %10041 = vmatpush3.msk.msra.mxu1 %vm624_vm0, %v11911_v21  ;;  %9457 = vmatprep.mubr.msk.f32.mxu1 %vm20_vm1, %v2305_v27  ;;  %v5086_v21 = vld [vmem:[#allocation2 + $0x79] sm:$0xff]  ;;  %v5112_v27 = vld [vmem:[#allocation2 + $0x1e1] sm:$0xff] }
 0x1b3   :  { %9847 = vmatmul.mubr.msk.f32.vlgmr.msra.gmra.mrb[0].mxu0 %vm20_vm1, %v5081_v26  ;;  %v2335_v26 = vld [vmem:[#allocation2 + $0x1c8] sm:$0xff] }
 0x1b4   :  { %9943 = vmatpush3.msk.msra.mxu0 %vm624_vm0, %v11902_v6  ;;  %9849 = vmatprep.mubr.msk.f32.mxu0 %vm20_vm1, %v5082_v28  ;;  %v2308_v6 = vld [vmem:[#allocation2 + $0x50] sm:$0xff] }
 0x1b5   :  { %9458 = vmatmul.mubr.msk.f32.gmra.mrb[2].mxu1 %vm20_vm1, %v2306_v30  ;;  %v2336_v28 = vld [vmem:[#allocation2 + $0x1d0] sm:$0xff]  ;;  %v2337_v30 = vld [vmem:[#allocation2 + $0x1e0] sm:$0xff] }
 0x1b6   :  { %9460 = vmatprep.mubr.msk.f32.mxu1 %vm20_vm1, %v2307_v32  ;;  %v2339_v32 = vld [vmem:[#allocation2 + $0x1f8] sm:$0xff] }
 0x1b7   :  { %9850 = vmatmul.mubr.msk.f32.gmra.mrb[2].mxu0 %vm20_vm1, %v5083_v31  ;;  %v5114_v31 = vld [vmem:[#allocation2 + $0x1f9] sm:$0xff] }
 0x1b8   :  { %9852 = vmatprep.mubr.msk.f32.mxu0 %vm20_vm1, %v5084_v33  ;;  %v5116_v33 = vld [vmem:[#allocation2 + $0x211] sm:$0xff] }
 0x1b9   :  { %9461 = vmatmul.mubr.msk.f32.gmra.mrb[4].mxu1 %vm20_vm1, %v2308_v6  ;;  %v2340_v6 = vld [vmem:[#allocation2 + $0x200] sm:$0xff] }
 0x1ba   :  { %9463 = vmatprep.mubr.msk.f32.mxu1 %vm20_vm1, %v2309_v35  ;;  %v2341_v35 = vld [vmem:[#allocation2 + $0x210] sm:$0xff] }
 0x1bb   :  { %9853 = vmatmul.mubr.msk.f32.gmra.mrb[4].mxu0 %vm20_vm1, %v5085_v34  ;;  %v5117_v34 = vld [vmem:[#allocation2 + $0x219] sm:$0xff] }
 0x1bc   :  { %9855 = vmatprep.mubr.msk.f32.mxu0 %vm20_vm1, %v5086_v21  ;;  %v5118_v21 = vld [vmem:[#allocation2 + $0x229] sm:$0xff] }
 0x1bd   :  { %9464 = vmatmul.mubr.msk.f32.gmra.mrb[6].mxu1 %vm20_vm1, %v2310_v36  ;;  %v2342_v36 = vld [vmem:[#allocation2 + $0x218] sm:$0xff] }
 0x1be   :  { %9466 = vmatprep.mubr.msk.f32.mxu1 %vm20_vm1, %v2311_v38  ;;  %v2343_v38 = vld [vmem:[#allocation2 + $0x228] sm:$0xff] }
 0x1bf   :  { %9856 = vmatmul.mubr.msk.f32.gmra.mrb[6].mxu0 %vm20_vm1, %v5087_v37  ;;  %v5119_v37 = vld [vmem:[#allocation2 + $0x231] sm:$0xff] }
 0x1c0   :  { %9858 = vmatprep.mubr.msk.f32.mxu0 %vm20_vm1, %v5088_v39  ;;  %v5120_v39 = vld [vmem:[#allocation2 + $0x241] sm:$0xff] }
 0x1c1   :  { %9467 = vmatmul.mubr.msk.f32.gmra.mrb[8].mxu1 %vm20_vm1, %v2312_v40  ;;  %v2344_v40 = vld [vmem:[#allocation2 + $0x230] sm:$0xff] }
 0x1c2   :  { %9469 = vmatprep.mubr.msk.f32.mxu1 %vm20_vm1, %v2313_v42  ;;  %v2345_v42 = vld [vmem:[#allocation2 + $0x240] sm:$0xff] }
 0x1c3   :  { %9859 = vmatmul.mubr.msk.f32.gmra.mrb[8].mxu0 %vm20_vm1, %v5089_v41  ;;  %v5121_v41 = vld [vmem:[#allocation2 + $0x249] sm:$0xff] }
 0x1c4   :  { %9861 = vmatprep.mubr.msk.f32.mxu0 %vm20_vm1, %v5090_v43  ;;  %v5122_v43 = vld [vmem:[#allocation2 + $0x259] sm:$0xff] }
 0x1c5   :  { %9470 = vmatmul.mubr.msk.f32.gmra.mrb[10].mxu1 %vm20_vm1, %v2314_v44  ;;  %v2346_v44 = vld [vmem:[#allocation2 + $0x248] sm:$0xff] }
 0x1c6   :  { %9472 = vmatprep.mubr.msk.f32.mxu1 %vm20_vm1, %v2315_v46  ;;  %v2347_v46 = vld [vmem:[#allocation2 + $0x258] sm:$0xff] }
 0x1c7   :  { %9862 = vmatmul.mubr.msk.f32.gmra.mrb[10].mxu0 %vm20_vm1, %v5091_v45  ;;  %v5123_v45 = vld [vmem:[#allocation2 + $0x261] sm:$0xff] }
 0x1c8   :  { %9864 = vmatprep.mubr.msk.f32.mxu0 %vm20_vm1, %v5092_v47  ;;  %v5124_v47 = vld [vmem:[#allocation2 + $0x271] sm:$0xff] }
 0x1c9   :  { %9473 = vmatmul.mubr.msk.f32.gmra.mrb[12].mxu1 %vm20_vm1, %v2316_v48  ;;  %v2348_v48 = vld [vmem:[#allocation2 + $0x260] sm:$0xff] }
 0x1ca   :  { %9475 = vmatprep.mubr.msk.f32.mxu1 %vm20_vm1, %v2317_v50  ;;  %v2349_v50 = vld [vmem:[#allocation2 + $0x270] sm:$0xff] }
 0x1cb   :  { %9865 = vmatmul.mubr.msk.f32.gmra.mrb[12].mxu0 %vm20_vm1, %v5093_v49  ;;  %v5125_v49 = vld [vmem:[#allocation2 + $0x279] sm:$0xff] }
 0x1cc   :  { %9867 = vmatprep.mubr.msk.f32.mxu0 %vm20_vm1, %v5094_v51  ;;  %v5126_v51 = vld [vmem:[#allocation2 + $0x289] sm:$0xff] }
 0x1cd   :  { %9476 = vmatmul.mubr.msk.f32.gmra.mrb[14].mxu1 %vm20_vm1, %v2318_v52  ;;  %v2350_v52 = vld [vmem:[#allocation2 + $0x278] sm:$0xff] }
 0x1ce   :  { %9478 = vmatprep.mubr.msk.f32.mxu1 %vm20_vm1, %v2319_v54  ;;  %v2351_v54 = vld [vmem:[#allocation2 + $0x288] sm:$0xff] }
 0x1cf   :  { %9868 = vmatmul.mubr.msk.f32.gmra.mrb[14].mxu0 %vm20_vm1, %v5095_v53  ;;  %v5127_v53 = vld [vmem:[#allocation2 + $0x291] sm:$0xff] }
 0x1d0   :  { %9870 = vmatprep.mubr.msk.f32.mxu0 %vm20_vm1, %v5096_v55  ;;  %v5128_v55 = vld [vmem:[#allocation2 + $0x2a1] sm:$0xff] }
 0x1d1   :  { %9479 = vmatmul.mubr.msk.f32.gmra.mrb[16].mxu1 %vm20_vm1, %v2320_v56  ;;  %v2352_v56 = vld [vmem:[#allocation2 + $0x290] sm:$0xff] }
 0x1d2   :  { %9481 = vmatprep.mubr.msk.f32.mxu1 %vm20_vm1, %v2321_v58  ;;  %v2353_v58 = vld [vmem:[#allocation2 + $0x2a0] sm:$0xff] }
 0x1d3   :  { %9871 = vmatmul.mubr.msk.f32.gmra.mrb[16].mxu0 %vm20_vm1, %v5097_v57  ;;  %v5129_v57 = vld [vmem:[#allocation2 + $0x2a9] sm:$0xff] }
 0x1d4   :  { %9873 = vmatprep.mubr.msk.f32.mxu0 %vm20_vm1, %v5098_v59  ;;  %v5130_v59 = vld [vmem:[#allocation2 + $0x2b9] sm:$0xff] }
 0x1d5   :  { %9482 = vmatmul.mubr.msk.f32.gmra.mrb[18].mxu1 %vm20_vm1, %v2322_v60  ;;  %v2354_v60 = vld [vmem:[#allocation2 + $0x2a8] sm:$0xff] }
 0x1d6   :  { %9484 = vmatprep.mubr.msk.f32.mxu1 %vm20_vm1, %v2323_v62  ;;  %v2355_v62 = vld [vmem:[#allocation2 + $0x2b8] sm:$0xff] }
 0x1d7   :  { %9874 = vmatmul.mubr.msk.f32.gmra.mrb[18].mxu0 %vm20_vm1, %v5099_v61  ;;  %v5131_v61 = vld [vmem:[#allocation2 + $0x2c1] sm:$0xff] }
 0x1d8   :  { %9876 = vmatprep.mubr.msk.f32.mxu0 %vm20_vm1, %v5100_v63  ;;  %v5132_v63 = vld [vmem:[#allocation2 + $0x2d1] sm:$0xff] }
 0x1d9   :  { %9485 = vmatmul.mubr.msk.f32.gmra.mrb[20].mxu1 %vm20_vm1, %v2324_v0  ;;  %v2356_v0 = vld [vmem:[#allocation2 + $0x2c0] sm:$0xff] }
 0x1da   :  { %9487 = vmatprep.mubr.msk.f32.mxu1 %vm20_vm1, %v2325_v3  ;;  %v2357_v3 = vld [vmem:[#allocation2 + $0x2d0] sm:$0xff] }
 0x1db   :  { %9877 = vmatmul.mubr.msk.f32.gmra.mrb[20].mxu0 %vm20_vm1, %v5101_v1  ;;  %v5133_v1 = vld [vmem:[#allocation2 + $0x2d9] sm:$0xff] }
 0x1dc   :  { %9879 = vmatprep.mubr.msk.f32.mxu0 %vm20_vm1, %v5102_v5  ;;  %v5134_v5 = vld [vmem:[#allocation2 + $0x2e9] sm:$0xff] }
 0x1dd   :  { %9488 = vmatmul.mubr.msk.f32.gmra.mrb[22].mxu1 %vm20_vm1, %v2326_v7  ;;  %v2358_v7 = vld [vmem:[#allocation2 + $0x2d8] sm:$0xff] }
 0x1de   :  { %9490 = vmatprep.mubr.msk.f32.mxu1 %vm20_vm1, %v2327_v11  ;;  %v2359_v11 = vld [vmem:[#allocation2 + $0x2e8] sm:$0xff] }
 0x1df   :  { %9880 = vmatmul.mubr.msk.f32.gmra.mrb[22].mxu0 %vm20_vm1, %v5103_v9  ;;  %v5135_v9 = vld [vmem:[#allocation2 + $0x2f1] sm:$0xff] }
 0x1e0   :  { %9882 = vmatprep.mubr.msk.f32.mxu0 %vm20_vm1, %v5104_v13  ;;  %v5136_v13 = vld [vmem:[#allocation2 + $0x301] sm:$0xff] }
 0x1e1   :  { %9491 = vmatmul.mubr.msk.f32.gmra.mrb[24].mxu1 %vm20_vm1, %v2328_v10  ;;  %v2360_v10 = vld [vmem:[#allocation2 + $0x2f0] sm:$0xff] }
 0x1e2   :  { %9493 = vmatprep.mubr.msk.f32.mxu1 %vm20_vm1, %v2329_v14  ;;  %v2361_v14 = vld [vmem:[#allocation2 + $0x300] sm:$0xff] }
 0x1e3   :  { %9883 = vmatmul.mubr.msk.f32.gmra.mrb[24].mxu0 %vm20_vm1, %v5105_v18  ;;  %v5137_v18 = vld [vmem:[#allocation2 + $0x309] sm:$0xff] }
 0x1e4   :  { %9885 = vmatprep.mubr.msk.f32.mxu0 %vm20_vm1, %v5106_v15  ;;  %v5138_v15 = vld [vmem:[#allocation2 + $0x319] sm:$0xff] }
 0x1e5   :  { %9494 = vmatmul.mubr.msk.f32.gmra.mrb[26].mxu1 %vm20_vm1, %v2330_v19  ;;  %v2362_v19 = vld [vmem:[#allocation2 + $0x308] sm:$0xff] }
 0x1e6   :  { %9496 = vmatprep.mubr.msk.f32.mxu1 %vm20_vm1, %v2331_v22  ;;  %v2363_v22 = vld [vmem:[#allocation2 + $0x318] sm:$0xff] }
 0x1e7   :  { %9886 = vmatmul.mubr.msk.f32.gmra.mrb[26].mxu0 %vm20_vm1, %v5107_v20  ;;  %v5139_v20 = vld [vmem:[#allocation2 + $0x321] sm:$0xff] }
 0x1e8   :  { %9888 = vmatprep.mubr.msk.f32.mxu0 %vm20_vm1, %v5108_v4  ;;  %v5140_v4 = vld [vmem:[#allocation2 + $0x331] sm:$0xff] }
 0x1e9   :  { %9497 = vmatmul.mubr.msk.f32.gmra.mrb[28].mxu1 %vm20_vm1, %v2332_v2  ;;  %v2364_v2 = vld [vmem:[#allocation2 + $0x320] sm:$0xff] }
 0x1ea   :  { %9499 = vmatprep.mubr.msk.f32.mxu1 %vm20_vm1, %v12017_v12  ;;  %v2338_v12 = vld [vmem:[#allocation2 + $0x1e8] sm:$0xff] }
 0x1eb   :  { %9889 = vmatmul.mubr.msk.f32.gmra.mrb[28].mxu0 %vm20_vm1, %v5109_v23  ;;  %v5141_v23 = vld [vmem:[#allocation2 + $0x339] sm:$0xff] }
 0x1ec   :  { %9891 = vmatprep.mubr.msk.f32.mxu0 %vm20_vm1, %v5110_v24  ;;  %v5142_v24 = vld [vmem:[#allocation2 + $0x349] sm:$0xff] }
 0x1ed   :  { %9500 = vmatmul.mubr.msk.f32.gmra.mrb[30].mxu1 %vm20_vm1, %v12027_v16  ;;  %v5115_v16 = vld [vmem:[#allocation2 + $0x201] sm:$0xff] }
 0x1ee   :  { %9502 = vmatprep.mubr.msk.f32.mxu1 %vm20_vm1, %v2335_v26  ;;  %v5790_v26 = vld [vmem:[#allocation2 + $0x32] sm:$0xff] }
 0x1ef   :  { %9892 = vmatmul.mubr.msk.f32.gmra.mrb[30].mxu0 %vm20_vm1, %v5111_v25  ;;  %v5143_v25 = vld [vmem:[#allocation2 + $0x351] sm:$0xff] }
 0x1f0   :  { %9894 = vmatprep.mubr.msk.f32.mxu0 %vm20_vm1, %v5112_v27  ;;  %v10653_v27 = vld [vmem:[#allocation2 + $0x19] sm:$0xff] }
 0x1f1   :  { %9503 = vmatmul.mubr.msk.f32.gmra.mrb[32].mxu1 %vm20_vm1, %v2336_v28  ;;  %v5791_v28 = vld [vmem:[#allocation2 + $0x3a] sm:$0xff] }
 0x1f2   :  { %9505 = vmatprep.mubr.msk.f32.mxu1 %vm20_vm1, %v2337_v30  ;;  %v10654_v30 = vld [vmem:[#allocation2 + $0x21] sm:$0xff] }
 0x1f3   :  { %9895 = vmatmul.mubr.msk.f32.gmra.mrb[32].mxu0 %vm20_vm1, %v5113_v29  ;;  %v5792_v29 = vld [vmem:[#allocation2 + $0x4a] sm:$0xff] }
 0x1f4   :  { %9897 = vmatprep.mubr.msk.f32.mxu0 %vm20_vm1, %v5114_v31  ;;  %v5794_v31 = vld [vmem:[#allocation2 + $0x62] sm:$0xff] }
 0x1f5   :  { %9506 = vmatmul.mubr.msk.f32.gmra.mrb[34].mxu1 %vm20_vm1, %v2338_v12  ;;  %v10656_v12 = vld [vmem:[#allocation2 + $0x39] sm:$0xff] }
 0x1f6   :  { %9508 = vmatprep.mubr.msk.f32.mxu1 %vm20_vm1, %v2339_v32  ;;  %v5795_v32 = vld [vmem:[#allocation2 + $0x6a] sm:$0xff] }
 0x1f7   :  { %9898 = vmatmul.mubr.msk.f32.gmra.mrb[34].mxu0 %vm20_vm1, %v5115_v16  ;;  %v10657_v16 = vld [vmem:[#allocation2 + $0x49] sm:$0xff] }
 0x1f8   :  { %9900 = vmatprep.mubr.msk.f32.mxu0 %vm20_vm1, %v5116_v33  ;;  %v5796_v33 = vld [vmem:[#allocation2 + $0x7a] sm:$0xff] }
 0x1f9   :  { %9509 = vmatmul.mubr.msk.f32.gmra.mrb[36].mxu1 %vm20_vm1, %v2340_v6  ;;  %v10658_v6 = vld [vmem:[#allocation2 + $0x51] sm:$0xff] }
 0x1fa   :  { %9511 = vmatprep.mubr.msk.f32.mxu1 %vm20_vm1, %v2341_v35  ;;  %v5797_v35 = vld [vmem:[#allocation2 + $0x82] sm:$0xff] }
 0x1fb   :  { %9901 = vmatmul.mubr.msk.f32.gmra.mrb[36].mxu0 %vm20_vm1, %v5117_v34  ;;  %v10659_v34 = vld [vmem:[#allocation2 + $0x61] sm:$0xff] }
 0x1fc   :  { %9903 = vmatprep.mubr.msk.f32.mxu0 %vm20_vm1, %v5118_v21  ;;  %v5798_v21 = vld [vmem:[#allocation2 + $0x92] sm:$0xff] }
 0x1fd   :  { %9512 = vmatmul.mubr.msk.f32.gmra.mrb[38].mxu1 %vm20_vm1, %v2342_v36  ;;  %v10660_v36 = vld [vmem:[#allocation2 + $0x69] sm:$0xff] }
 0x1fe   :  { %9514 = vmatprep.mubr.msk.f32.mxu1 %vm20_vm1, %v2343_v38  ;;  %v5799_v38 = vld [vmem:[#allocation2 + $0x9a] sm:$0xff] }
 0x1ff   :  { %9904 = vmatmul.mubr.msk.f32.gmra.mrb[38].mxu0 %vm20_vm1, %v5119_v37  ;;  %v10661_v37 = vld [vmem:[#allocation2 + $0x79] sm:$0xff] }
 0x200   :  { %9906 = vmatprep.mubr.msk.f32.mxu0 %vm20_vm1, %v5120_v39  ;;  %v5800_v39 = vld [vmem:[#allocation2 + $0xaa] sm:$0xff] }
 0x201   :  { %9515 = vmatmul.mubr.msk.f32.gmra.mrb[40].mxu1 %vm20_vm1, %v2344_v40  ;;  %v10662_v40 = vld [vmem:[#allocation2 + $0x81] sm:$0xff] }
 0x202   :  { %9517 = vmatprep.mubr.msk.f32.mxu1 %vm20_vm1, %v2345_v42  ;;  %v5801_v42 = vld [vmem:[#allocation2 + $0xb2] sm:$0xff] }
 0x203   :  { %9907 = vmatmul.mubr.msk.f32.gmra.mrb[40].mxu0 %vm20_vm1, %v5121_v41  ;;  %v10663_v41 = vld [vmem:[#allocation2 + $0x91] sm:$0xff] }
 0x204   :  { %9909 = vmatprep.mubr.msk.f32.mxu0 %vm20_vm1, %v5122_v43  ;;  %v5802_v43 = vld [vmem:[#allocation2 + $0xc2] sm:$0xff] }
 0x205   :  { %9518 = vmatmul.mubr.msk.f32.gmra.mrb[42].mxu1 %vm20_vm1, %v2346_v44  ;;  %v10664_v44 = vld [vmem:[#allocation2 + $0x99] sm:$0xff] }
 0x206   :  { %9520 = vmatprep.mubr.msk.f32.mxu1 %vm20_vm1, %v2347_v46  ;;  %v5803_v46 = vld [vmem:[#allocation2 + $0xca] sm:$0xff] }
 0x207   :  { %9910 = vmatmul.mubr.msk.f32.gmra.mrb[42].mxu0 %vm20_vm1, %v5123_v45  ;;  %v10665_v45 = vld [vmem:[#allocation2 + $0xa9] sm:$0xff] }
 0x208   :  { %9912 = vmatprep.mubr.msk.f32.mxu0 %vm20_vm1, %v5124_v47  ;;  %v5804_v47 = vld [vmem:[#allocation2 + $0xda] sm:$0xff] }
 0x209   :  { %9521 = vmatmul.mubr.msk.f32.gmra.mrb[44].mxu1 %vm20_vm1, %v2348_v48  ;;  %v10666_v48 = vld [vmem:[#allocation2 + $0xb1] sm:$0xff] }
 0x20a   :  { %9523 = vmatprep.mubr.msk.f32.mxu1 %vm20_vm1, %v2349_v50  ;;  %v5805_v50 = vld [vmem:[#allocation2 + $0xe2] sm:$0xff] }
 0x20b   :  { %9913 = vmatmul.mubr.msk.f32.gmra.mrb[44].mxu0 %vm20_vm1, %v5125_v49  ;;  %v10667_v49 = vld [vmem:[#allocation2 + $0xc1] sm:$0xff] }
 0x20c   :  { %9915 = vmatprep.mubr.msk.f32.mxu0 %vm20_vm1, %v5126_v51  ;;  %v5806_v51 = vld [vmem:[#allocation2 + $0xf2] sm:$0xff] }
 0x20d   :  { %9524 = vmatmul.mubr.msk.f32.gmra.mrb[46].mxu1 %vm20_vm1, %v2350_v52  ;;  %v10668_v52 = vld [vmem:[#allocation2 + $0xc9] sm:$0xff] }
 0x20e   :  { %9526 = vmatprep.mubr.msk.f32.mxu1 %vm20_vm1, %v2351_v54  ;;  %v5807_v54 = vld [vmem:[#allocation2 + $0xfa] sm:$0xff] }
 0x20f   :  { %9916 = vmatmul.mubr.msk.f32.gmra.mrb[46].mxu0 %vm20_vm1, %v5127_v53  ;;  %v10669_v53 = vld [vmem:[#allocation2 + $0xd9] sm:$0xff] }
 0x210   :  { %9918 = vmatprep.mubr.msk.f32.mxu0 %vm20_vm1, %v5128_v55  ;;  %v5808_v55 = vld [vmem:[#allocation2 + $0x10a] sm:$0xff] }
 0x211   :  { %9527 = vmatmul.mubr.msk.f32.gmra.mrb[48].mxu1 %vm20_vm1, %v2352_v56  ;;  %v10670_v56 = vld [vmem:[#allocation2 + $0xe1] sm:$0xff] }
 0x212   :  { %9529 = vmatprep.mubr.msk.f32.mxu1 %vm20_vm1, %v2353_v58  ;;  %v5809_v58 = vld [vmem:[#allocation2 + $0x112] sm:$0xff] }
 0x213   :  { %9919 = vmatmul.mubr.msk.f32.gmra.mrb[48].mxu0 %vm20_vm1, %v5129_v57  ;;  %v10671_v57 = vld [vmem:[#allocation2 + $0xf1] sm:$0xff] }
 0x214   :  { %9921 = vmatprep.mubr.msk.f32.mxu0 %vm20_vm1, %v5130_v59  ;;  %v5810_v59 = vld [vmem:[#allocation2 + $0x122] sm:$0xff] }
 0x215   :  { %9530 = vmatmul.mubr.msk.f32.gmra.mrb[50].mxu1 %vm20_vm1, %v2354_v60  ;;  %v10672_v60 = vld [vmem:[#allocation2 + $0xf9] sm:$0xff] }
 0x216   :  { %9532 = vmatprep.mubr.msk.f32.mxu1 %vm20_vm1, %v2355_v62  ;;  %v5811_v62 = vld [vmem:[#allocation2 + $0x12a] sm:$0xff] }
 0x217   :  { %9922 = vmatmul.mubr.msk.f32.gmra.mrb[50].mxu0 %vm20_vm1, %v5131_v61  ;;  %v10673_v61 = vld [vmem:[#allocation2 + $0x109] sm:$0xff] }
 0x218   :  { %9924 = vmatprep.mubr.msk.f32.mxu0 %vm20_vm1, %v5132_v63  ;;  %v5812_v63 = vld [vmem:[#allocation2 + $0x13a] sm:$0xff] }
 0x219   :  { %9533 = vmatmul.mubr.msk.f32.gmra.mrb[52].mxu1 %vm20_vm1, %v2356_v0  ;;  %v10674_v0 = vld [vmem:[#allocation2 + $0x111] sm:$0xff] }
 0x21a   :  { %9535 = vmatprep.mubr.msk.f32.mxu1 %vm20_vm1, %v2357_v3  ;;  %v5813_v3 = vld [vmem:[#allocation2 + $0x142] sm:$0xff] }
 0x21b   :  { %9925 = vmatmul.mubr.msk.f32.gmra.mrb[52].mxu0 %vm20_vm1, %v5133_v1  ;;  %v10675_v1 = vld [vmem:[#allocation2 + $0x121] sm:$0xff] }
 0x21c   :  { %9927 = vmatprep.mubr.msk.f32.mxu0 %vm20_vm1, %v5134_v5  ;;  %v5814_v5 = vld [vmem:[#allocation2 + $0x152] sm:$0xff] }
 0x21d   :  { %9536 = vmatmul.mubr.msk.f32.gmra.mrb[54].mxu1 %vm20_vm1, %v2358_v7  ;;  %v10676_v7 = vld [vmem:[#allocation2 + $0x129] sm:$0xff] }
 0x21e   :  { %9538 = vmatprep.mubr.msk.f32.mxu1 %vm20_vm1, %v2359_v11  ;;  %v5815_v11 = vld [vmem:[#allocation2 + $0x15a] sm:$0xff] }
 0x21f   :  { %9928 = vmatmul.mubr.msk.f32.gmra.mrb[54].mxu0 %vm20_vm1, %v5135_v9  ;;  %v10677_v9 = vld [vmem:[#allocation2 + $0x139] sm:$0xff] }
 0x220   :  { %9930 = vmatprep.mubr.msk.f32.mxu0 %vm20_vm1, %v5136_v13  ;;  %v5816_v13 = vld [vmem:[#allocation2 + $0x16a] sm:$0xff] }
 0x221   :  { %9539 = vmatmul.mubr.msk.f32.gmra.mrb[56].mxu1 %vm20_vm1, %v2360_v10  ;;  %v10678_v10 = vld [vmem:[#allocation2 + $0x141] sm:$0xff] }
 0x222   :  { %9541 = vmatprep.mubr.msk.f32.mxu1 %vm20_vm1, %v2361_v14  ;;  %v5817_v14 = vld [vmem:[#allocation2 + $0x172] sm:$0xff] }
 0x223   :  { %9931 = vmatmul.mubr.msk.f32.gmra.mrb[56].mxu0 %vm20_vm1, %v5137_v18  ;;  %v10679_v18 = vld [vmem:[#allocation2 + $0x151] sm:$0xff] }
 0x224   :  { %9933 = vmatprep.mubr.msk.f32.mxu0 %vm20_vm1, %v5138_v15  ;;  %v5818_v15 = vld [vmem:[#allocation2 + $0x182] sm:$0xff] }
 0x225   :  { %9542 = vmatmul.mubr.msk.f32.gmra.mrb[58].mxu1 %vm20_vm1, %v2362_v19  ;;  %v10680_v19 = vld [vmem:[#allocation2 + $0x159] sm:$0xff] }
 0x226   :  { %9544 = vmatprep.mubr.msk.f32.mxu1 %vm20_vm1, %v2363_v22  ;;  %v5819_v22 = vld [vmem:[#allocation2 + $0x18a] sm:$0xff] }
 0x227   :  { %9934 = vmatmul.mubr.msk.f32.gmra.mrb[58].mxu0 %vm20_vm1, %v5139_v20  ;;  %v10681_v20 = vld [vmem:[#allocation2 + $0x169] sm:$0xff] }
 0x228   :  { %9936 = vmatprep.mubr.msk.f32.mxu0 %vm20_vm1, %v5140_v4  ;;  %v5820_v4 = vld [vmem:[#allocation2 + $0x19a] sm:$0xff] }
 0x229   :  { %9545 = vmatmul.mubr.msk.f32.gmra.mrb[60].mxu1 %vm20_vm1, %v2364_v2  ;;  %v10682_v2 = vld [vmem:[#allocation2 + $0x171] sm:$0xff] }
 0x22a   :  { %9547 = vmatprep.mubr.msk.f32.mxu1 %vm20_vm1, %v12145_v17  ;;  %v10655_v17 = vld [vmem:[#allocation2 + $0x31] sm:$0xff] }
 0x22b   :  { %9937 = vmatmul.mubr.msk.f32.gmra.mrb[60].mxu0 %vm20_vm1, %v5141_v23  ;;  %v10683_v23 = vld [vmem:[#allocation2 + $0x181] sm:$0xff] }
 0x22c   :  { %9939 = vmatprep.mubr.msk.f32.mxu0 %vm20_vm1, %v5142_v24  ;;  %v5821_v24 = vld [vmem:[#allocation2 + $0x1a2] sm:$0xff] }
 0x22d   :  { %9548 = vmatmul.mubr.msk.f32.gmra.mrb[62].mxu1 %vm20_vm1, %v12155_v8  ;;  %v5793_v8 = vld [vmem:[#allocation2 + $0x52] sm:$0xff] }
 0x22e   :  { %10042 = vmatprep.mubr.msk.f32.mxu1 %vm20_vm1, %v10653_v27  ;;  %v10685_v27 = vld [vmem:[#allocation2 + $0x1c9] sm:$0xff] }
 0x22f   :  { %9940 = vmatmul.mubr.msk.f32.gmra.mrb[62].mxu0 %vm20_vm1, %v5143_v25  ;;  %v5822_v25 = vld [vmem:[#allocation2 + $0x1e2] sm:$0xff] }
 0x230   :  { %9944 = vmatprep.mubr.msk.f32.mxu0 %vm20_vm1, %v5790_v26  ;;  %v10684_v26 = vld [vmem:[#allocation2 + $0x189] sm:$0xff] }
 0x231   :  { %10043 = vmatmul.mubr.msk.f32.vlgmr.msra.gmra.mrb[64].mxu1 %vm20_vm1, %v10654_v30  ;;  %v10686_v30 = vld [vmem:[#allocation2 + $0x1d1] sm:$0xff] }
 0x232   :  { %10045 = vmatprep.mubr.msk.f32.mxu1 %vm20_vm1, %v10655_v17  ;;  %v10687_v17 = vld [vmem:[#allocation2 + $0x1e1] sm:$0xff] }
 0x233   :  { %9945 = vmatmul.mubr.msk.f32.vlgmr.msra.gmra.mrb[0].mxu0 %vm20_vm1, %v5791_v28  ;;  %v5823_v28 = vld [vmem:[#allocation2 + $0x1ea] sm:$0xff] }
 0x234   :  { %9947 = vmatprep.mubr.msk.f32.mxu0 %vm20_vm1, %v5792_v29  ;;  %v5824_v29 = vld [vmem:[#allocation2 + $0x1fa] sm:$0xff] }
 0x235   :  { %10046 = vmatmul.mubr.msk.f32.gmra.mrb[66].mxu1 %vm20_vm1, %v10656_v12  ;;  %v10688_v12 = vld [vmem:[#allocation2 + $0x1e9] sm:$0xff] }
 0x236   :  { %10048 = vmatprep.mubr.msk.f32.mxu1 %vm20_vm1, %v10657_v16  ;;  %v10689_v16 = vld [vmem:[#allocation2 + $0x1f9] sm:$0xff] }
 0x237   :  { %9948 = vmatmul.mubr.msk.f32.gmra.mrb[2].mxu0 %vm20_vm1, %v5793_v8  ;;  %v5825_v8 = vld [vmem:[#allocation2 + $0x202] sm:$0xff] }
 0x238   :  { %9950 = vmatprep.mubr.msk.f32.mxu0 %vm20_vm1, %v5794_v31  ;;  %v5826_v31 = vld [vmem:[#allocation2 + $0x212] sm:$0xff] }
 0x239   :  { %10049 = vmatmul.mubr.msk.f32.gmra.mrb[68].mxu1 %vm20_vm1, %v10658_v6  ;;  %v10690_v6 = vld [vmem:[#allocation2 + $0x201] sm:$0xff] }
 0x23a   :  { %10051 = vmatprep.mubr.msk.f32.mxu1 %vm20_vm1, %v10659_v34  ;;  %v10691_v34 = vld [vmem:[#allocation2 + $0x211] sm:$0xff] }
 0x23b   :  { %9951 = vmatmul.mubr.msk.f32.gmra.mrb[4].mxu0 %vm20_vm1, %v5795_v32  ;;  %v5827_v32 = vld [vmem:[#allocation2 + $0x21a] sm:$0xff] }
 0x23c   :  { %9953 = vmatprep.mubr.msk.f32.mxu0 %vm20_vm1, %v5796_v33  ;;  %v5828_v33 = vld [vmem:[#allocation2 + $0x22a] sm:$0xff] }
 0x23d   :  { %10052 = vmatmul.mubr.msk.f32.gmra.mrb[70].mxu1 %vm20_vm1, %v10660_v36  ;;  %v10692_v36 = vld [vmem:[#allocation2 + $0x219] sm:$0xff] }
 0x23e   :  { %10054 = vmatprep.mubr.msk.f32.mxu1 %vm20_vm1, %v10661_v37  ;;  %v10693_v37 = vld [vmem:[#allocation2 + $0x229] sm:$0xff] }
 0x23f   :  { %9954 = vmatmul.mubr.msk.f32.gmra.mrb[6].mxu0 %vm20_vm1, %v5797_v35  ;;  %v5829_v35 = vld [vmem:[#allocation2 + $0x232] sm:$0xff] }
 0x240   :  { %9956 = vmatprep.mubr.msk.f32.mxu0 %vm20_vm1, %v5798_v21  ;;  %v5830_v21 = vld [vmem:[#allocation2 + $0x242] sm:$0xff] }
 0x241   :  { %10055 = vmatmul.mubr.msk.f32.gmra.mrb[72].mxu1 %vm20_vm1, %v10662_v40  ;;  %v10694_v40 = vld [vmem:[#allocation2 + $0x231] sm:$0xff] }
 0x242   :  { %10057 = vmatprep.mubr.msk.f32.mxu1 %vm20_vm1, %v10663_v41  ;;  %v10695_v41 = vld [vmem:[#allocation2 + $0x241] sm:$0xff] }
 0x243   :  { %9957 = vmatmul.mubr.msk.f32.gmra.mrb[8].mxu0 %vm20_vm1, %v5799_v38  ;;  %v5831_v38 = vld [vmem:[#allocation2 + $0x24a] sm:$0xff] }
 0x244   :  { %9959 = vmatprep.mubr.msk.f32.mxu0 %vm20_vm1, %v5800_v39  ;;  %v5832_v39 = vld [vmem:[#allocation2 + $0x25a] sm:$0xff] }
 0x245   :  { %10058 = vmatmul.mubr.msk.f32.gmra.mrb[74].mxu1 %vm20_vm1, %v10664_v44 }
 0x246   :  { %10060 = vmatprep.mubr.msk.f32.mxu1 %vm20_vm1, %v10665_v45 }
 0x247   :  { %9960 = vmatmul.mubr.msk.f32.gmra.mrb[10].mxu0 %vm20_vm1, %v5801_v42  ;;  %v5833_v42 = vld [vmem:[#allocation2 + $0x262] sm:$0xff] }
 0x248   :  { %9962 = vmatprep.mubr.msk.f32.mxu0 %vm20_vm1, %v5802_v43  ;;  %v5834_v43 = vld [vmem:[#allocation2 + $0x272] sm:$0xff] }
 0x249   :  { %10061 = vmatmul.mubr.msk.f32.gmra.mrb[76].mxu1 %vm20_vm1, %v10666_v48  ;;  %v5835_v48 = vld [vmem:[#allocation2 + $0x27a] sm:$0xff] }
 0x24a   :  { %10063 = vmatprep.mubr.msk.f32.mxu1 %vm20_vm1, %v10667_v49  ;;  %v5836_v49 = vld [vmem:[#allocation2 + $0x28a] sm:$0xff] }
 0x24b   :  { %9963 = vmatmul.mubr.msk.f32.gmra.mrb[12].mxu0 %vm20_vm1, %v5803_v46  ;;  %v10696_v46 = vld [vmem:[#allocation2 + $0x249] sm:$0xff] }
 0x24c   :  { %9965 = vmatprep.mubr.msk.f32.mxu0 %vm20_vm1, %v5804_v47  ;;  %v10697_v47 = vld [vmem:[#allocation2 + $0x259] sm:$0xff] }
 0x24d   :  { %10064 = vmatmul.mubr.msk.f32.gmra.mrb[78].mxu1 %vm20_vm1, %v10668_v52  ;;  %v10698_v52 = vld [vmem:[#allocation2 + $0x261] sm:$0xff] }
 0x24e   :  { %10066 = vmatprep.mubr.msk.f32.mxu1 %vm20_vm1, %v10669_v53  ;;  %v10699_v53 = vld [vmem:[#allocation2 + $0x271] sm:$0xff] }
 0x24f   :  { %9966 = vmatmul.mubr.msk.f32.gmra.mrb[14].mxu0 %vm20_vm1, %v5805_v50 }
 0x250   :  { %9968 = vmatprep.mubr.msk.f32.mxu0 %vm20_vm1, %v5806_v51 }
 0x251   :  { %10067 = vmatmul.mubr.msk.f32.gmra.mrb[80].mxu1 %vm20_vm1, %v10670_v56 }
 0x252   :  { %10069 = vmatprep.mubr.msk.f32.mxu1 %vm20_vm1, %v10671_v57 }
 0x253   :  { %9969 = vmatmul.mubr.msk.f32.gmra.mrb[16].mxu0 %vm20_vm1, %v5807_v54  ;;  %v5837_v54 = vld [vmem:[#allocation2 + $0x292] sm:$0xff] }
 0x254   :  { %9971 = vmatprep.mubr.msk.f32.mxu0 %vm20_vm1, %v5808_v55  ;;  %v5838_v55 = vld [vmem:[#allocation2 + $0x2a2] sm:$0xff] }
 0x255   :  { %10070 = vmatmul.mubr.msk.f32.gmra.mrb[82].mxu1 %vm20_vm1, %v10672_v60  ;;  %v5839_v60 = vld [vmem:[#allocation2 + $0x2aa] sm:$0xff] }
 0x256   :  { %10072 = vmatprep.mubr.msk.f32.mxu1 %vm20_vm1, %v10673_v61  ;;  %v5840_v61 = vld [vmem:[#allocation2 + $0x2ba] sm:$0xff] }
 0x257   :  { %9972 = vmatmul.mubr.msk.f32.gmra.mrb[18].mxu0 %vm20_vm1, %v5809_v58  ;;  %v10700_v58 = vld [vmem:[#allocation2 + $0x279] sm:$0xff] }
 0x258   :  { %9974 = vmatprep.mubr.msk.f32.mxu0 %vm20_vm1, %v5810_v59  ;;  %v10701_v59 = vld [vmem:[#allocation2 + $0x289] sm:$0xff] }
 0x259   :  { %10073 = vmatmul.mubr.msk.f32.gmra.mrb[84].mxu1 %vm20_vm1, %v10674_v0  ;;  %v10702_v0 = vld [vmem:[#allocation2 + $0x291] sm:$0xff] }
 0x25a   :  { %10075 = vmatprep.mubr.msk.f32.mxu1 %vm20_vm1, %v10675_v1  ;;  %v10703_v1 = vld [vmem:[#allocation2 + $0x2a1] sm:$0xff] }
 0x25b   :  { %9975 = vmatmul.mubr.msk.f32.gmra.mrb[20].mxu0 %vm20_vm1, %v5811_v62 }
 0x25c   :  { %9977 = vmatprep.mubr.msk.f32.mxu0 %vm20_vm1, %v5812_v63 }
 0x25d   :  { %10076 = vmatmul.mubr.msk.f32.gmra.mrb[86].mxu1 %vm20_vm1, %v10676_v7 }
 0x25e   :  { %10078 = vmatprep.mubr.msk.f32.mxu1 %vm20_vm1, %v10677_v9 }
 0x25f   :  { %9978 = vmatmul.mubr.msk.f32.gmra.mrb[22].mxu0 %vm20_vm1, %v5813_v3  ;;  %v5841_v3 = vld [vmem:[#allocation2 + $0x2c2] sm:$0xff] }
 0x260   :  { %9980 = vmatprep.mubr.msk.f32.mxu0 %vm20_vm1, %v5814_v5  ;;  %v5842_v5 = vld [vmem:[#allocation2 + $0x2d2] sm:$0xff] }
 0x261   :  { %10079 = vmatmul.mubr.msk.f32.gmra.mrb[88].mxu1 %vm20_vm1, %v10678_v10  ;;  %v5843_v10 = vld [vmem:[#allocation2 + $0x2da] sm:$0xff] }
 0x262   :  { %10081 = vmatprep.mubr.msk.f32.mxu1 %vm20_vm1, %v10679_v18  ;;  %v5844_v18 = vld [vmem:[#allocation2 + $0x2ea] sm:$0xff] }
 0x263   :  { %9981 = vmatmul.mubr.msk.f32.gmra.mrb[24].mxu0 %vm20_vm1, %v5815_v11  ;;  %v10704_v11 = vld [vmem:[#allocation2 + $0x2a9] sm:$0xff] }
 0x264   :  { %9983 = vmatprep.mubr.msk.f32.mxu0 %vm20_vm1, %v5816_v13  ;;  %v10705_v13 = vld [vmem:[#allocation2 + $0x2b9] sm:$0xff] }
 0x265   :  { %10082 = vmatmul.mubr.msk.f32.gmra.mrb[90].mxu1 %vm20_vm1, %v10680_v19  ;;  %v10706_v19 = vld [vmem:[#allocation2 + $0x2c1] sm:$0xff] }
 0x266   :  { %10084 = vmatprep.mubr.msk.f32.mxu1 %vm20_vm1, %v10681_v20  ;;  %v10707_v20 = vld [vmem:[#allocation2 + $0x2d1] sm:$0xff] }
 0x267   :  { %9984 = vmatmul.mubr.msk.f32.gmra.mrb[26].mxu0 %vm20_vm1, %v5817_v14 }
 0x268   :  { %9986 = vmatprep.mubr.msk.f32.mxu0 %vm20_vm1, %v5818_v15 }
 0x269   :  { %10085 = vmatmul.mubr.msk.f32.gmra.mrb[92].mxu1 %vm20_vm1, %v10682_v2 }
 0x26a   :  { %10087 = vmatprep.mubr.msk.f32.mxu1 %vm20_vm1, %v10683_v23 }
 0x26b   :  { %9987 = vmatmul.mubr.msk.f32.gmra.mrb[28].mxu0 %vm20_vm1, %v5819_v22  ;;  %v5845_v22 = vld [vmem:[#allocation2 + $0x2f2] sm:$0xff] }
 0x26c   :  { %9989 = vmatprep.mubr.msk.f32.mxu0 %vm20_vm1, %v5820_v4  ;;  %v5846_v4 = vld [vmem:[#allocation2 + $0x302] sm:$0xff] }
 0x26d   :  { %10088 = vmatmul.mubr.msk.f32.gmra.mrb[94].mxu1 %vm20_vm1, %v10684_v26  ;;  %v5847_v26 = vld [vmem:[#allocation2 + $0x30a] sm:$0xff] }
 0x26e   :  { %10090 = vmatprep.mubr.msk.f32.mxu1 %vm20_vm1, %v10685_v27  ;;  %v5848_v27 = vld [vmem:[#allocation2 + $0x31a] sm:$0xff] }
 0x26f   :  { %9990 = vmatmul.mubr.msk.f32.gmra.mrb[30].mxu0 %vm20_vm1, %v5821_v24  ;;  %v10708_v24 = vld [vmem:[#allocation2 + $0x2d9] sm:$0xff] }
 0x270   :  { %9992 = vmatprep.mubr.msk.f32.mxu0 %vm20_vm1, %v5822_v25  ;;  %v10709_v25 = vld [vmem:[#allocation2 + $0x2e9] sm:$0xff] }
 0x271   :  { %10091 = vmatmul.mubr.msk.f32.gmra.mrb[96].mxu1 %vm20_vm1, %v10686_v30  ;;  %v10710_v30 = vld [vmem:[#allocation2 + $0x2f1] sm:$0xff] }
 0x272   :  { %10093 = vmatprep.mubr.msk.f32.mxu1 %vm20_vm1, %v10687_v17  ;;  %v10711_v17 = vld [vmem:[#allocation2 + $0x301] sm:$0xff] }
 0x273   :  { %9993 = vmatmul.mubr.msk.f32.gmra.mrb[32].mxu0 %vm20_vm1, %v5823_v28 }
 0x274   :  { %9995 = vmatprep.mubr.msk.f32.mxu0 %vm20_vm1, %v5824_v29 }
 0x275   :  { %10094 = vmatmul.mubr.msk.f32.gmra.mrb[98].mxu1 %vm20_vm1, %v10688_v12 }
 0x276   :  { %10096 = vmatprep.mubr.msk.f32.mxu1 %vm20_vm1, %v10689_v16 }
 0x277   :  { %9996 = vmatmul.mubr.msk.f32.gmra.mrb[34].mxu0 %vm20_vm1, %v5825_v8  ;;  %v5849_v8 = vld [vmem:[#allocation2 + $0x322] sm:$0xff] }
 0x278   :  { %9998 = vmatprep.mubr.msk.f32.mxu0 %vm20_vm1, %v5826_v31  ;;  %v5850_v31 = vld [vmem:[#allocation2 + $0x332] sm:$0xff] }
 0x279   :  { %10097 = vmatmul.mubr.msk.f32.gmra.mrb[100].mxu1 %vm20_vm1, %v10690_v6  ;;  %v5851_v6 = vld [vmem:[#allocation2 + $0x33a] sm:$0xff] }
 0x27a   :  { %10099 = vmatprep.mubr.msk.f32.mxu1 %vm20_vm1, %v10691_v34  ;;  %v5852_v34 = vld [vmem:[#allocation2 + $0x34a] sm:$0xff] }
 0x27b   :  { %9999 = vmatmul.mubr.msk.f32.gmra.mrb[36].mxu0 %vm20_vm1, %v5827_v32  ;;  %v10712_v32 = vld [vmem:[#allocation2 + $0x309] sm:$0xff] }
 0x27c   :  { %10001 = vmatprep.mubr.msk.f32.mxu0 %vm20_vm1, %v5828_v33  ;;  %v10713_v33 = vld [vmem:[#allocation2 + $0x319] sm:$0xff] }
 0x27d   :  { %10100 = vmatmul.mubr.msk.f32.gmra.mrb[102].mxu1 %vm20_vm1, %v10692_v36  ;;  %v10714_v36 = vld [vmem:[#allocation2 + $0x321] sm:$0xff] }
 0x27e   :  { %10102 = vmatprep.mubr.msk.f32.mxu1 %vm20_vm1, %v10693_v37  ;;  %v10715_v37 = vld [vmem:[#allocation2 + $0x331] sm:$0xff] }
 0x27f   :  { %10002 = vmatmul.mubr.msk.f32.gmra.mrb[38].mxu0 %vm20_vm1, %v5829_v35 }
 0x280   :  { %10004 = vmatprep.mubr.msk.f32.mxu0 %vm20_vm1, %v5830_v21 }
 0x281   :  { %10103 = vmatmul.mubr.msk.f32.gmra.mrb[104].mxu1 %vm20_vm1, %v10694_v40 }
 0x282   :  { %10105 = vmatprep.mubr.msk.f32.mxu1 %vm20_vm1, %v10695_v41  ;;  %v10716_v41 = vld [vmem:[#allocation2 + $0x339] sm:$0xff] }
 0x283   :  { %10005 = vmatmul.mubr.msk.f32.gmra.mrb[40].mxu0 %vm20_vm1, %v5831_v38  ;;  %v5853_v38 = vld [vmem:[#allocation2 + $0x352] sm:$0xff] }
 0x284   :  { %10007 = vmatprep.mubr.msk.f32.mxu0 %vm20_vm1, %v5832_v39  ;;  %v12391_v44 = vpop.f32.mrb[0].mxu1 }
 0x285   :  { %v12393_v45 = vpop.f32.mrb[1].mxu1  ;;  %10106 = vmatmul.mubr.msk.f32.gmra.mrb[106].mxu1 %vm20_vm1, %v10696_v46 }
 0x286   :  { %10108 = vmatprep.mubr.msk.f32.mxu1 %vm20_vm1, %v10697_v47 }
 0x287   :  { %10008 = vmatmul.mubr.msk.f32.gmra.mrb[42].mxu0 %vm20_vm1, %v5833_v42 }
 0x288   :  { %10010 = vmatprep.mubr.msk.f32.mxu0 %vm20_vm1, %v5834_v43  ;;  %v12399_v50 = vpop.f32.mrb[2].mxu1 }
 0x289   :  { %v12401_v51 = vpop.f32.mrb[3].mxu1  ;;  %10109 = vmatmul.mubr.msk.f32.gmra.mrb[108].mxu1 %vm20_vm1, %v10698_v52 }
 0x28a   :  { %10111 = vmatprep.mubr.msk.f32.mxu1 %vm20_vm1, %v10699_v53 }
 0x28b   :  { %10011 = vmatmul.mubr.msk.f32.gmra.mrb[44].mxu0 %vm20_vm1, %v5835_v48 }
 0x28c   :  { %10013 = vmatprep.mubr.msk.f32.mxu0 %vm20_vm1, %v5836_v49  ;;  %v12407_v56 = vpop.f32.mrb[4].mxu1 }
 0x28d   :  { %v12409_v57 = vpop.f32.mrb[5].mxu1  ;;  %10112 = vmatmul.mubr.msk.f32.gmra.mrb[110].mxu1 %vm20_vm1, %v10700_v58 }
 0x28e   :  { %10114 = vmatprep.mubr.msk.f32.mxu1 %vm20_vm1, %v10701_v59 }
 0x28f   :  { %10014 = vmatmul.mubr.msk.f32.gmra.mrb[46].mxu0 %vm20_vm1, %v5837_v54 }
 0x290   :  { %10016 = vmatprep.mubr.msk.f32.mxu0 %vm20_vm1, %v5838_v55  ;;  %v12415_v62 = vpop.f32.mrb[6].mxu1 }
 0x291   :  { %v12417_v63 = vpop.f32.mrb[7].mxu1  ;;  %10115 = vmatmul.mubr.msk.f32.gmra.mrb[112].mxu1 %vm20_vm1, %v10702_v0 }
 0x292   :  { %10117 = vmatprep.mubr.msk.f32.mxu1 %vm20_vm1, %v10703_v1 }
 0x293   :  { %10017 = vmatmul.mubr.msk.f32.gmra.mrb[48].mxu0 %vm20_vm1, %v5839_v60 }
 0x294   :  { %10019 = vmatprep.mubr.msk.f32.mxu0 %vm20_vm1, %v5840_v61  ;;  %v12423_v7 = vpop.f32.mrb[8].mxu1 }
 0x295   :  { %v12425_v9 = vpop.f32.mrb[9].mxu1  ;;  %10118 = vmatmul.mubr.msk.f32.gmra.mrb[114].mxu1 %vm20_vm1, %v10704_v11 }
 0x296   :  { %10120 = vmatprep.mubr.msk.f32.mxu1 %vm20_vm1, %v10705_v13 }
 0x297   :  { %10020 = vmatmul.mubr.msk.f32.gmra.mrb[50].mxu0 %vm20_vm1, %v5841_v3 }
 0x298   :  { %10022 = vmatprep.mubr.msk.f32.mxu0 %vm20_vm1, %v5842_v5  ;;  %v12431_v14 = vpop.f32.mrb[10].mxu1 }
 0x299   :  { %v12433_v15 = vpop.f32.mrb[11].mxu1  ;;  %10121 = vmatmul.mubr.msk.f32.gmra.mrb[116].mxu1 %vm20_vm1, %v10706_v19 }
 0x29a   :  { %10123 = vmatprep.mubr.msk.f32.mxu1 %vm20_vm1, %v10707_v20 }
 0x29b   :  { %10023 = vmatmul.mubr.msk.f32.gmra.mrb[52].mxu0 %vm20_vm1, %v5843_v10 }
 0x29c   :  { %10025 = vmatprep.mubr.msk.f32.mxu0 %vm20_vm1, %v5844_v18  ;;  %v12439_v2 = vpop.f32.mrb[12].mxu1 }
 0x29d   :  { %v12441_v23 = vpop.f32.mrb[13].mxu1  ;;  %10124 = vmatmul.mubr.msk.f32.gmra.mrb[118].mxu1 %vm20_vm1, %v10708_v24 }
 0x29e   :  { %10126 = vmatprep.mubr.msk.f32.mxu1 %vm20_vm1, %v10709_v25 }
 0x29f   :  { %10026 = vmatmul.mubr.msk.f32.gmra.mrb[54].mxu0 %vm20_vm1, %v5845_v22 }
 0x2a0   :  { %10028 = vmatprep.mubr.msk.f32.mxu0 %vm20_vm1, %v5846_v4  ;;  %v12447_v28 = vpop.f32.mrb[14].mxu1 }
 0x2a1   :  { %v12449_v29 = vpop.f32.mrb[15].mxu1  ;;  %10127 = vmatmul.mubr.msk.f32.gmra.mrb[120].mxu1 %vm20_vm1, %v10710_v30 }
 0x2a2   :  { %10129 = vmatprep.mubr.msk.f32.mxu1 %vm20_vm1, %v10711_v17 }
 0x2a3   :  { %10029 = vmatmul.mubr.msk.f32.gmra.mrb[56].mxu0 %vm20_vm1, %v5847_v26 }
 0x2a4   :  { %10031 = vmatprep.mubr.msk.f32.mxu0 %vm20_vm1, %v5848_v27  ;;  %v12455_v12 = vpop.f32.mrb[16].mxu1 }
 0x2a5   :  { %v12457_v16 = vpop.f32.mrb[17].mxu1  ;;  %10130 = vmatmul.mubr.msk.f32.gmra.mrb[122].mxu1 %vm20_vm1, %v10712_v32 }
 0x2a6   :  { %10132 = vmatprep.mubr.msk.f32.mxu1 %vm20_vm1, %v10713_v33 }
 0x2a7   :  { %10032 = vmatmul.mubr.msk.f32.gmra.mrb[58].mxu0 %vm20_vm1, %v5849_v8 }
 0x2a8   :  { %10034 = vmatprep.mubr.msk.f32.mxu0 %vm20_vm1, %v5850_v31  ;;  %v12463_v35 = vpop.f32.mrb[18].mxu1 }
 0x2a9   :  { %v12465_v21 = vpop.f32.mrb[19].mxu1  ;;  %10133 = vmatmul.mubr.msk.f32.gmra.mrb[124].mxu1 %vm20_vm1, %v10714_v36 }
 0x2aa   :  { %10135 = vmatprep.mubr.msk.f32.mxu1 %vm20_vm1, %v10715_v37 }
 0x2ab   :  { %10035 = vmatmul.mubr.msk.f32.gmra.mrb[60].mxu0 %vm20_vm1, %v5851_v6 }
 0x2ac   :  { %10037 = vmatprep.mubr.msk.f32.mxu0 %vm20_vm1, %v5852_v34  ;;  %v12471_v39 = vpop.f32.mrb[20].mxu1 }
 0x2ad   :  { %v12473_v40 = vpop.f32.mrb[21].mxu1  ;;  %10136 = vmatmul.mubr.msk.f32.gmra.mrb[126].mxu1 %vm20_vm1, %v10716_v41 }
 0x2af   :  { %10038 = vmatmul.mubr.msk.f32.gmra.mrb[62].mxu0 %vm20_vm1, %v5853_v38 }
 0x2b0   :  { %v12477_v42 = vpop.f32.mrb[22].mxu1 }
 0x2b1   :  { %v12479_v43 = vpop.f32.mrb[23].mxu1 }
 0x2b4   :  { %v12481_v46 = vpop.f32.mrb[24].mxu1 }
 0x2b5   :  { %v12483_v47 = vpop.f32.mrb[25].mxu1 }
 0x2b8   :  { %v12485_v48 = vpop.f32.mrb[26].mxu1 }
 0x2b9   :  { %v12487_v49 = vpop.f32.mrb[27].mxu1 }
 0x2bc   :  { %v12489_v52 = vpop.f32.mrb[28].mxu1 }
 0x2bd   :  { %v12491_v53 = vpop.f32.mrb[29].mxu1 }
 0x2c0   :  { %v12493_v54 = vpop.f32.mrb[30].mxu1 }
 0x2c1   :  { %v12495_v55 = vpop.f32.mrb[31].mxu1 }
 0x2c4   :  { %v12497_v58 = vpop.f32.mrb[32].mxu1 }
 0x2c5   :  { %v12499_v59 = vpop.f32.mrb[33].mxu1 }
 0x2c8   :  { %v12501_v60 = vpop.f32.mrb[34].mxu1 }
 0x2c9   :  { %v12503_v61 = vpop.f32.mrb[35].mxu1 }
 0x2cc   :  { %v12505_v0 = vpop.f32.mrb[36].mxu1 }
 0x2cd   :  { %v12507_v1 = vpop.f32.mrb[37].mxu1 }
 0x2d0   :  { %v12509_v3 = vpop.f32.mrb[38].mxu1 }
 0x2d1   :  { %v12511_v5 = vpop.f32.mrb[39].mxu1 }
 0x2d4   :  { %v12513_v11 = vpop.f32.mrb[40].mxu1 }
 0x2d5   :  { %v12515_v13 = vpop.f32.mrb[41].mxu1 }
 0x2d8   :  { %v12517_v10 = vpop.f32.mrb[42].mxu1 }
 0x2d9   :  { %v12519_v18 = vpop.f32.mrb[43].mxu1 }
 0x2dc   :  { %v12521_v19 = vpop.f32.mrb[44].mxu1 }
 0x2dd   :  { %v12523_v20 = vpop.f32.mrb[45].mxu1 }
 0x2e0   :  { %v12525_v22 = vpop.f32.mrb[46].mxu1 }
 0x2e1   :  { %v12527_v4 = vpop.f32.mrb[47].mxu1 }
 0x2e4   :  { %v12529_v24 = vpop.f32.mrb[48].mxu1 }
 0x2e5   :  { %v12531_v25 = vpop.f32.mrb[49].mxu1 }
 0x2e8   :  { %v12533_v26 = vpop.f32.mrb[50].mxu1 }
 0x2e9   :  { %v12535_v27 = vpop.f32.mrb[51].mxu1 }
 0x2ec   :  { %v12537_v30 = vpop.f32.mrb[52].mxu1 }
 0x2ed   :  { %v12539_v17 = vpop.f32.mrb[53].mxu1 }
 0x2ee   :  { %14468 = vst [vmem:[#allocation11_spill] sm:$0xff] %v12539_v17 }
 0x2f0   :  { %v12541_v8 = vpop.f32.mrb[54].mxu1 }
 0x2f1   :  { %14469 = vst [vmem:[#allocation12_spill] sm:$0xff] %v12541_v8  ;;  %v12543_v31 = vpop.f32.mrb[55].mxu1 }
 0x2f4   :  { %v12545_v32 = vpop.f32.mrb[56].mxu1 }
 0x2f5   :  { %14470 = vst [vmem:[#allocation13_spill] sm:$0xff] %v12545_v32  ;;  %v12547_v33 = vpop.f32.mrb[57].mxu1 }
 0x2f6   :  { %14471 = vst [vmem:[#allocation14_spill] sm:$0xff] %v12547_v33 }
 0x2f8   :  { %v12549_v6 = vpop.f32.mrb[58].mxu1 }
 0x2f9   :  { %14472 = vst [vmem:[#allocation19_spill] sm:$0xff] %v12549_v6  ;;  %v12551_v34 = vpop.f32.mrb[59].mxu1 }
 0x2fa   :  { %14473 = vst [vmem:[#allocation21_spill] sm:$0xff] %v12551_v34 }
 0x2fc   :  { %v12553_v36 = vpop.f32.mrb[60].mxu1 }
 0x2fd   :  { %14474 = vst [vmem:[#allocation15_spill] sm:$0xff] %v12553_v36  ;;  %v12555_v37 = vpop.f32.mrb[61].mxu1 }
 0x2fe   :  { %14475 = vst [vmem:[#allocation23_spill] sm:$0xff] %v12555_v37 }
 0x300   :  { %v12557_v38 = vpop.f32.mrb[62].mxu1 }
 0x301   :  { %14476 = vst [vmem:[#allocation16_spill] sm:$0xff] %v12557_v38  ;;  %v12559_v41 = vpop.f32.mrb[63].mxu1 }
 0x302   :  { %14477 = vst [vmem:[#allocation25_spill] sm:$0xff] %v12559_v41 }
 0x304   :  { %v12561_v17 = vpop.f32.mrb[64].mxu1 }
 0x305   :  { %14478 = vst [vmem:[#allocation17_spill] sm:$0xff] %v12561_v17  ;;  %v7354_v6 = vsel %vm6500_vm4, %v12561_v17, 0.0  ;;  %7751 = vst.msk [vmem:[%s14204_s5 + $0x8] sm:$0xff] %vm6500_vm4, %v12561_v17  ;;  %v12573_v38 = vpop.f32.mrb[65].mxu1 }
 0x306   :  { %v9946_v8 = vpop.f32.mrb[0].mxu0  ;;  %14480 = vst [vmem:[#allocation18_spill] sm:$0xff] %v12573_v38  ;;  %v7353_v37 = vsel %vm6500_vm4, %v12573_v38, 0.0  ;;  %7750 = vst.msk [vmem:[%s14204_s5] sm:$0xff] %vm6500_vm4, %v12573_v38 }
 0x307   :  { %v12564_v32 = vadd.f32 %v9946_v8, %v12391_v44  ;;  %v6117_v33 = vpop.f32.mrb[1].mxu0  ;;  %v7355_v44 = vadd.f32 %v7354_v6, %v7353_v37 }
 0x308   :  { %v12576_v41 = vadd.f32 %v6117_v33, %v12393_v45  ;;  %v12599_v17 = vpop.f32.mrb[66].mxu1 }
 0x309   :  { %14479 = vst [vmem:[#allocation27_spill] sm:$0xff] %v12564_v32  ;;  %6901 = vst.msk [vmem:[%s14202_s3 + $0x8] sm:$0xff] %vm6500_vm4, %v12564_v32  ;;  %v6502_v45 = vsel %vm6500_vm4, %v12564_v32, 0.0  ;;  %v12609_v37 = vpop.f32.mrb[67].mxu1  ;;  %v7358_v32 = vsel %vm6500_vm4, %v12599_v17, 0.0 }
 0x30a   :  { %14481 = vst [vmem:[#allocation29_spill] sm:$0xff] %v12576_v41  ;;  %v6501_v8 = vsel %vm6500_vm4, %v12576_v41, 0.0  ;;  %6900 = vst.msk [vmem:[%s14202_s3] sm:$0xff] %vm6500_vm4, %v12576_v41  ;;  %v9949_v33 = vpop.f32.mrb[2].mxu0  ;;  %v7356_v36 = vsel %vm6500_vm4, %v12609_v37, 0.0 }
 0x30b   :  { %14482 = vst [vmem:[#allocation20_spill] sm:$0xff] %v12599_v17  ;;  %v12602_v38 = vadd.f32 %v9949_v33, %v12399_v50  ;;  %7753 = vst.msk [vmem:[%s14204_s5 + $0x18] sm:$0xff] %vm6500_vm4, %v12599_v17  ;;  %v6127_v6 = vpop.f32.mrb[3].mxu0  ;;  %v6503_v50 = vadd.f32 %v6502_v45, %v6501_v8  ;;  %v7357_v33 = vadd.f32 %v7356_v36, %v7355_v44 }
 0x30c   :  { %14483 = vst [vmem:[#allocation31_spill] sm:$0xff] %v12609_v37  ;;  %v12614_v41 = vadd.f32 %v6127_v6, %v12401_v51  ;;  %7752 = vst.msk [vmem:[%s14204_s5 + $0x10] sm:$0xff] %vm6500_vm4, %v12609_v37  ;;  %v12635_v17 = vpop.f32.mrb[68].mxu1 }
 0x30d   :  { %6903 = vst.msk [vmem:[%s14202_s3 + $0x18] sm:$0xff] %vm6500_vm4, %v12602_v38  ;;  %14485 = vst [vmem:[#allocation33_spill] sm:$0xff] %v12635_v17  ;;  %v7359_v8 = vadd.f32 %v7358_v32, %v7357_v33  ;;  %v12645_v44 = vpop.f32.mrb[69].mxu1  ;;  %v7362_v34 = vsel %vm6500_vm4, %v12635_v17, 0.0 }
 0x30e   :  { %14484 = vst [vmem:[#allocation22_spill] sm:$0xff] %v12614_v41  ;;  %v6504_v51 = vsel %vm6500_vm4, %v12614_v41, 0.0  ;;  %6902 = vst.msk [vmem:[%s14202_s3 + $0x10] sm:$0xff] %vm6500_vm4, %v12614_v41  ;;  %v9952_v6 = vpop.f32.mrb[4].mxu0  ;;  %v6506_v41 = vsel %vm6500_vm4, %v12602_v38, 0.0 }
 0x30f   :  { %v6505_v45 = vadd.f32 %v6504_v51, %v6503_v50  ;;  %v12638_v37 = vadd.f32 %v9952_v6, %v12407_v56  ;;  %7755 = vst.msk [vmem:[%s14204_s5 + $0x28] sm:$0xff] %vm6500_vm4, %v12635_v17  ;;  %v6137_v36 = vpop.f32.mrb[5].mxu0  ;;  %14486 = vst [vmem:[#allocation24_spill] sm:$0xff] %v12645_v44  ;;  %v7360_v56 = vsel %vm6500_vm4, %v12645_v44, 0.0 }
 0x310   :  { %v12652_v32 = vadd.f32 %v6137_v36, %v12409_v57  ;;  %7754 = vst.msk [vmem:[%s14204_s5 + $0x20] sm:$0xff] %vm6500_vm4, %v12645_v44  ;;  %v7361_v33 = vadd.f32 %v7360_v56, %v7359_v8  ;;  %v12673_v6 = vpop.f32.mrb[70].mxu1 }
 0x311   :  { %v6507_v50 = vadd.f32 %v6506_v41, %v6505_v45  ;;  %6905 = vst.msk [vmem:[%s14202_s3 + $0x28] sm:$0xff] %vm6500_vm4, %v12638_v37  ;;  %14487 = vst [vmem:[#allocation35_spill] sm:$0xff] %v12673_v6  ;;  %v12683_v36 = vpop.f32.mrb[71].mxu1  ;;  %v6510_v17 = vsel %vm6500_vm4, %v12638_v37, 0.0  ;;  %v7366_v44 = vsel %vm6500_vm4, %v12673_v6, 0.0 }
 0x312   :  { %v6508_v57 = vsel %vm6500_vm4, %v12652_v32, 0.0  ;;  %6904 = vst.msk [vmem:[%s14202_s3 + $0x20] sm:$0xff] %vm6500_vm4, %v12652_v32  ;;  %v9955_v51 = vpop.f32.mrb[6].mxu0  ;;  %7757 = vst.msk [vmem:[%s14204_s5 + $0x38] sm:$0xff] %vm6500_vm4, %v12673_v6  ;;  %v7363_v56 = vadd.f32 %v7362_v34, %v7361_v33 }
 0x313   :  { %v6509_v41 = vadd.f32 %v6508_v57, %v6507_v50  ;;  %v12676_v45 = vadd.f32 %v9955_v51, %v12415_v62  ;;  %v6147_v8 = vpop.f32.mrb[7].mxu0  ;;  %14488 = vst [vmem:[#allocation26_spill] sm:$0xff] %v12683_v36  ;;  %v7364_v62 = vsel %vm6500_vm4, %v12683_v36, 0.0  ;;  %7756 = vst.msk [vmem:[%s14204_s5 + $0x30] sm:$0xff] %vm6500_vm4, %v12683_v36 }
 0x314   :  { %v12690_v50 = vadd.f32 %v6147_v8, %v12417_v63  ;;  %v7365_v33 = vadd.f32 %v7364_v62, %v7363_v56  ;;  %v12711_v51 = vpop.f32.mrb[72].mxu1 }
 0x315   :  { %6907 = vst.msk [vmem:[%s14202_s3 + $0x38] sm:$0xff] %vm6500_vm4, %v12676_v45  ;;  %v6511_v34 = vadd.f32 %v6510_v17, %v6509_v41  ;;  %14489 = vst [vmem:[#allocation37_spill] sm:$0xff] %v12711_v51  ;;  %v12721_v41 = vpop.f32.mrb[73].mxu1  ;;  %v6514_v62 = vsel %vm6500_vm4, %v12676_v45, 0.0  ;;  %v7370_v36 = vsel %vm6500_vm4, %v12711_v51, 0.0 }
 0x316   :  { %v6512_v63 = vsel %vm6500_vm4, %v12690_v50, 0.0  ;;  %6906 = vst.msk [vmem:[%s14202_s3 + $0x30] sm:$0xff] %vm6500_vm4, %v12690_v50  ;;  %v9958_v57 = vpop.f32.mrb[8].mxu0  ;;  %7759 = vst.msk [vmem:[%s14204_s5 + $0x48] sm:$0xff] %vm6500_vm4, %v12711_v51  ;;  %v7367_v56 = vadd.f32 %v7366_v44, %v7365_v33 }
 0x317   :  { %v6513_v8 = vadd.f32 %v6512_v63, %v6511_v34  ;;  %v12714_v6 = vadd.f32 %v9958_v57, %v12423_v7  ;;  %v6157_v17 = vpop.f32.mrb[9].mxu0  ;;  %14490 = vst [vmem:[#allocation28_spill] sm:$0xff] %v12721_v41  ;;  %v7368_v7 = vsel %vm6500_vm4, %v12721_v41, 0.0  ;;  %7758 = vst.msk [vmem:[%s14204_s5 + $0x40] sm:$0xff] %vm6500_vm4, %v12721_v41 }
 0x318   :  { %v12728_v34 = vadd.f32 %v6157_v17, %v12425_v9  ;;  %v7369_v33 = vadd.f32 %v7368_v7, %v7367_v56  ;;  %v12749_v57 = vpop.f32.mrb[74].mxu1 }
 0x319   :  { %6909 = vst.msk [vmem:[%s14202_s3 + $0x48] sm:$0xff] %vm6500_vm4, %v12714_v6  ;;  %v6515_v44 = vadd.f32 %v6514_v62, %v6513_v8  ;;  %14491 = vst [vmem:[#allocation39_spill] sm:$0xff] %v12749_v57  ;;  %v12759_v56 = vpop.f32.mrb[75].mxu1  ;;  %v6518_v7 = vsel %vm6500_vm4, %v12714_v6, 0.0  ;;  %v7374_v41 = vsel %vm6500_vm4, %v12749_v57, 0.0 }
 0x31a   :  { %v6516_v9 = vsel %vm6500_vm4, %v12728_v34, 0.0  ;;  %6908 = vst.msk [vmem:[%s14202_s3 + $0x40] sm:$0xff] %vm6500_vm4, %v12728_v34  ;;  %v9961_v63 = vpop.f32.mrb[10].mxu0  ;;  %7761 = vst.msk [vmem:[%s14204_s5 + $0x58] sm:$0xff] %vm6500_vm4, %v12749_v57  ;;  %v7371_v62 = vadd.f32 %v7370_v36, %v7369_v33 }
 0x31b   :  { %v6517_v17 = vadd.f32 %v6516_v9, %v6515_v44  ;;  %v12752_v51 = vadd.f32 %v9961_v63, %v12431_v14  ;;  %v6167_v8 = vpop.f32.mrb[11].mxu0  ;;  %14492 = vst [vmem:[#allocation30_spill] sm:$0xff] %v12759_v56  ;;  %v7372_v14 = vsel %vm6500_vm4, %v12759_v56, 0.0  ;;  %7760 = vst.msk [vmem:[%s14204_s5 + $0x50] sm:$0xff] %vm6500_vm4, %v12759_v56 }
 0x31c   :  { %v12766_v44 = vadd.f32 %v6167_v8, %v12433_v15  ;;  %v7373_v33 = vadd.f32 %v7372_v14, %v7371_v62  ;;  %v12787_v63 = vpop.f32.mrb[76].mxu1 }
 0x31d   :  { %6911 = vst.msk [vmem:[%s14202_s3 + $0x58] sm:$0xff] %vm6500_vm4, %v12752_v51  ;;  %v6519_v36 = vadd.f32 %v6518_v7, %v6517_v17  ;;  %14493 = vst [vmem:[#allocation41_spill] sm:$0xff] %v12787_v63  ;;  %v12797_v62 = vpop.f32.mrb[77].mxu1  ;;  %v6522_v14 = vsel %vm6500_vm4, %v12752_v51, 0.0  ;;  %v7378_v56 = vsel %vm6500_vm4, %v12787_v63, 0.0 }
 0x31e   :  { %v6520_v15 = vsel %vm6500_vm4, %v12766_v44, 0.0  ;;  %6910 = vst.msk [vmem:[%s14202_s3 + $0x50] sm:$0xff] %vm6500_vm4, %v12766_v44  ;;  %v9964_v9 = vpop.f32.mrb[12].mxu0  ;;  %7763 = vst.msk [vmem:[%s14204_s5 + $0x68] sm:$0xff] %vm6500_vm4, %v12787_v63  ;;  %v7375_v7 = vadd.f32 %v7374_v41, %v7373_v33 }
 0x31f   :  { %v6521_v8 = vadd.f32 %v6520_v15, %v6519_v36  ;;  %v12790_v57 = vadd.f32 %v9964_v9, %v12439_v2  ;;  %v6177_v17 = vpop.f32.mrb[13].mxu0  ;;  %14494 = vst [vmem:[#allocation32_spill] sm:$0xff] %v12797_v62  ;;  %v7376_v2 = vsel %vm6500_vm4, %v12797_v62, 0.0  ;;  %7762 = vst.msk [vmem:[%s14204_s5 + $0x60] sm:$0xff] %vm6500_vm4, %v12797_v62 }
 0x320   :  { %v12804_v36 = vadd.f32 %v6177_v17, %v12441_v23  ;;  %v7377_v33 = vadd.f32 %v7376_v2, %v7375_v7  ;;  %v12825_v9 = vpop.f32.mrb[78].mxu1 }
 0x321   :  { %6913 = vst.msk [vmem:[%s14202_s3 + $0x68] sm:$0xff] %vm6500_vm4, %v12790_v57  ;;  %v6523_v41 = vadd.f32 %v6522_v14, %v6521_v8  ;;  %14495 = vst [vmem:[#allocation43_spill] sm:$0xff] %v12825_v9  ;;  %v12835_v7 = vpop.f32.mrb[79].mxu1  ;;  %v6526_v2 = vsel %vm6500_vm4, %v12790_v57, 0.0  ;;  %v7382_v62 = vsel %vm6500_vm4, %v12825_v9, 0.0 }
 0x322   :  { %v6524_v23 = vsel %vm6500_vm4, %v12804_v36, 0.0  ;;  %6912 = vst.msk [vmem:[%s14202_s3 + $0x60] sm:$0xff] %vm6500_vm4, %v12804_v36  ;;  %v9967_v15 = vpop.f32.mrb[14].mxu0  ;;  %7765 = vst.msk [vmem:[%s14204_s5 + $0x78] sm:$0xff] %vm6500_vm4, %v12825_v9  ;;  %v7379_v14 = vadd.f32 %v7378_v56, %v7377_v33 }
 0x323   :  { %v6525_v17 = vadd.f32 %v6524_v23, %v6523_v41  ;;  %v12828_v63 = vadd.f32 %v9967_v15, %v12447_v28  ;;  %v6187_v8 = vpop.f32.mrb[15].mxu0  ;;  %14496 = vst [vmem:[#allocation34_spill] sm:$0xff] %v12835_v7  ;;  %v7380_v28 = vsel %vm6500_vm4, %v12835_v7, 0.0  ;;  %7764 = vst.msk [vmem:[%s14204_s5 + $0x70] sm:$0xff] %vm6500_vm4, %v12835_v7 }
 0x324   :  { %v12842_v41 = vadd.f32 %v6187_v8, %v12449_v29  ;;  %v7381_v33 = vadd.f32 %v7380_v28, %v7379_v14  ;;  %v12863_v15 = vpop.f32.mrb[80].mxu1 }
 0x325   :  { %6915 = vst.msk [vmem:[%s14202_s3 + $0x78] sm:$0xff] %vm6500_vm4, %v12828_v63  ;;  %v6527_v56 = vadd.f32 %v6526_v2, %v6525_v17  ;;  %14497 = vst [vmem:[#allocation45_spill] sm:$0xff] %v12863_v15  ;;  %v12873_v14 = vpop.f32.mrb[81].mxu1  ;;  %v6530_v28 = vsel %vm6500_vm4, %v12828_v63, 0.0  ;;  %v7386_v7 = vsel %vm6500_vm4, %v12863_v15, 0.0 }
 0x326   :  { %v6528_v29 = vsel %vm6500_vm4, %v12842_v41, 0.0  ;;  %6914 = vst.msk [vmem:[%s14202_s3 + $0x70] sm:$0xff] %vm6500_vm4, %v12842_v41  ;;  %v9970_v23 = vpop.f32.mrb[16].mxu0  ;;  %7767 = vst.msk [vmem:[%s14204_s5 + $0x88] sm:$0xff] %vm6500_vm4, %v12863_v15  ;;  %v7383_v2 = vadd.f32 %v7382_v62, %v7381_v33 }
 0x327   :  { %v6529_v8 = vadd.f32 %v6528_v29, %v6527_v56  ;;  %v12866_v9 = vadd.f32 %v9970_v23, %v12455_v12  ;;  %v6197_v17 = vpop.f32.mrb[17].mxu0  ;;  %14498 = vst [vmem:[#allocation36_spill] sm:$0xff] %v12873_v14  ;;  %v7384_v12 = vsel %vm6500_vm4, %v12873_v14, 0.0  ;;  %7766 = vst.msk [vmem:[%s14204_s5 + $0x80] sm:$0xff] %vm6500_vm4, %v12873_v14 }
 0x328   :  { %v12880_v56 = vadd.f32 %v6197_v17, %v12457_v16  ;;  %v7385_v33 = vadd.f32 %v7384_v12, %v7383_v2  ;;  %v12901_v23 = vpop.f32.mrb[82].mxu1 }
 0x329   :  { %6917 = vst.msk [vmem:[%s14202_s3 + $0x88] sm:$0xff] %vm6500_vm4, %v12866_v9  ;;  %v6531_v62 = vadd.f32 %v6530_v28, %v6529_v8  ;;  %14499 = vst [vmem:[#allocation47_spill] sm:$0xff] %v12901_v23  ;;  %v12911_v2 = vpop.f32.mrb[83].mxu1  ;;  %v6534_v12 = vsel %vm6500_vm4, %v12866_v9, 0.0  ;;  %v7390_v14 = vsel %vm6500_vm4, %v12901_v23, 0.0 }
 0x32a   :  { %v6532_v16 = vsel %vm6500_vm4, %v12880_v56, 0.0  ;;  %6916 = vst.msk [vmem:[%s14202_s3 + $0x80] sm:$0xff] %vm6500_vm4, %v12880_v56  ;;  %v9973_v29 = vpop.f32.mrb[18].mxu0  ;;  %7769 = vst.msk [vmem:[%s14204_s5 + $0x98] sm:$0xff] %vm6500_vm4, %v12901_v23  ;;  %v7387_v28 = vadd.f32 %v7386_v7, %v7385_v33 }
 0x32b   :  { %v6533_v17 = vadd.f32 %v6532_v16, %v6531_v62  ;;  %v12904_v15 = vadd.f32 %v9973_v29, %v12463_v35  ;;  %v6207_v8 = vpop.f32.mrb[19].mxu0  ;;  %14500 = vst [vmem:[#allocation38_spill] sm:$0xff] %v12911_v2  ;;  %v7388_v35 = vsel %vm6500_vm4, %v12911_v2, 0.0  ;;  %7768 = vst.msk [vmem:[%s14204_s5 + $0x90] sm:$0xff] %vm6500_vm4, %v12911_v2 }
 0x32c   :  { %v12918_v62 = vadd.f32 %v6207_v8, %v12465_v21  ;;  %v7389_v33 = vadd.f32 %v7388_v35, %v7387_v28  ;;  %v12939_v29 = vpop.f32.mrb[84].mxu1 }
 0x32d   :  { %6919 = vst.msk [vmem:[%s14202_s3 + $0x98] sm:$0xff] %vm6500_vm4, %v12904_v15  ;;  %v6535_v7 = vadd.f32 %v6534_v12, %v6533_v17  ;;  %14501 = vst [vmem:[#allocation49_spill] sm:$0xff] %v12939_v29  ;;  %v12949_v28 = vpop.f32.mrb[85].mxu1  ;;  %v6538_v35 = vsel %vm6500_vm4, %v12904_v15, 0.0  ;;  %v7394_v2 = vsel %vm6500_vm4, %v12939_v29, 0.0 }
 0x32e   :  { %v6536_v21 = vsel %vm6500_vm4, %v12918_v62, 0.0  ;;  %6918 = vst.msk [vmem:[%s14202_s3 + $0x90] sm:$0xff] %vm6500_vm4, %v12918_v62  ;;  %v9976_v16 = vpop.f32.mrb[20].mxu0  ;;  %7771 = vst.msk [vmem:[%s14204_s5 + $0xa8] sm:$0xff] %vm6500_vm4, %v12939_v29  ;;  %v7391_v12 = vadd.f32 %v7390_v14, %v7389_v33 }
 0x32f   :  { %v6537_v8 = vadd.f32 %v6536_v21, %v6535_v7  ;;  %v12942_v23 = vadd.f32 %v9976_v16, %v12471_v39  ;;  %v6217_v17 = vpop.f32.mrb[21].mxu0  ;;  %14502 = vst [vmem:[#allocation40_spill] sm:$0xff] %v12949_v28  ;;  %v7392_v39 = vsel %vm6500_vm4, %v12949_v28, 0.0  ;;  %7770 = vst.msk [vmem:[%s14204_s5 + $0xa0] sm:$0xff] %vm6500_vm4, %v12949_v28 }
 0x330   :  { %v12956_v7 = vadd.f32 %v6217_v17, %v12473_v40  ;;  %v7393_v33 = vadd.f32 %v7392_v39, %v7391_v12  ;;  %v12977_v16 = vpop.f32.mrb[86].mxu1 }
 0x331   :  { %6921 = vst.msk [vmem:[%s14202_s3 + $0xa8] sm:$0xff] %vm6500_vm4, %v12942_v23  ;;  %v6539_v14 = vadd.f32 %v6538_v35, %v6537_v8  ;;  %14503 = vst [vmem:[#allocation51_spill] sm:$0xff] %v12977_v16  ;;  %v12987_v12 = vpop.f32.mrb[87].mxu1  ;;  %v6542_v39 = vsel %vm6500_vm4, %v12942_v23, 0.0  ;;  %v7398_v28 = vsel %vm6500_vm4, %v12977_v16, 0.0 }
 0x332   :  { %v6540_v40 = vsel %vm6500_vm4, %v12956_v7, 0.0  ;;  %6920 = vst.msk [vmem:[%s14202_s3 + $0xa0] sm:$0xff] %vm6500_vm4, %v12956_v7  ;;  %v9979_v21 = vpop.f32.mrb[22].mxu0  ;;  %7773 = vst.msk [vmem:[%s14204_s5 + $0xb8] sm:$0xff] %vm6500_vm4, %v12977_v16  ;;  %v7395_v35 = vadd.f32 %v7394_v2, %v7393_v33 }
 0x333   :  { %v6541_v17 = vadd.f32 %v6540_v40, %v6539_v14  ;;  %v12980_v29 = vadd.f32 %v9979_v21, %v12477_v42  ;;  %v6227_v8 = vpop.f32.mrb[23].mxu0  ;;  %14504 = vst [vmem:[#allocation42_spill] sm:$0xff] %v12987_v12  ;;  %v7396_v42 = vsel %vm6500_vm4, %v12987_v12, 0.0  ;;  %7772 = vst.msk [vmem:[%s14204_s5 + $0xb0] sm:$0xff] %vm6500_vm4, %v12987_v12 }
 0x334   :  { %v12994_v14 = vadd.f32 %v6227_v8, %v12479_v43  ;;  %v7397_v33 = vadd.f32 %v7396_v42, %v7395_v35  ;;  %v13015_v21 = vpop.f32.mrb[88].mxu1 }
 0x335   :  { %6923 = vst.msk [vmem:[%s14202_s3 + $0xb8] sm:$0xff] %vm6500_vm4, %v12980_v29  ;;  %v6543_v2 = vadd.f32 %v6542_v39, %v6541_v17  ;;  %14505 = vst [vmem:[#allocation53_spill] sm:$0xff] %v13015_v21  ;;  %v13025_v35 = vpop.f32.mrb[89].mxu1  ;;  %v6546_v42 = vsel %vm6500_vm4, %v12980_v29, 0.0  ;;  %v7402_v12 = vsel %vm6500_vm4, %v13015_v21, 0.0 }
 0x336   :  { %v6544_v43 = vsel %vm6500_vm4, %v12994_v14, 0.0  ;;  %6922 = vst.msk [vmem:[%s14202_s3 + $0xb0] sm:$0xff] %vm6500_vm4, %v12994_v14  ;;  %v9982_v40 = vpop.f32.mrb[24].mxu0  ;;  %7775 = vst.msk [vmem:[%s14204_s5 + $0xc8] sm:$0xff] %vm6500_vm4, %v13015_v21  ;;  %v7399_v39 = vadd.f32 %v7398_v28, %v7397_v33 }
 0x337   :  { %v6545_v8 = vadd.f32 %v6544_v43, %v6543_v2  ;;  %v13018_v16 = vadd.f32 %v9982_v40, %v12481_v46  ;;  %v6237_v17 = vpop.f32.mrb[25].mxu0  ;;  %14506 = vst [vmem:[#allocation44_spill] sm:$0xff] %v13025_v35  ;;  %v7400_v46 = vsel %vm6500_vm4, %v13025_v35, 0.0  ;;  %7774 = vst.msk [vmem:[%s14204_s5 + $0xc0] sm:$0xff] %vm6500_vm4, %v13025_v35 }
 0x338   :  { %v13032_v2 = vadd.f32 %v6237_v17, %v12483_v47  ;;  %v7401_v33 = vadd.f32 %v7400_v46, %v7399_v39  ;;  %v13053_v40 = vpop.f32.mrb[90].mxu1 }
 0x339   :  { %6925 = vst.msk [vmem:[%s14202_s3 + $0xc8] sm:$0xff] %vm6500_vm4, %v13018_v16  ;;  %v6547_v28 = vadd.f32 %v6546_v42, %v6545_v8  ;;  %14507 = vst [vmem:[#allocation55_spill] sm:$0xff] %v13053_v40  ;;  %v13063_v39 = vpop.f32.mrb[91].mxu1  ;;  %v6550_v46 = vsel %vm6500_vm4, %v13018_v16, 0.0  ;;  %v7406_v35 = vsel %vm6500_vm4, %v13053_v40, 0.0 }
 0x33a   :  { %v6548_v47 = vsel %vm6500_vm4, %v13032_v2, 0.0  ;;  %6924 = vst.msk [vmem:[%s14202_s3 + $0xc0] sm:$0xff] %vm6500_vm4, %v13032_v2  ;;  %v9985_v43 = vpop.f32.mrb[26].mxu0  ;;  %7777 = vst.msk [vmem:[%s14204_s5 + $0xd8] sm:$0xff] %vm6500_vm4, %v13053_v40  ;;  %v7403_v42 = vadd.f32 %v7402_v12, %v7401_v33 }
 0x33b   :  { %v6549_v17 = vadd.f32 %v6548_v47, %v6547_v28  ;;  %v13056_v21 = vadd.f32 %v9985_v43, %v12485_v48  ;;  %v6247_v8 = vpop.f32.mrb[27].mxu0  ;;  %14508 = vst [vmem:[#allocation46_spill] sm:$0xff] %v13063_v39  ;;  %v7404_v48 = vsel %vm6500_vm4, %v13063_v39, 0.0  ;;  %7776 = vst.msk [vmem:[%s14204_s5 + $0xd0] sm:$0xff] %vm6500_vm4, %v13063_v39 }
 0x33c   :  { %v13070_v28 = vadd.f32 %v6247_v8, %v12487_v49  ;;  %v7405_v33 = vadd.f32 %v7404_v48, %v7403_v42  ;;  %v13091_v43 = vpop.f32.mrb[92].mxu1 }
 0x33d   :  { %6927 = vst.msk [vmem:[%s14202_s3 + $0xd8] sm:$0xff] %vm6500_vm4, %v13056_v21  ;;  %v6551_v12 = vadd.f32 %v6550_v46, %v6549_v17  ;;  %14509 = vst [vmem:[#allocation57_spill] sm:$0xff] %v13091_v43  ;;  %v13101_v42 = vpop.f32.mrb[93].mxu1  ;;  %v6554_v48 = vsel %vm6500_vm4, %v13056_v21, 0.0  ;;  %v7410_v39 = vsel %vm6500_vm4, %v13091_v43, 0.0 }
 0x33e   :  { %v6552_v49 = vsel %vm6500_vm4, %v13070_v28, 0.0  ;;  %6926 = vst.msk [vmem:[%s14202_s3 + $0xd0] sm:$0xff] %vm6500_vm4, %v13070_v28  ;;  %v9988_v47 = vpop.f32.mrb[28].mxu0  ;;  %7779 = vst.msk [vmem:[%s14204_s5 + $0xe8] sm:$0xff] %vm6500_vm4, %v13091_v43  ;;  %v7407_v46 = vadd.f32 %v7406_v35, %v7405_v33 }
 0x33f   :  { %v6553_v8 = vadd.f32 %v6552_v49, %v6551_v12  ;;  %v13094_v40 = vadd.f32 %v9988_v47, %v12489_v52  ;;  %v6257_v17 = vpop.f32.mrb[29].mxu0  ;;  %14510 = vst [vmem:[#allocation48_spill] sm:$0xff] %v13101_v42  ;;  %v7408_v52 = vsel %vm6500_vm4, %v13101_v42, 0.0  ;;  %7778 = vst.msk [vmem:[%s14204_s5 + $0xe0] sm:$0xff] %vm6500_vm4, %v13101_v42 }
 0x340   :  { %v13108_v12 = vadd.f32 %v6257_v17, %v12491_v53  ;;  %v7409_v33 = vadd.f32 %v7408_v52, %v7407_v46  ;;  %v13129_v47 = vpop.f32.mrb[94].mxu1 }
 0x341   :  { %6929 = vst.msk [vmem:[%s14202_s3 + $0xe8] sm:$0xff] %vm6500_vm4, %v13094_v40  ;;  %v6555_v35 = vadd.f32 %v6554_v48, %v6553_v8  ;;  %14511 = vst [vmem:[#allocation59_spill] sm:$0xff] %v13129_v47  ;;  %v13139_v46 = vpop.f32.mrb[95].mxu1  ;;  %v6558_v52 = vsel %vm6500_vm4, %v13094_v40, 0.0  ;;  %v7414_v42 = vsel %vm6500_vm4, %v13129_v47, 0.0 }
 0x342   :  { %v6556_v53 = vsel %vm6500_vm4, %v13108_v12, 0.0  ;;  %6928 = vst.msk [vmem:[%s14202_s3 + $0xe0] sm:$0xff] %vm6500_vm4, %v13108_v12  ;;  %v9991_v49 = vpop.f32.mrb[30].mxu0  ;;  %7781 = vst.msk [vmem:[%s14204_s5 + $0xf8] sm:$0xff] %vm6500_vm4, %v13129_v47  ;;  %v7411_v48 = vadd.f32 %v7410_v39, %v7409_v33 }
 0x343   :  { %v6557_v17 = vadd.f32 %v6556_v53, %v6555_v35  ;;  %v13132_v43 = vadd.f32 %v9991_v49, %v12493_v54  ;;  %v6267_v8 = vpop.f32.mrb[31].mxu0  ;;  %14512 = vst [vmem:[#allocation50_spill] sm:$0xff] %v13139_v46  ;;  %v7412_v54 = vsel %vm6500_vm4, %v13139_v46, 0.0  ;;  %7780 = vst.msk [vmem:[%s14204_s5 + $0xf0] sm:$0xff] %vm6500_vm4, %v13139_v46 }
 0x344   :  { %v13146_v35 = vadd.f32 %v6267_v8, %v12495_v55  ;;  %v7413_v33 = vadd.f32 %v7412_v54, %v7411_v48  ;;  %v13167_v49 = vpop.f32.mrb[96].mxu1 }
 0x345   :  { %6931 = vst.msk [vmem:[%s14202_s3 + $0xf8] sm:$0xff] %vm6500_vm4, %v13132_v43  ;;  %v6559_v39 = vadd.f32 %v6558_v52, %v6557_v17  ;;  %14513 = vst [vmem:[#allocation61_spill] sm:$0xff] %v13167_v49  ;;  %v13177_v48 = vpop.f32.mrb[97].mxu1  ;;  %v6562_v54 = vsel %vm6500_vm4, %v13132_v43, 0.0  ;;  %v7418_v46 = vsel %vm6500_vm4, %v13167_v49, 0.0 }
 0x346   :  { %v6560_v55 = vsel %vm6500_vm4, %v13146_v35, 0.0  ;;  %6930 = vst.msk [vmem:[%s14202_s3 + $0xf0] sm:$0xff] %vm6500_vm4, %v13146_v35  ;;  %v9994_v53 = vpop.f32.mrb[32].mxu0  ;;  %7783 = vst.msk [vmem:[%s14204_s5 + $0x108] sm:$0xff] %vm6500_vm4, %v13167_v49  ;;  %v7415_v52 = vadd.f32 %v7414_v42, %v7413_v33 }
 0x347   :  { %v6561_v8 = vadd.f32 %v6560_v55, %v6559_v39  ;;  %v13170_v47 = vadd.f32 %v9994_v53, %v12497_v58  ;;  %v6277_v17 = vpop.f32.mrb[33].mxu0  ;;  %14514 = vst [vmem:[#allocation52_spill] sm:$0xff] %v13177_v48  ;;  %v7416_v58 = vsel %vm6500_vm4, %v13177_v48, 0.0  ;;  %7782 = vst.msk [vmem:[%s14204_s5 + $0x100] sm:$0xff] %vm6500_vm4, %v13177_v48 }
 0x348   :  { %v13184_v39 = vadd.f32 %v6277_v17, %v12499_v59  ;;  %v7417_v33 = vadd.f32 %v7416_v58, %v7415_v52  ;;  %v13205_v53 = vpop.f32.mrb[98].mxu1 }
 0x349   :  { %6933 = vst.msk [vmem:[%s14202_s3 + $0x108] sm:$0xff] %vm6500_vm4, %v13170_v47  ;;  %v6563_v42 = vadd.f32 %v6562_v54, %v6561_v8  ;;  %14515 = vst [vmem:[#allocation63_spill] sm:$0xff] %v13205_v53  ;;  %v13215_v52 = vpop.f32.mrb[99].mxu1  ;;  %v6566_v58 = vsel %vm6500_vm4, %v13170_v47, 0.0  ;;  %v7422_v48 = vsel %vm6500_vm4, %v13205_v53, 0.0 }
 0x34a   :  { %v6564_v59 = vsel %vm6500_vm4, %v13184_v39, 0.0  ;;  %6932 = vst.msk [vmem:[%s14202_s3 + $0x100] sm:$0xff] %vm6500_vm4, %v13184_v39  ;;  %v9997_v55 = vpop.f32.mrb[34].mxu0  ;;  %7785 = vst.msk [vmem:[%s14204_s5 + $0x118] sm:$0xff] %vm6500_vm4, %v13205_v53  ;;  %v7419_v54 = vadd.f32 %v7418_v46, %v7417_v33 }
 0x34b   :  { %v6565_v17 = vadd.f32 %v6564_v59, %v6563_v42  ;;  %v13208_v49 = vadd.f32 %v9997_v55, %v12501_v60  ;;  %v6287_v8 = vpop.f32.mrb[35].mxu0  ;;  %14516 = vst [vmem:[#allocation54_spill] sm:$0xff] %v13215_v52  ;;  %v7420_v60 = vsel %vm6500_vm4, %v13215_v52, 0.0  ;;  %7784 = vst.msk [vmem:[%s14204_s5 + $0x110] sm:$0xff] %vm6500_vm4, %v13215_v52 }
 0x34c   :  { %v13222_v42 = vadd.f32 %v6287_v8, %v12503_v61  ;;  %v7421_v33 = vadd.f32 %v7420_v60, %v7419_v54  ;;  %v13243_v55 = vpop.f32.mrb[100].mxu1 }
 0x34d   :  { %6935 = vst.msk [vmem:[%s14202_s3 + $0x118] sm:$0xff] %vm6500_vm4, %v13208_v49  ;;  %v6567_v46 = vadd.f32 %v6566_v58, %v6565_v17  ;;  %14517 = vst [vmem:[#allocation56_spill] sm:$0xff] %v13243_v55  ;;  %v13253_v54 = vpop.f32.mrb[101].mxu1  ;;  %v6570_v60 = vsel %vm6500_vm4, %v13208_v49, 0.0  ;;  %v7426_v52 = vsel %vm6500_vm4, %v13243_v55, 0.0 }
 0x34e   :  { %v6568_v61 = vsel %vm6500_vm4, %v13222_v42, 0.0  ;;  %6934 = vst.msk [vmem:[%s14202_s3 + $0x110] sm:$0xff] %vm6500_vm4, %v13222_v42  ;;  %v10000_v59 = vpop.f32.mrb[36].mxu0  ;;  %7787 = vst.msk [vmem:[%s14204_s5 + $0x128] sm:$0xff] %vm6500_vm4, %v13243_v55  ;;  %v7423_v58 = vadd.f32 %v7422_v48, %v7421_v33 }
 0x34f   :  { %v6569_v8 = vadd.f32 %v6568_v61, %v6567_v46  ;;  %v13246_v53 = vadd.f32 %v10000_v59, %v12505_v0  ;;  %v6297_v17 = vpop.f32.mrb[37].mxu0  ;;  %14518 = vst [vmem:[#allocation66_spill] sm:$0xff] %v13253_v54  ;;  %v7424_v0 = vsel %vm6500_vm4, %v13253_v54, 0.0  ;;  %7786 = vst.msk [vmem:[%s14204_s5 + $0x120] sm:$0xff] %vm6500_vm4, %v13253_v54 }
 0x350   :  { %v13260_v46 = vadd.f32 %v6297_v17, %v12507_v1  ;;  %v7425_v33 = vadd.f32 %v7424_v0, %v7423_v58  ;;  %v13281_v59 = vpop.f32.mrb[102].mxu1 }
 0x351   :  { %6937 = vst.msk [vmem:[%s14202_s3 + $0x128] sm:$0xff] %vm6500_vm4, %v13246_v53  ;;  %v6571_v48 = vadd.f32 %v6570_v60, %v6569_v8  ;;  %14519 = vst [vmem:[#allocation58_spill] sm:$0xff] %v13281_v59  ;;  %v13291_v58 = vpop.f32.mrb[103].mxu1  ;;  %v6574_v0 = vsel %vm6500_vm4, %v13246_v53, 0.0  ;;  %v7430_v54 = vsel %vm6500_vm4, %v13281_v59, 0.0 }
 0x352   :  { %v6572_v1 = vsel %vm6500_vm4, %v13260_v46, 0.0  ;;  %6936 = vst.msk [vmem:[%s14202_s3 + $0x120] sm:$0xff] %vm6500_vm4, %v13260_v46  ;;  %v10003_v61 = vpop.f32.mrb[38].mxu0  ;;  %7789 = vst.msk [vmem:[%s14204_s5 + $0x138] sm:$0xff] %vm6500_vm4, %v13281_v59  ;;  %v7427_v60 = vadd.f32 %v7426_v52, %v7425_v33 }
 0x353   :  { %v6573_v17 = vadd.f32 %v6572_v1, %v6571_v48  ;;  %v13284_v55 = vadd.f32 %v10003_v61, %v12509_v3  ;;  %v6307_v8 = vpop.f32.mrb[39].mxu0  ;;  %14520 = vst [vmem:[#allocation60_spill] sm:$0xff] %v13291_v58  ;;  %v7428_v3 = vsel %vm6500_vm4, %v13291_v58, 0.0  ;;  %7788 = vst.msk [vmem:[%s14204_s5 + $0x130] sm:$0xff] %vm6500_vm4, %v13291_v58 }
 0x354   :  { %v13298_v48 = vadd.f32 %v6307_v8, %v12511_v5  ;;  %v7429_v33 = vadd.f32 %v7428_v3, %v7427_v60  ;;  %v13319_v61 = vpop.f32.mrb[104].mxu1 }
 0x355   :  { %6939 = vst.msk [vmem:[%s14202_s3 + $0x138] sm:$0xff] %vm6500_vm4, %v13284_v55  ;;  %v6575_v52 = vadd.f32 %v6574_v0, %v6573_v17  ;;  %14521 = vst [vmem:[#allocation62_spill] sm:$0xff] %v13319_v61  ;;  %v13329_v60 = vpop.f32.mrb[105].mxu1  ;;  %v6578_v3 = vsel %vm6500_vm4, %v13284_v55, 0.0  ;;  %v7434_v58 = vsel %vm6500_vm4, %v13319_v61, 0.0 }
 0x356   :  { %v6576_v5 = vsel %vm6500_vm4, %v13298_v48, 0.0  ;;  %6938 = vst.msk [vmem:[%s14202_s3 + $0x130] sm:$0xff] %vm6500_vm4, %v13298_v48  ;;  %v10006_v1 = vpop.f32.mrb[40].mxu0  ;;  %7791 = vst.msk [vmem:[%s14204_s5 + $0x148] sm:$0xff] %vm6500_vm4, %v13319_v61  ;;  %v7431_v0 = vadd.f32 %v7430_v54, %v7429_v33 }
 0x357   :  { %v6577_v8 = vadd.f32 %v6576_v5, %v6575_v52  ;;  %v13322_v59 = vadd.f32 %v10006_v1, %v12513_v11  ;;  %v6317_v17 = vpop.f32.mrb[41].mxu0  ;;  %14522 = vst [vmem:[#allocation64_spill] sm:$0xff] %v13329_v60  ;;  %v7432_v11 = vsel %vm6500_vm4, %v13329_v60, 0.0  ;;  %7790 = vst.msk [vmem:[%s14204_s5 + $0x140] sm:$0xff] %vm6500_vm4, %v13329_v60 }
 0x358   :  { %v13336_v52 = vadd.f32 %v6317_v17, %v12515_v13  ;;  %v7433_v33 = vadd.f32 %v7432_v11, %v7431_v0  ;;  %v13357_v1 = vpop.f32.mrb[106].mxu1 }
 0x359   :  { %6941 = vst.msk [vmem:[%s14202_s3 + $0x148] sm:$0xff] %vm6500_vm4, %v13322_v59  ;;  %v6579_v54 = vadd.f32 %v6578_v3, %v6577_v8  ;;  %14523 = vst [vmem:[#allocation65_spill] sm:$0xff] %v13357_v1  ;;  %v13367_v0 = vpop.f32.mrb[107].mxu1  ;;  %v6582_v11 = vsel %vm6500_vm4, %v13322_v59, 0.0  ;;  %v7438_v60 = vsel %vm6500_vm4, %v13357_v1, 0.0 }
 0x35a   :  { %v6580_v13 = vsel %vm6500_vm4, %v13336_v52, 0.0  ;;  %6940 = vst.msk [vmem:[%s14202_s3 + $0x140] sm:$0xff] %vm6500_vm4, %v13336_v52  ;;  %v10009_v5 = vpop.f32.mrb[42].mxu0  ;;  %7793 = vst.msk [vmem:[%s14204_s5 + $0x158] sm:$0xff] %vm6500_vm4, %v13357_v1  ;;  %v7435_v3 = vadd.f32 %v7434_v58, %v7433_v33 }
 0x35b   :  { %v6581_v17 = vadd.f32 %v6580_v13, %v6579_v54  ;;  %v13360_v61 = vadd.f32 %v10009_v5, %v12517_v10  ;;  %v6327_v8 = vpop.f32.mrb[43].mxu0  ;;  %14524 = vst [vmem:[#allocation67_spill] sm:$0xff] %v13367_v0  ;;  %v7436_v10 = vsel %vm6500_vm4, %v13367_v0, 0.0  ;;  %7792 = vst.msk [vmem:[%s14204_s5 + $0x150] sm:$0xff] %vm6500_vm4, %v13367_v0 }
 0x35c   :  { %v13374_v54 = vadd.f32 %v6327_v8, %v12519_v18  ;;  %v7437_v33 = vadd.f32 %v7436_v10, %v7435_v3  ;;  %v13395_v5 = vpop.f32.mrb[108].mxu1 }
 0x35d   :  { %6943 = vst.msk [vmem:[%s14202_s3 + $0x158] sm:$0xff] %vm6500_vm4, %v13360_v61  ;;  %v6583_v58 = vadd.f32 %v6582_v11, %v6581_v17  ;;  %14525 = vst [vmem:[#allocation68_spill] sm:$0xff] %v13395_v5  ;;  %v13405_v3 = vpop.f32.mrb[109].mxu1  ;;  %v6586_v10 = vsel %vm6500_vm4, %v13360_v61, 0.0  ;;  %v7442_v0 = vsel %vm6500_vm4, %v13395_v5, 0.0 }
 0x35e   :  { %v6584_v18 = vsel %vm6500_vm4, %v13374_v54, 0.0  ;;  %6942 = vst.msk [vmem:[%s14202_s3 + $0x150] sm:$0xff] %vm6500_vm4, %v13374_v54  ;;  %v10012_v13 = vpop.f32.mrb[44].mxu0  ;;  %7795 = vst.msk [vmem:[%s14204_s5 + $0x168] sm:$0xff] %vm6500_vm4, %v13395_v5  ;;  %v7439_v11 = vadd.f32 %v7438_v60, %v7437_v33 }
 0x35f   :  { %v6585_v8 = vadd.f32 %v6584_v18, %v6583_v58  ;;  %v13398_v1 = vadd.f32 %v10012_v13, %v12521_v19  ;;  %v6337_v17 = vpop.f32.mrb[45].mxu0  ;;  %14526 = vst [vmem:[#allocation9_spill] sm:$0xff] %v13405_v3  ;;  %v7440_v19 = vsel %vm6500_vm4, %v13405_v3, 0.0  ;;  %7794 = vst.msk [vmem:[%s14204_s5 + $0x160] sm:$0xff] %vm6500_vm4, %v13405_v3 }
 0x360   :  { %v13412_v58 = vadd.f32 %v6337_v17, %v12523_v20  ;;  %v7441_v33 = vadd.f32 %v7440_v19, %v7439_v11  ;;  %v13433_v13 = vpop.f32.mrb[110].mxu1 }
 0x361   :  { %6945 = vst.msk [vmem:[%s14202_s3 + $0x168] sm:$0xff] %vm6500_vm4, %v13398_v1  ;;  %v6587_v60 = vadd.f32 %v6586_v10, %v6585_v8  ;;  %14527 = vst [vmem:[#allocation10_spill] sm:$0xff] %v13433_v13  ;;  %v13443_v11 = vpop.f32.mrb[111].mxu1  ;;  %v6590_v19 = vsel %vm6500_vm4, %v13398_v1, 0.0  ;;  %v7446_v3 = vsel %vm6500_vm4, %v13433_v13, 0.0 }
 0x362   :  { %v6588_v20 = vsel %vm6500_vm4, %v13412_v58, 0.0  ;;  %6944 = vst.msk [vmem:[%s14202_s3 + $0x160] sm:$0xff] %vm6500_vm4, %v13412_v58  ;;  %v10015_v18 = vpop.f32.mrb[46].mxu0  ;;  %7797 = vst.msk [vmem:[%s14204_s5 + $0x178] sm:$0xff] %vm6500_vm4, %v13433_v13  ;;  %v7443_v10 = vadd.f32 %v7442_v0, %v7441_v33 }
 0x363   :  { %v6589_v17 = vadd.f32 %v6588_v20, %v6587_v60  ;;  %v13436_v5 = vadd.f32 %v10015_v18, %v12525_v22  ;;  %v6347_v8 = vpop.f32.mrb[47].mxu0  ;;  %14528 = vst [vmem:[#allocation69_spill] sm:$0xff] %v13443_v11  ;;  %v7444_v22 = vsel %vm6500_vm4, %v13443_v11, 0.0  ;;  %7796 = vst.msk [vmem:[%s14204_s5 + $0x170] sm:$0xff] %vm6500_vm4, %v13443_v11 }
 0x364   :  { %v13450_v60 = vadd.f32 %v6347_v8, %v12527_v4  ;;  %v7445_v33 = vadd.f32 %v7444_v22, %v7443_v10  ;;  %v13471_v18 = vpop.f32.mrb[112].mxu1 }
 0x365   :  { %6947 = vst.msk [vmem:[%s14202_s3 + $0x178] sm:$0xff] %vm6500_vm4, %v13436_v5  ;;  %v6591_v0 = vadd.f32 %v6590_v19, %v6589_v17  ;;  %14529 = vst [vmem:[#allocation70_spill] sm:$0xff] %v13471_v18  ;;  %v13481_v10 = vpop.f32.mrb[113].mxu1  ;;  %v6594_v22 = vsel %vm6500_vm4, %v13436_v5, 0.0  ;;  %v7450_v11 = vsel %vm6500_vm4, %v13471_v18, 0.0 }
 0x366   :  { %v6592_v4 = vsel %vm6500_vm4, %v13450_v60, 0.0  ;;  %6946 = vst.msk [vmem:[%s14202_s3 + $0x170] sm:$0xff] %vm6500_vm4, %v13450_v60  ;;  %v10018_v20 = vpop.f32.mrb[48].mxu0  ;;  %7799 = vst.msk [vmem:[%s14204_s5 + $0x188] sm:$0xff] %vm6500_vm4, %v13471_v18  ;;  %v7447_v19 = vadd.f32 %v7446_v3, %v7445_v33 }
 0x367   :  { %v6593_v8 = vadd.f32 %v6592_v4, %v6591_v0  ;;  %v13474_v13 = vadd.f32 %v10018_v20, %v12529_v24  ;;  %v6357_v17 = vpop.f32.mrb[49].mxu0  ;;  %14531 = vst [vmem:[#allocation72_spill] sm:$0xff] %v13481_v10  ;;  %v7448_v24 = vsel %vm6500_vm4, %v13481_v10, 0.0  ;;  %7798 = vst.msk [vmem:[%s14204_s5 + $0x180] sm:$0xff] %vm6500_vm4, %v13481_v10 }
 0x368   :  { %v13488_v0 = vadd.f32 %v6357_v17, %v12531_v25  ;;  %v7449_v33 = vadd.f32 %v7448_v24, %v7447_v19  ;;  %v13509_v20 = vpop.f32.mrb[114].mxu1 }
 0x369   :  { %14530 = vst [vmem:[#allocation71_spill] sm:$0xff] %v13474_v13  ;;  %6949 = vst.msk [vmem:[%s14202_s3 + $0x188] sm:$0xff] %vm6500_vm4, %v13474_v13  ;;  %v6595_v3 = vadd.f32 %v6594_v22, %v6593_v8  ;;  %v13519_v19 = vpop.f32.mrb[115].mxu1  ;;  %v6598_v24 = vsel %vm6500_vm4, %v13474_v13, 0.0  ;;  %v7454_v10 = vsel %vm6500_vm4, %v13509_v20, 0.0  ;;  %v14570_v13 = vld [vmem:[#allocation29_spill] sm:$0xff] }
 0x36a   :  { %14532 = vst [vmem:[#allocation73_spill] sm:$0xff] %v13488_v0  ;;  %v6596_v25 = vsel %vm6500_vm4, %v13488_v0, 0.0  ;;  %6948 = vst.msk [vmem:[%s14202_s3 + $0x180] sm:$0xff] %vm6500_vm4, %v13488_v0  ;;  %v10021_v4 = vpop.f32.mrb[50].mxu0  ;;  %v7451_v22 = vadd.f32 %v7450_v11, %v7449_v33 }
 0x36b   :  { %14533 = vst [vmem:[#allocation74_spill] sm:$0xff] %v13509_v20  ;;  %v6597_v17 = vadd.f32 %v6596_v25, %v6595_v3  ;;  %v13512_v18 = vadd.f32 %v10021_v4, %v12533_v26  ;;  %7801 = vst.msk [vmem:[%s14204_s5 + $0x198] sm:$0xff] %vm6500_vm4, %v13509_v20  ;;  %v6367_v8 = vpop.f32.mrb[51].mxu0  ;;  %v7452_v26 = vsel %vm6500_vm4, %v13519_v19, 0.0 }
 0x36c   :  { %14535 = vst [vmem:[#allocation76_spill] sm:$0xff] %v13519_v19  ;;  %v13526_v3 = vadd.f32 %v6367_v8, %v12535_v27  ;;  %7800 = vst.msk [vmem:[%s14204_s5 + $0x190] sm:$0xff] %vm6500_vm4, %v13519_v19  ;;  %v7453_v33 = vadd.f32 %v7452_v26, %v7451_v22  ;;  %v13547_v4 = vpop.f32.mrb[116].mxu1 }
 0x36d   :  { %14534 = vst [vmem:[#allocation75_spill] sm:$0xff] %v13512_v18  ;;  %6951 = vst.msk [vmem:[%s14202_s3 + $0x198] sm:$0xff] %vm6500_vm4, %v13512_v18  ;;  %v6599_v11 = vadd.f32 %v6598_v24, %v6597_v17  ;;  %v13557_v22 = vpop.f32.mrb[117].mxu1  ;;  %v6602_v26 = vsel %vm6500_vm4, %v13512_v18, 0.0  ;;  %v7458_v19 = vsel %vm6500_vm4, %v13547_v4, 0.0 }
 0x36e   :  { %14536 = vst [vmem:[#allocation77_spill] sm:$0xff] %v13526_v3  ;;  %v6600_v27 = vsel %vm6500_vm4, %v13526_v3, 0.0  ;;  %6950 = vst.msk [vmem:[%s14202_s3 + $0x190] sm:$0xff] %vm6500_vm4, %v13526_v3  ;;  %v10024_v25 = vpop.f32.mrb[52].mxu0  ;;  %v7455_v24 = vadd.f32 %v7454_v10, %v7453_v33 }
 0x36f   :  { %14537 = vst [vmem:[#allocation78_spill] sm:$0xff] %v13547_v4  ;;  %v6601_v8 = vadd.f32 %v6600_v27, %v6599_v11  ;;  %v13550_v20 = vadd.f32 %v10024_v25, %v12537_v30  ;;  %7803 = vst.msk [vmem:[%s14204_s5 + $0x1a8] sm:$0xff] %vm6500_vm4, %v13547_v4  ;;  %v6377_v17 = vpop.f32.mrb[53].mxu0  ;;  %v14540_v11 = vld [vmem:[#allocation11_spill] sm:$0xff]  ;;  %v7456_v30 = vsel %vm6500_vm4, %v13557_v22, 0.0 }
 0x370   :  { %14539 = vst [vmem:[#allocation80_spill] sm:$0xff] %v13557_v22  ;;  %v13564_v27 = vadd.f32 %v6377_v17, %v14540_v11  ;;  %7802 = vst.msk [vmem:[%s14204_s5 + $0x1a0] sm:$0xff] %vm6500_vm4, %v13557_v22  ;;  %v7457_v33 = vadd.f32 %v7456_v30, %v7455_v24  ;;  %v13585_v11 = vpop.f32.mrb[118].mxu1  ;;  %v14543_v22 = vld [vmem:[#allocation12_spill] sm:$0xff] }
 0x371   :  { %14538 = vst [vmem:[#allocation79_spill] sm:$0xff] %v13550_v20  ;;  %6953 = vst.msk [vmem:[%s14202_s3 + $0x1a8] sm:$0xff] %vm6500_vm4, %v13550_v20  ;;  %v6603_v10 = vadd.f32 %v6602_v26, %v6601_v8  ;;  %v13595_v24 = vpop.f32.mrb[119].mxu1  ;;  %v6606_v30 = vsel %vm6500_vm4, %v13550_v20, 0.0 }
 0x372   :  { %14541 = vst [vmem:[#allocation11_spill] sm:$0xff] %v13564_v27  ;;  %v6604_v25 = vsel %vm6500_vm4, %v13564_v27, 0.0  ;;  %6952 = vst.msk [vmem:[%s14202_s3 + $0x1a0] sm:$0xff] %vm6500_vm4, %v13564_v27  ;;  %v10027_v17 = vpop.f32.mrb[54].mxu0  ;;  %v7459_v26 = vadd.f32 %v7458_v19, %v7457_v33  ;;  %v7462_v27 = vsel %vm6500_vm4, %v13585_v11, 0.0 }
 0x373   :  { %14542 = vst [vmem:[#allocation81_spill] sm:$0xff] %v13585_v11  ;;  %v6605_v4 = vadd.f32 %v6604_v25, %v6603_v10  ;;  %v13588_v18 = vadd.f32 %v10027_v17, %v14543_v22  ;;  %7805 = vst.msk [vmem:[%s14204_s5 + $0x1b8] sm:$0xff] %vm6500_vm4, %v13585_v11  ;;  %v6387_v8 = vpop.f32.mrb[55].mxu0  ;;  %v7460_v22 = vsel %vm6500_vm4, %v13595_v24, 0.0  ;;  %v14548_v11 = vld [vmem:[#allocation13_spill] sm:$0xff] }
 0x374   :  { %14545 = vst [vmem:[#allocation82_spill] sm:$0xff] %v13595_v24  ;;  %v13602_v10 = vadd.f32 %v6387_v8, %v12543_v31  ;;  %7804 = vst.msk [vmem:[%s14204_s5 + $0x1b0] sm:$0xff] %vm6500_vm4, %v13595_v24  ;;  %v7461_v33 = vadd.f32 %v7460_v22, %v7459_v26  ;;  %v13623_v17 = vpop.f32.mrb[120].mxu1 }
 0x375   :  { %14544 = vst [vmem:[#allocation12_spill] sm:$0xff] %v13588_v18  ;;  %6955 = vst.msk [vmem:[%s14202_s3 + $0x1b8] sm:$0xff] %vm6500_vm4, %v13588_v18  ;;  %v6607_v19 = vadd.f32 %v6606_v30, %v6605_v4  ;;  %v13633_v26 = vpop.f32.mrb[121].mxu1  ;;  %v6610_v22 = vsel %vm6500_vm4, %v13588_v18, 0.0 }
 0x376   :  { %14546 = vst [vmem:[#allocation83_spill] sm:$0xff] %v13602_v10  ;;  %v6608_v31 = vsel %vm6500_vm4, %v13602_v10, 0.0  ;;  %6954 = vst.msk [vmem:[%s14202_s3 + $0x1b0] sm:$0xff] %vm6500_vm4, %v13602_v10  ;;  %v10030_v25 = vpop.f32.mrb[56].mxu0  ;;  %v7463_v30 = vadd.f32 %v7462_v27, %v7461_v33  ;;  %v7466_v10 = vsel %vm6500_vm4, %v13623_v17, 0.0 }
 0x377   :  { %14547 = vst [vmem:[#allocation84_spill] sm:$0xff] %v13623_v17  ;;  %v6609_v8 = vadd.f32 %v6608_v31, %v6607_v19  ;;  %v13626_v24 = vadd.f32 %v10030_v25, %v14548_v11  ;;  %7807 = vst.msk [vmem:[%s14204_s5 + $0x1c8] sm:$0xff] %vm6500_vm4, %v13623_v17  ;;  %v6397_v4 = vpop.f32.mrb[57].mxu0  ;;  %v14551_v19 = vld [vmem:[#allocation14_spill] sm:$0xff]  ;;  %v7464_v11 = vsel %vm6500_vm4, %v13633_v26, 0.0 }
 0x378   :  { %14550 = vst [vmem:[#allocation85_spill] sm:$0xff] %v13633_v26  ;;  %v13640_v31 = vadd.f32 %v6397_v4, %v14551_v19  ;;  %7806 = vst.msk [vmem:[%s14204_s5 + $0x1c0] sm:$0xff] %vm6500_vm4, %v13633_v26  ;;  %v7465_v33 = vadd.f32 %v7464_v11, %v7463_v30  ;;  %v13661_v19 = vpop.f32.mrb[122].mxu1  ;;  %v14554_v26 = vld [vmem:[#allocation19_spill] sm:$0xff] }
 0x379   :  { %14549 = vst [vmem:[#allocation13_spill] sm:$0xff] %v13626_v24  ;;  %6957 = vst.msk [vmem:[%s14202_s3 + $0x1c8] sm:$0xff] %vm6500_vm4, %v13626_v24  ;;  %v6611_v27 = vadd.f32 %v6610_v22, %v6609_v8  ;;  %v13671_v30 = vpop.f32.mrb[123].mxu1  ;;  %v6614_v11 = vsel %vm6500_vm4, %v13626_v24, 0.0 }
 0x37a   :  { %14552 = vst [vmem:[#allocation14_spill] sm:$0xff] %v13640_v31  ;;  %v6612_v25 = vsel %vm6500_vm4, %v13640_v31, 0.0  ;;  %6956 = vst.msk [vmem:[%s14202_s3 + $0x1c0] sm:$0xff] %vm6500_vm4, %v13640_v31  ;;  %v10033_v4 = vpop.f32.mrb[58].mxu0  ;;  %v7467_v22 = vadd.f32 %v7466_v10, %v7465_v33  ;;  %v7470_v31 = vsel %vm6500_vm4, %v13661_v19, 0.0 }
 0x37b   :  { %14553 = vst [vmem:[#allocation86_spill] sm:$0xff] %v13661_v19  ;;  %v6613_v17 = vadd.f32 %v6612_v25, %v6611_v27  ;;  %v13664_v18 = vadd.f32 %v10033_v4, %v14554_v26  ;;  %7809 = vst.msk [vmem:[%s14204_s5 + $0x1d8] sm:$0xff] %vm6500_vm4, %v13661_v19  ;;  %v6407_v8 = vpop.f32.mrb[59].mxu0  ;;  %v14557_v27 = vld [vmem:[#allocation21_spill] sm:$0xff]  ;;  %v7468_v26 = vsel %vm6500_vm4, %v13671_v30, 0.0 }
 0x37c   :  { %14556 = vst [vmem:[#allocation87_spill] sm:$0xff] %v13671_v30  ;;  %v13678_v25 = vadd.f32 %v6407_v8, %v14557_v27  ;;  %7808 = vst.msk [vmem:[%s14204_s5 + $0x1d0] sm:$0xff] %vm6500_vm4, %v13671_v30  ;;  %v7469_v33 = vadd.f32 %v7468_v26, %v7467_v22  ;;  %v13699_v27 = vpop.f32.mrb[124].mxu1  ;;  %v14560_v30 = vld [vmem:[#allocation15_spill] sm:$0xff] }
 0x37d   :  { %14555 = vst [vmem:[#allocation19_spill] sm:$0xff] %v13664_v18  ;;  %6959 = vst.msk [vmem:[%s14202_s3 + $0x1d8] sm:$0xff] %vm6500_vm4, %v13664_v18  ;;  %v6615_v10 = vadd.f32 %v6614_v11, %v6613_v17  ;;  %v13709_v22 = vpop.f32.mrb[125].mxu1  ;;  %v6618_v26 = vsel %vm6500_vm4, %v13664_v18, 0.0 }
 0x37e   :  { %14558 = vst [vmem:[#allocation21_spill] sm:$0xff] %v13678_v25  ;;  %v6616_v4 = vsel %vm6500_vm4, %v13678_v25, 0.0  ;;  %6958 = vst.msk [vmem:[%s14202_s3 + $0x1d0] sm:$0xff] %vm6500_vm4, %v13678_v25  ;;  %v10036_v8 = vpop.f32.mrb[60].mxu0  ;;  %v7471_v11 = vadd.f32 %v7470_v31, %v7469_v33  ;;  %v7474_v25 = vsel %vm6500_vm4, %v13699_v27, 0.0 }
 0x37f   :  { %14559 = vst [vmem:[#allocation88_spill] sm:$0xff] %v13699_v27  ;;  %v6617_v19 = vadd.f32 %v6616_v4, %v6615_v10  ;;  %v13702_v24 = vadd.f32 %v10036_v8, %v14560_v30  ;;  %7811 = vst.msk [vmem:[%s14204_s5 + $0x1e8] sm:$0xff] %vm6500_vm4, %v13699_v27  ;;  %v6417_v17 = vpop.f32.mrb[61].mxu0  ;;  %v14563_v10 = vld [vmem:[#allocation23_spill] sm:$0xff]  ;;  %v7472_v30 = vsel %vm6500_vm4, %v13709_v22, 0.0 }
 0x380   :  { %14562 = vst [vmem:[#allocation89_spill] sm:$0xff] %v13709_v22  ;;  %v13716_v4 = vadd.f32 %v6417_v17, %v14563_v10  ;;  %7810 = vst.msk [vmem:[%s14204_s5 + $0x1e0] sm:$0xff] %vm6500_vm4, %v13709_v22  ;;  %v7473_v33 = vadd.f32 %v7472_v30, %v7471_v11  ;;  %v13737_v10 = vpop.f32.mrb[126].mxu1  ;;  %v14566_v22 = vld [vmem:[#allocation16_spill] sm:$0xff] }
 0x381   :  { %14561 = vst [vmem:[#allocation15_spill] sm:$0xff] %v13702_v24  ;;  %6961 = vst.msk [vmem:[%s14202_s3 + $0x1e8] sm:$0xff] %vm6500_vm4, %v13702_v24  ;;  %v6619_v31 = vadd.f32 %v6618_v26, %v6617_v19  ;;  %v13747_v11 = vpop.f32.mrb[127].mxu1  ;;  %v6622_v30 = vsel %vm6500_vm4, %v13702_v24, 0.0 }
 0x382   :  { %14564 = vst [vmem:[#allocation23_spill] sm:$0xff] %v13716_v4  ;;  %v6620_v8 = vsel %vm6500_vm4, %v13716_v4, 0.0  ;;  %6960 = vst.msk [vmem:[%s14202_s3 + $0x1e0] sm:$0xff] %vm6500_vm4, %v13716_v4  ;;  %v10039_v17 = vpop.f32.mrb[62].mxu0  ;;  %v7475_v26 = vadd.f32 %v7474_v25, %v7473_v33  ;;  %v7478_v4 = vsel %vm6500_vm4, %v13737_v10, 0.0 }
 0x383   :  { %14565 = vst [vmem:[#allocation90_spill] sm:$0xff] %v13737_v10  ;;  %v6621_v27 = vadd.f32 %v6620_v8, %v6619_v31  ;;  %v13740_v18 = vadd.f32 %v10039_v17, %v14566_v22  ;;  %7813 = vst.msk [vmem:[%s14204_s5 + $0x1f8] sm:$0xff] %vm6500_vm4, %v13737_v10  ;;  %v6427_v19 = vpop.f32.mrb[63].mxu0  ;;  %v14568_v31 = vld [vmem:[#allocation25_spill] sm:$0xff]  ;;  %v7476_v22 = vsel %vm6500_vm4, %v13747_v11, 0.0 }
 0x384   :  { %14567 = vst [vmem:[#allocation16_spill] sm:$0xff] %v13747_v11  ;;  %v13754_v8 = vadd.f32 %v6427_v19, %v14568_v31  ;;  %7812 = vst.msk [vmem:[%s14204_s5 + $0x1f0] sm:$0xff] %vm6500_vm4, %v13747_v11  ;;  %v7477_v33 = vadd.f32 %v7476_v22, %v7475_v26 }
 0x385   :  { %6963 = vst.msk [vmem:[%s14202_s3 + $0x1f8] sm:$0xff] %vm6500_vm4, %v13740_v18  ;;  %v6623_v25 = vadd.f32 %v6622_v30, %v6621_v27  ;;  %v6626_v10 = vsel %vm6500_vm4, %v13740_v18, 0.0 }
 0x386   :  { %14569 = vst [vmem:[#allocation25_spill] sm:$0xff] %v13754_v8  ;;  %v6624_v17 = vsel %vm6500_vm4, %v13754_v8, 0.0  ;;  %6962 = vst.msk [vmem:[%s14202_s3 + $0x1f0] sm:$0xff] %vm6500_vm4, %v13754_v8  ;;  %v13775_v31 = vadd.f32 %v7478_v4, %v7477_v33  ;;  %v14571_v8 = vld [vmem:[#allocation27_spill] sm:$0xff]  ;;  %v14572_v4 = vld [vmem:[#allocation22_spill] sm:$0xff]  ;;  %s10766_s3 = smov [#allocation3]  }
 0x387   :  { %v6625_v19 = vadd.f32 %v6624_v17, %v6623_v25  ;;  %s7822_s5 = sshll.u32 %s10766_s3, 4  ;;  %s7823_s5 = int_to_ptr.vmem [resolvable:$true] %s7822_s5 }
 0x388   :  { %s10717_s11 = scalar_lea.vmem %s7823_s5, 32  ;;  %p10722_p1 = scmp.lt.s32.totalorder %s7823_s5, %s7823_s5 }
 0x389   :  { %v6627_v11 = vadd.f32 %v6626_v10, %v6625_v19  ;;  %p10718_p0 = scmp.ne.s32.totalorder %s7823_s5, %s10717_s11  ;;  %p10723_p2 = scmp.lt.s32.totalorder %s10717_s11, %s10717_s11 }
 0x38b   :  { %v6628_v24 = vrot.slane %v6627_v11, 4  ;;  %p10724_p3 = por %p10723_p2, %p10722_p1 }
 0x38d   :  { %v6629_v20 = vadd.f32 %v6628_v24, %v6627_v11  ;;  %p10725_p4 = pnand %p10724_p3, %p10718_p0 }
 0x38f   :  { %v6630_v27 = vrot.slane %v6629_v20, 2 }
 0x391   :  { %v6631_v26 = vadd.f32 %v6630_v27, %v6629_v20 }
 0x393   :  { %v6632_v30 = vrot.slane %v6631_v26, 1 }
 0x395   :  { %v6633_v22 = vadd.f32 %v6632_v30, %v6631_v26 }
 0x397   :  { %v13779_v3 = vmul.f32 0.001953125, %v6633_v22 }
 0x399   :  { %v6635_v0 = vsub.f32 %v14570_v13, %v13779_v3  ;;  %v6636_v25 = vsub.f32 %v14571_v8, %v13779_v3  ;;  %v6637_v33 = vsub.f32 %v14572_v4, %v13779_v3  ;;  %v6638_v10 = vsub.f32 %v12602_v38, %v13779_v3 }
 0x39a   :  { %v6639_v20 = vsub.f32 %v12652_v32, %v13779_v3  ;;  %v6640_v19 = vsub.f32 %v12638_v37, %v13779_v3  ;;  %v6641_v30 = vsub.f32 %v12690_v50, %v13779_v3  ;;  %v6642_v32 = vsub.f32 %v12676_v45, %v13779_v3 }
 0x39b   :  { %v6699_v17 = vmul.f32 %v6635_v0, %v6635_v0  ;;  %v6700_v24 = vmul.f32 %v6636_v25, %v6636_v25  ;;  %v6701_v11 = vmul.f32 %v6637_v33, %v6637_v33  ;;  %v6702_v27 = vmul.f32 %v6638_v10, %v6638_v10 }
 0x39c   :  { %v6703_v22 = vmul.f32 %v6639_v20, %v6639_v20  ;;  %v6704_v25 = vmul.f32 %v6640_v19, %v6640_v19  ;;  %v6643_v33 = vsub.f32 %v12728_v34, %v13779_v3  ;;  %v6705_v10 = vmul.f32 %v6641_v30, %v6641_v30 }
 0x39d   :  { %v6763_v13 = vsel %vm6500_vm4, %v6699_v17, 0.0  ;;  %v6764_v8 = vsel %vm6500_vm4, %v6700_v24, 0.0  ;;  %v6766_v38 = vsel %vm6500_vm4, %v6701_v11, 0.0  ;;  %v6768_v4 = vsel %vm6500_vm4, %v6702_v27, 0.0 }
 0x39e   :  { %v6765_v26 = vadd.f32 %v6764_v8, %v6763_v13  ;;  %v6770_v17 = vsel %vm6500_vm4, %v6703_v22, 0.0  ;;  %v6644_v50 = vsub.f32 %v12714_v6, %v13779_v3  ;;  %v6706_v20 = vmul.f32 %v6642_v32, %v6642_v32 }
 0x39f   :  { %v6772_v11 = vsel %vm6500_vm4, %v6704_v25, 0.0  ;;  %v6645_v45 = vsub.f32 %v12766_v44, %v13779_v3  ;;  %v6707_v19 = vmul.f32 %v6643_v33, %v6643_v33  ;;  %v6774_v27 = vsel %vm6500_vm4, %v6705_v10, 0.0 }
 0x3a0   :  { %v6767_v0 = vadd.f32 %v6766_v38, %v6765_v26  ;;  %v6646_v34 = vsub.f32 %v12752_v51, %v13779_v3  ;;  %v6708_v26 = vmul.f32 %v6644_v50, %v6644_v50  ;;  %v6776_v30 = vsel %vm6500_vm4, %v6706_v20, 0.0 }
 0x3a1   :  { %v6647_v6 = vsub.f32 %v12804_v36, %v13779_v3  ;;  %v6709_v38 = vmul.f32 %v6645_v45, %v6645_v45  ;;  %v6648_v44 = vsub.f32 %v12790_v57, %v13779_v3  ;;  %v6649_v33 = vsub.f32 %v12842_v41, %v13779_v3 }
 0x3a2   :  { %v6769_v37 = vadd.f32 %v6768_v4, %v6767_v0  ;;  %v6778_v0 = vsel %vm6500_vm4, %v6707_v19, 0.0  ;;  %v6710_v25 = vmul.f32 %v6646_v34, %v6646_v34  ;;  %v6780_v4 = vsel %vm6500_vm4, %v6708_v26, 0.0 }
 0x3a3   :  { %v6711_v10 = vmul.f32 %v6647_v6, %v6647_v6  ;;  %v6712_v50 = vmul.f32 %v6648_v44, %v6648_v44  ;;  %v6713_v45 = vmul.f32 %v6649_v33, %v6649_v33  ;;  %v6655_v44 = vsub.f32 %v12956_v7, %v13779_v3 }
 0x3a4   :  { %v6771_v24 = vadd.f32 %v6770_v17, %v6769_v37  ;;  %v7480_v37 = vrot.slane %v13775_v31, 4  ;;  %v6782_v17 = vsel %vm6500_vm4, %v6709_v38, 0.0  ;;  %v6784_v20 = vsel %vm6500_vm4, %v6710_v25, 0.0 }
 0x3a5   :  { %v6786_v19 = vsel %vm6500_vm4, %v6711_v10, 0.0  ;;  %v6788_v34 = vsel %vm6500_vm4, %v6712_v50, 0.0  ;;  %v6658_v7 = vsub.f32 %v12980_v29, %v13779_v3 }
 0x3a6   :  { %v6773_v13 = vadd.f32 %v6772_v11, %v6771_v24  ;;  %v6650_v24 = vsub.f32 %v12828_v63, %v13779_v3  ;;  %v7481_v57 = vadd.f32 %v7480_v37, %v13775_v31 }
 0x3a8   :  { %v6775_v8 = vadd.f32 %v6774_v27, %v6773_v13  ;;  %v6651_v13 = vsub.f32 %v12880_v56, %v13779_v3  ;;  %v6652_v27 = vsub.f32 %v12866_v9, %v13779_v3  ;;  %v7482_v63 = vrot.slane %v7481_v57, 2 }
 0x3a9   :  { %v6654_v56 = vsub.f32 %v12904_v15, %v13779_v3 }
 0x3aa   :  { %v6777_v22 = vadd.f32 %v6776_v30, %v6775_v8  ;;  %v6714_v8 = vmul.f32 %v6650_v24, %v6650_v24  ;;  %v6653_v30 = vsub.f32 %v12918_v62, %v13779_v3  ;;  %v6715_v31 = vmul.f32 %v6651_v13, %v6651_v13 }
 0x3ab   :  { %v6716_v38 = vmul.f32 %v6652_v27, %v6652_v27  ;;  %v6656_v62 = vsub.f32 %v12942_v23, %v13779_v3  ;;  %v6659_v13 = vsub.f32 %v13032_v2, %v13779_v3  ;;  %v6722_v27 = vmul.f32 %v6658_v7, %v6658_v7 }
 0x3ac   :  { %v6779_v32 = vadd.f32 %v6778_v0, %v6777_v22  ;;  %v6790_v22 = vsel %vm6500_vm4, %v6713_v45, 0.0  ;;  %v6792_v0 = vsel %vm6500_vm4, %v6714_v8, 0.0  ;;  %v6717_v25 = vmul.f32 %v6653_v30, %v6653_v30 }
 0x3ad   :  { %v6796_v33 = vsel %vm6500_vm4, %v6716_v38, 0.0 }
 0x3ae   :  { %v6781_v51 = vadd.f32 %v6780_v4, %v6779_v32  ;;  %v7483_v32 = vadd.f32 %v7482_v63, %v7481_v57  ;;  %v6794_v4 = vsel %vm6500_vm4, %v6715_v31, 0.0  ;;  %v6798_v24 = vsel %vm6500_vm4, %v6717_v25, 0.0 }
 0x3af   :  { %v6661_v63 = vsub.f32 %v13070_v28, %v13779_v3  ;;  %v6662_v31 = vsub.f32 %v13056_v21, %v13779_v3  ;;  %v6663_v28 = vsub.f32 %v13108_v12, %v13779_v3  ;;  %v6665_v12 = vsub.f32 %v13146_v35, %v13779_v3 }
 0x3b0   :  { %v6783_v36 = vadd.f32 %v6782_v17, %v6781_v51  ;;  %v6718_v51 = vmul.f32 %v6654_v56, %v6654_v56  ;;  %v7484_v10 = vrot.slane %v7483_v32, 1  ;;  %v6657_v17 = vsub.f32 %v12994_v14, %v13779_v3 }
 0x3b1   :  { %v6660_v14 = vsub.f32 %v13018_v16, %v13779_v3  ;;  %v14573_v16 = vld [vmem:[#allocation18_spill] sm:$0xff] }
 0x3b2   :  { %v6785_v11 = vadd.f32 %v6784_v20, %v6783_v36  ;;  %v6719_v36 = vmul.f32 %v6655_v44, %v6655_v44  ;;  %v6720_v20 = vmul.f32 %v6656_v62, %v6656_v62  ;;  %v6800_v57 = vsel %vm6500_vm4, %v6718_v51, 0.0 }
 0x3b3   :  { %v6721_v45 = vmul.f32 %v6657_v17, %v6657_v17  ;;  %v6726_v62 = vmul.f32 %v6662_v31, %v6662_v31 }
 0x3b4   :  { %v6787_v41 = vadd.f32 %v6786_v19, %v6785_v11  ;;  %v7485_v11 = vadd.f32 %v7484_v10, %v7483_v32  ;;  %v6802_v19 = vsel %vm6500_vm4, %v6719_v36, 0.0  ;;  %v6804_v8 = vsel %vm6500_vm4, %v6720_v20, 0.0  ;;  %v14577_v20 = vld [vmem:[#allocation24_spill] sm:$0xff] }
 0x3b5   :  { %v6806_v30 = vsel %vm6500_vm4, %v6721_v45, 0.0 }
 0x3b6   :  { %v6789_v26 = vadd.f32 %v6788_v34, %v6787_v41  ;;  %v13857_v34 = vmul.f32 0.001953125, %v7485_v11  ;;  %v6666_v11 = vsub.f32 %v13132_v43, %v13779_v3 }
 0x3b8   :  { %v6791_v6 = vadd.f32 %v6790_v22, %v6789_v26  ;;  %v6723_v26 = vmul.f32 %v6659_v13, %v6659_v13  ;;  %v6724_v22 = vmul.f32 %v6660_v14, %v6660_v14  ;;  %v7487_v56 = vsub.f32 %v14573_v16, %v13857_v34 }
 0x3b9   :  { %v6816_v13 = vsel %vm6500_vm4, %v6726_v62, 0.0  ;;  %v6730_v16 = vmul.f32 %v6666_v11, %v6666_v11 }
 0x3ba   :  { %v6793_v9 = vadd.f32 %v6792_v0, %v6791_v6  ;;  %v6808_v6 = vsel %vm6500_vm4, %v6722_v27, 0.0  ;;  %v14574_v0 = vld [vmem:[#allocation17_spill] sm:$0xff]  ;;  %v6810_v44 = vsel %vm6500_vm4, %v6723_v26, 0.0  ;;  %v6812_v51 = vsel %vm6500_vm4, %v6724_v22, 0.0 }
 0x3bb   :  { %v7488_v32 = vsub.f32 %v14574_v0, %v13857_v34 }
 0x3bc   :  { %v6795_v37 = vadd.f32 %v6794_v4, %v6793_v9  ;;  %v6725_v9 = vmul.f32 %v6661_v63, %v6661_v63  ;;  %v14575_v4 = vld [vmem:[#allocation31_spill] sm:$0xff] }
 0x3bd   :  { %v7489_v21 = vsub.f32 %v14575_v4, %v13857_v34  ;;  %v7552_v36 = vmul.f32 %v7488_v32, %v7488_v32 }
 0x3be   :  { %v6797_v15 = vadd.f32 %v6796_v33, %v6795_v37  ;;  %v6664_v37 = vsub.f32 %v13094_v40, %v13779_v3  ;;  %v7551_v33 = vmul.f32 %v7487_v56, %v7487_v56 }
 0x3bf   :  { %v7553_v40 = vmul.f32 %v7489_v21, %v7489_v21  ;;  %v7616_v27 = vsel %vm6500_vm4, %v7552_v36, 0.0 }
 0x3c0   :  { %v6799_v50 = vadd.f32 %v6798_v24, %v6797_v15  ;;  %v14576_v15 = vld [vmem:[#allocation20_spill] sm:$0xff]  ;;  %v6727_v24 = vmul.f32 %v6663_v28, %v6663_v28  ;;  %v7615_v45 = vsel %vm6500_vm4, %v7551_v33, 0.0 }
 0x3c1   :  { %v7490_v17 = vsub.f32 %v14576_v15, %v13857_v34  ;;  %v7617_v26 = vadd.f32 %v7616_v27, %v7615_v45  ;;  %v7618_v22 = vsel %vm6500_vm4, %v7553_v40, 0.0 }
 0x3c2   :  { %v6801_v23 = vadd.f32 %v6800_v57, %v6799_v50  ;;  %v6814_v50 = vsel %vm6500_vm4, %v6725_v9, 0.0  ;;  %v7491_v57 = vsub.f32 %v14577_v20, %v13857_v34  ;;  %v6818_v63 = vsel %vm6500_vm4, %v6727_v24, 0.0 }
 0x3c3   :  { %v7554_v14 = vmul.f32 %v7490_v17, %v7490_v17  ;;  %v6824_v17 = vsel %vm6500_vm4, %v6730_v16, 0.0  ;;  %v6671_v20 = vsub.f32 %v13260_v46, %v13779_v3  ;;  %v14584_v46 = vld [vmem:[#allocation39_spill] sm:$0xff] }
 0x3c4   :  { %v6803_v41 = vadd.f32 %v6802_v19, %v6801_v23  ;;  %v6728_v23 = vmul.f32 %v6664_v37, %v6664_v37  ;;  %v7555_v31 = vmul.f32 %v7491_v57, %v7491_v57 }
 0x3c5   :  { %v7620_v9 = vsel %vm6500_vm4, %v7554_v14, 0.0 }
 0x3c6   :  { %v6805_v29 = vadd.f32 %v6804_v8, %v6803_v41  ;;  %v14578_v41 = vld [vmem:[#allocation33_spill] sm:$0xff]  ;;  %v6667_v8 = vsub.f32 %v13184_v39, %v13779_v3  ;;  %v6820_v56 = vsel %vm6500_vm4, %v6728_v23, 0.0  ;;  %v14580_v39 = vld [vmem:[#allocation35_spill] sm:$0xff]  ;;  %v7622_v33 = vsel %vm6500_vm4, %v7555_v31, 0.0 }
 0x3c7   :  { %v7492_v35 = vsub.f32 %v14578_v41, %v13857_v34  ;;  %v7494_v32 = vsub.f32 %v14580_v39, %v13857_v34  ;;  %v6672_v41 = vsub.f32 %v13246_v53, %v13779_v3  ;;  %v14585_v53 = vld [vmem:[#allocation32_spill] sm:$0xff] }
 0x3c8   :  { %v6807_v2 = vadd.f32 %v6806_v30, %v6805_v29  ;;  %v6729_v29 = vmul.f32 %v6665_v12, %v6665_v12  ;;  %v14579_v30 = vld [vmem:[#allocation26_spill] sm:$0xff] }
 0x3c9   :  { %v7556_v28 = vmul.f32 %v7492_v35, %v7492_v35 }
 0x3ca   :  { %v6809_v38 = vadd.f32 %v6808_v6, %v6807_v2  ;;  %v7493_v2 = vsub.f32 %v14579_v30, %v13857_v34  ;;  %v6668_v6 = vsub.f32 %v13170_v47, %v13779_v3  ;;  %v6822_v4 = vsel %vm6500_vm4, %v6729_v29, 0.0  ;;  %v14581_v47 = vld [vmem:[#allocation28_spill] sm:$0xff] }
 0x3cb   :  { %v7495_v62 = vsub.f32 %v14581_v47, %v13857_v34  ;;  %v7498_v29 = vsub.f32 %v14584_v46, %v13857_v34  ;;  %v6735_v30 = vmul.f32 %v6671_v20, %v6671_v20  ;;  %v6677_v20 = vsub.f32 %v13374_v54, %v13779_v3  ;;  %v14590_v54 = vld [vmem:[#allocation45_spill] sm:$0xff] }
 0x3cc   :  { %v6811_v25 = vadd.f32 %v6810_v44, %v6809_v38  ;;  %v7619_v38 = vadd.f32 %v7618_v22, %v7617_v26  ;;  %v6669_v44 = vsub.f32 %v13222_v42, %v13779_v3  ;;  %v6732_v15 = vmul.f32 %v6668_v6, %v6668_v6  ;;  %v14582_v42 = vld [vmem:[#allocation37_spill] sm:$0xff] }
 0x3cd   :  { %v7496_v24 = vsub.f32 %v14582_v42, %v13857_v34  ;;  %v7559_v45 = vmul.f32 %v7495_v62, %v7495_v62  ;;  %v7499_v6 = vsub.f32 %v14585_v53, %v13857_v34 }
 0x3ce   :  { %v6813_v10 = vadd.f32 %v6812_v51, %v6811_v25  ;;  %v6731_v25 = vmul.f32 %v6667_v8, %v6667_v8  ;;  %v7621_v21 = vadd.f32 %v7620_v9, %v7619_v38  ;;  %v7557_v51 = vmul.f32 %v7493_v2, %v7493_v2 }
 0x3cf   :  { %v6733_v57 = vmul.f32 %v6669_v44, %v6669_v44  ;;  %v6828_v14 = vsel %vm6500_vm4, %v6732_v15, 0.0  ;;  %v6674_v38 = vsub.f32 %v13284_v55, %v13779_v3  ;;  %v7562_v44 = vmul.f32 %v7498_v29, %v7498_v29  ;;  %v14587_v55 = vld [vmem:[#allocation34_spill] sm:$0xff] }
 0x3d0   :  { %v6815_v7 = vadd.f32 %v6814_v50, %v6813_v10  ;;  %v6670_v10 = vsub.f32 %v13208_v49, %v13779_v3  ;;  %v7623_v36 = vadd.f32 %v7622_v33, %v7621_v21  ;;  %v7558_v50 = vmul.f32 %v7494_v32, %v7494_v32  ;;  %v14583_v49 = vld [vmem:[#allocation30_spill] sm:$0xff] }
 0x3d1   :  { %v6826_v40 = vsel %vm6500_vm4, %v6731_v25, 0.0  ;;  %v6830_v2 = vsel %vm6500_vm4, %v6733_v57, 0.0  ;;  %v7563_v33 = vmul.f32 %v7499_v6, %v7499_v6  ;;  %v6676_v15 = vsub.f32 %v13322_v59, %v13779_v3  ;;  %v14589_v59 = vld [vmem:[#allocation36_spill] sm:$0xff] }
 0x3d2   :  { %v6817_v19 = vadd.f32 %v6816_v13, %v6815_v7  ;;  %v7624_v7 = vsel %vm6500_vm4, %v7556_v28, 0.0  ;;  %v7497_v13 = vsub.f32 %v14583_v49, %v13857_v34  ;;  %v6734_v35 = vmul.f32 %v6670_v10, %v6670_v10 }
 0x3d3   :  { %v7625_v11 = vadd.f32 %v7624_v7, %v7623_v36  ;;  %v7628_v26 = vsel %vm6500_vm4, %v7558_v50, 0.0  ;;  %v7636_v7 = vsel %vm6500_vm4, %v7562_v44, 0.0  ;;  %v7503_v49 = vsub.f32 %v14589_v59, %v13857_v34 }
 0x3d4   :  { %v6819_v43 = vadd.f32 %v6818_v63, %v6817_v19  ;;  %v7626_v19 = vsel %vm6500_vm4, %v7557_v51, 0.0  ;;  %v7560_v63 = vmul.f32 %v7496_v24, %v7496_v24  ;;  %v7561_v16 = vmul.f32 %v7497_v13, %v7497_v13 }
 0x3d5   :  { %v7627_v27 = vadd.f32 %v7626_v19, %v7625_v11  ;;  %v6832_v39 = vsel %vm6500_vm4, %v6734_v35, 0.0  ;;  %v7501_v51 = vsub.f32 %v14587_v55, %v13857_v34  ;;  %v6678_v19 = vsub.f32 %v13360_v61, %v13779_v3  ;;  %v14591_v61 = vld [vmem:[#allocation38_spill] sm:$0xff] }
 0x3d6   :  { %v6821_v0 = vadd.f32 %v6820_v56, %v6819_v43  ;;  %v6673_v43 = vsub.f32 %v13298_v48, %v13779_v3  ;;  %v7630_v56 = vsel %vm6500_vm4, %v7559_v45, 0.0  ;;  %v14586_v48 = vld [vmem:[#allocation41_spill] sm:$0xff]  ;;  %v7632_v25 = vsel %vm6500_vm4, %v7560_v63, 0.0 }
 0x3d7   :  { %v7629_v31 = vadd.f32 %v7628_v26, %v7627_v27  ;;  %v7500_v9 = vsub.f32 %v14586_v48, %v13857_v34  ;;  %v7634_v10 = vsel %vm6500_vm4, %v7561_v16, 0.0  ;;  %v7565_v13 = vmul.f32 %v7501_v51, %v7501_v51 }
 0x3d8   :  { %v6823_v37 = vadd.f32 %v6822_v4, %v6821_v0  ;;  %v6736_v0 = vmul.f32 %v6672_v41, %v6672_v41  ;;  %v6675_v4 = vsub.f32 %v13336_v52, %v13779_v3  ;;  %v6737_v21 = vmul.f32 %v6673_v43, %v6673_v43  ;;  %v14588_v52 = vld [vmem:[#allocation43_spill] sm:$0xff] }
 0x3d9   :  { %v7631_v32 = vadd.f32 %v7630_v56, %v7629_v31  ;;  %v7502_v24 = vsub.f32 %v14588_v52, %v13857_v34  ;;  %v7564_v50 = vmul.f32 %v7500_v9, %v7500_v9  ;;  %v7638_v45 = vsel %vm6500_vm4, %v7563_v33, 0.0 }
 0x3da   :  { %v6825_v12 = vadd.f32 %v6824_v17, %v6823_v37  ;;  %v6834_v37 = vsel %vm6500_vm4, %v6735_v30, 0.0  ;;  %v6738_v17 = vmul.f32 %v6674_v38, %v6674_v38  ;;  %v6836_v36 = vsel %vm6500_vm4, %v6736_v0, 0.0 }
 0x3db   :  { %v7633_v47 = vadd.f32 %v7632_v25, %v7631_v32  ;;  %v6739_v57 = vmul.f32 %v6675_v4, %v6675_v4  ;;  %v6740_v41 = vmul.f32 %v6676_v15, %v6676_v15  ;;  %v7566_v46 = vmul.f32 %v7502_v24, %v7502_v24 }
 0x3dc   :  { %v6827_v23 = vadd.f32 %v6826_v40, %v6825_v12  ;;  %v6838_v40 = vsel %vm6500_vm4, %v6737_v21, 0.0  ;;  %v6840_v35 = vsel %vm6500_vm4, %v6738_v17, 0.0  ;;  %v7640_v29 = vsel %vm6500_vm4, %v7564_v50, 0.0 }
 0x3dd   :  { %v7635_v12 = vadd.f32 %v7634_v10, %v7633_v47  ;;  %v6679_v63 = vsub.f32 %v13412_v58, %v13779_v3  ;;  %v6741_v26 = vmul.f32 %v6677_v20, %v6677_v20  ;;  %v6842_v43 = vsel %vm6500_vm4, %v6739_v57, 0.0  ;;  %v14592_v58 = vld [vmem:[#allocation47_spill] sm:$0xff] }
 0x3de   :  { %v6829_v8 = vadd.f32 %v6828_v14, %v6827_v23  ;;  %v7505_v31 = vsub.f32 %v14591_v61, %v13857_v34  ;;  %v7642_v53 = vsel %vm6500_vm4, %v7565_v13, 0.0  ;;  %v6680_v6 = vsub.f32 %v13398_v1, %v13779_v3  ;;  %v14593_v1 = vld [vmem:[#allocation40_spill] sm:$0xff]  ;;  %v14601_v61 = vld [vmem:[#allocation75_spill] sm:$0xff] }
 0x3df   :  { %v7637_v11 = vadd.f32 %v7636_v7, %v7635_v12  ;;  %v6742_v16 = vmul.f32 %v6678_v19, %v6678_v19  ;;  %v6844_v56 = vsel %vm6500_vm4, %v6740_v41, 0.0  ;;  %v6681_v48 = vsub.f32 %v13450_v60, %v13779_v3  ;;  %v14594_v60 = vld [vmem:[#allocation49_spill] sm:$0xff]  ;;  %v14598_v19 = vld [vmem:[#allocation51_spill] sm:$0xff] }
 0x3e0   :  { %v6831_v22 = vadd.f32 %v6830_v2, %v6829_v8  ;;  %v7504_v8 = vsub.f32 %v14590_v54, %v13857_v34  ;;  %v6743_v9 = vmul.f32 %v6679_v63, %v6679_v63  ;;  %v6846_v44 = vsel %vm6500_vm4, %v6741_v26, 0.0  ;;  %v14595_v12 = vld [vmem:[#allocation73_spill] sm:$0xff]  ;;  %v14600_v26 = vld [vmem:[#allocation44_spill] sm:$0xff] }
 0x3e1   :  { %v7639_v14 = vadd.f32 %v7638_v45, %v7637_v11  ;;  %v7507_v21 = vsub.f32 %v14593_v1, %v13857_v34  ;;  %v6744_v55 = vmul.f32 %v6680_v6, %v6680_v6  ;;  %v6848_v51 = vsel %vm6500_vm4, %v6742_v16, 0.0  ;;  %v14597_v11 = vld [vmem:[#allocation71_spill] sm:$0xff] }
 0x3e2   :  { %v6833_v28 = vadd.f32 %v6832_v39, %v6831_v22  ;;  %v7567_v22 = vmul.f32 %v7503_v49, %v7503_v49  ;;  %v7506_v39 = vsub.f32 %v14592_v58, %v13857_v34  ;;  %v7568_v32 = vmul.f32 %v7504_v8, %v7504_v8 }
 0x3e3   :  { %v7641_v30 = vadd.f32 %v7640_v29, %v7639_v14  ;;  %v7508_v15 = vsub.f32 %v14594_v60, %v13857_v34  ;;  %v6745_v52 = vmul.f32 %v6681_v48, %v6681_v48  ;;  %v6850_v24 = vsel %vm6500_vm4, %v6743_v9, 0.0 }
 0x3e4   :  { %v6835_v62 = vadd.f32 %v6834_v37, %v6833_v28  ;;  %v7644_v28 = vsel %vm6500_vm4, %v7566_v46, 0.0  ;;  %v7569_v37 = vmul.f32 %v7505_v31, %v7505_v31  ;;  %v7646_v47 = vsel %vm6500_vm4, %v7567_v22, 0.0 }
 0x3e5   :  { %v7643_v38 = vadd.f32 %v7642_v53, %v7641_v30  ;;  %v7570_v17 = vmul.f32 %v7506_v39, %v7506_v39  ;;  %v7571_v57 = vmul.f32 %v7507_v21, %v7507_v21  ;;  %v6852_v49 = vsel %vm6500_vm4, %v6744_v55, 0.0  ;;  %v14603_v39 = vld [vmem:[#allocation11_spill] sm:$0xff] }
 0x3e6   :  { %v6837_v42 = vadd.f32 %v6836_v36, %v6835_v62  ;;  %v6682_v62 = vsub.f32 %v13436_v5, %v13779_v3  ;;  %v7648_v36 = vsel %vm6500_vm4, %v7568_v32, 0.0  ;;  %v14596_v5 = vld [vmem:[#allocation42_spill] sm:$0xff]  ;;  %v7510_v41 = vsub.f32 %v14598_v19, %v13857_v34 }
 0x3e7   :  { %v7645_v25 = vadd.f32 %v7644_v28, %v7643_v38  ;;  %v7509_v20 = vsub.f32 %v14596_v5, %v13857_v34  ;;  %v7652_v14 = vsel %vm6500_vm4, %v7570_v17, 0.0  ;;  %v6854_v46 = vsel %vm6500_vm4, %v6745_v52, 0.0 }
 0x3e8   :  { %v6839_v23 = vadd.f32 %v6838_v40, %v6837_v42  ;;  %v6683_v42 = vsub.f32 %v14595_v12, %v13779_v3  ;;  %v7650_v40 = vsel %vm6500_vm4, %v7569_v37, 0.0  ;;  %v6746_v59 = vmul.f32 %v6682_v62, %v6682_v62  ;;  %v14605_v37 = vld [vmem:[#allocation79_spill] sm:$0xff] }
 0x3e9   :  { %v7647_v33 = vadd.f32 %v7646_v47, %v7645_v25  ;;  %v7573_v30 = vmul.f32 %v7509_v20, %v7509_v20  ;;  %v6686_v31 = vsub.f32 %v14601_v61, %v13779_v3  ;;  %v6687_v32 = vsub.f32 %v14603_v39, %v13779_v3  ;;  %v14604_v25 = vld [vmem:[#allocation46_spill] sm:$0xff] }
 0x3ea   :  { %v6841_v27 = vadd.f32 %v6840_v35, %v6839_v23  ;;  %v6684_v23 = vsub.f32 %v14597_v11, %v13779_v3  ;;  %v7572_v35 = vmul.f32 %v7508_v15, %v7508_v15  ;;  %v6747_v8 = vmul.f32 %v6683_v42, %v6683_v42 }
 0x3eb   :  { %v7649_v50 = vadd.f32 %v7648_v36, %v7647_v33  ;;  %v6856_v53 = vsel %vm6500_vm4, %v6746_v59, 0.0  ;;  %v7658_v21 = vsel %vm6500_vm4, %v7573_v30, 0.0  ;;  %v6688_v47 = vsub.f32 %v14605_v37, %v13779_v3  ;;  %v14607_v36 = vld [vmem:[#allocation83_spill] sm:$0xff] }
 0x3ec   :  { %v6843_v2 = vadd.f32 %v6842_v43, %v6841_v27  ;;  %v14599_v27 = vld [vmem:[#allocation77_spill] sm:$0xff]  ;;  %v7511_v43 = vsub.f32 %v14600_v26, %v13857_v34  ;;  %v6748_v22 = vmul.f32 %v6684_v23, %v6684_v23  ;;  %v7656_v58 = vsel %vm6500_vm4, %v7572_v35, 0.0 }
 0x3ed   :  { %v7651_v13 = vadd.f32 %v7650_v40, %v7649_v50  ;;  %v6685_v54 = vsub.f32 %v14599_v27, %v13779_v3  ;;  %v6858_v48 = vsel %vm6500_vm4, %v6747_v8, 0.0  ;;  %v6750_v62 = vmul.f32 %v6686_v31, %v6686_v31  ;;  %v14609_v40 = vld [vmem:[#allocation12_spill] sm:$0xff] }
 0x3ee   :  { %v6845_v0 = vadd.f32 %v6844_v56, %v6843_v2  ;;  %v7654_v2 = vsel %vm6500_vm4, %v7571_v57, 0.0  ;;  %v14602_v56 = vld [vmem:[#allocation53_spill] sm:$0xff]  ;;  %v7575_v1 = vmul.f32 %v7511_v43, %v7511_v43  ;;  %v6860_v55 = vsel %vm6500_vm4, %v6748_v22, 0.0 }
 0x3ef   :  { %v7653_v29 = vadd.f32 %v7652_v14, %v7651_v13  ;;  %v7512_v38 = vsub.f32 %v14602_v56, %v13857_v34  ;;  %v6749_v28 = vmul.f32 %v6685_v54, %v6685_v54  ;;  %v6689_v12 = vsub.f32 %v14607_v36, %v13779_v3  ;;  %v14611_v14 = vld [vmem:[#allocation14_spill] sm:$0xff] }
 0x3f0   :  { %v6847_v4 = vadd.f32 %v6846_v44, %v6845_v0  ;;  %v7574_v0 = vmul.f32 %v7510_v41, %v7510_v41  ;;  %v6751_v42 = vmul.f32 %v6687_v32, %v6687_v32  ;;  %v7662_v57 = vsel %vm6500_vm4, %v7575_v1, 0.0 }
 0x3f1   :  { %v7655_v6 = vadd.f32 %v7654_v2, %v7653_v29  ;;  %v7576_v15 = vmul.f32 %v7512_v38, %v7512_v38  ;;  %v6862_v52 = vsel %vm6500_vm4, %v6749_v28, 0.0  ;;  %v6690_v11 = vsub.f32 %v14609_v40, %v13779_v3  ;;  %v14613_v2 = vld [vmem:[#allocation13_spill] sm:$0xff] }
 0x3f2   :  { %v6849_v10 = vadd.f32 %v6848_v51, %v6847_v4  ;;  %v7513_v4 = vsub.f32 %v14604_v25, %v13857_v34  ;;  %v7660_v17 = vsel %vm6500_vm4, %v7574_v0, 0.0  ;;  %v6752_v23 = vmul.f32 %v6688_v47, %v6688_v47 }
 0x3f3   :  { %v7657_v9 = vadd.f32 %v7656_v58, %v7655_v6  ;;  %v6864_v59 = vsel %vm6500_vm4, %v6750_v62, 0.0  ;;  %v7664_v35 = vsel %vm6500_vm4, %v7576_v15, 0.0  ;;  %v6691_v27 = vsub.f32 %v14611_v14, %v13779_v3  ;;  %v14615_v58 = vld [vmem:[#allocation21_spill] sm:$0xff] }
 0x3f4   :  { %v6851_v7 = vadd.f32 %v6850_v24, %v6849_v10  ;;  %v14606_v10 = vld [vmem:[#allocation55_spill] sm:$0xff]  ;;  %v7577_v20 = vmul.f32 %v7513_v4, %v7513_v4  ;;  %v6753_v54 = vmul.f32 %v6689_v12, %v6689_v12  ;;  %v6866_v8 = vsel %vm6500_vm4, %v6751_v42, 0.0 }
 0x3f5   :  { %v7659_v51 = vadd.f32 %v7658_v21, %v7657_v9  ;;  %v7514_v60 = vsub.f32 %v14606_v10, %v13857_v34  ;;  %v6692_v61 = vsub.f32 %v14613_v2, %v13779_v3  ;;  %v6754_v31 = vmul.f32 %v6690_v11, %v6690_v11  ;;  %v14617_v21 = vld [vmem:[#allocation19_spill] sm:$0xff] }
 0x3f6   :  { %v6853_v45 = vadd.f32 %v6852_v49, %v6851_v7  ;;  %v14608_v7 = vld [vmem:[#allocation48_spill] sm:$0xff]  ;;  %v7666_v30 = vsel %vm6500_vm4, %v7577_v20, 0.0  ;;  %v6868_v22 = vsel %vm6500_vm4, %v6752_v23, 0.0  ;;  %v6693_v39 = vsub.f32 %v14615_v58, %v13779_v3 }
 0x3f7   :  { %v7661_v24 = vadd.f32 %v7660_v17, %v7659_v51  ;;  %v7515_v5 = vsub.f32 %v14608_v7, %v13857_v34  ;;  %v7578_v41 = vmul.f32 %v7514_v60, %v7514_v60  ;;  %v6755_v32 = vmul.f32 %v6691_v27, %v6691_v27  ;;  %v14619_v17 = vld [vmem:[#allocation23_spill] sm:$0xff] }
 0x3f8   :  { %v6855_v63 = vadd.f32 %v6854_v46, %v6853_v45  ;;  %v14610_v45 = vld [vmem:[#allocation57_spill] sm:$0xff]  ;;  %v6870_v28 = vsel %vm6500_vm4, %v6753_v54, 0.0  ;;  %v6694_v37 = vsub.f32 %v14617_v21, %v13779_v3  ;;  %v6756_v47 = vmul.f32 %v6692_v61, %v6692_v61 }
 0x3f9   :  { %v7663_v49 = vadd.f32 %v7662_v57, %v7661_v24  ;;  %v7516_v19 = vsub.f32 %v14610_v45, %v13857_v34  ;;  %v7579_v43 = vmul.f32 %v7515_v5, %v7515_v5  ;;  %v7668_v0 = vsel %vm6500_vm4, %v7578_v41, 0.0  ;;  %v14621_v57 = vld [vmem:[#allocation15_spill] sm:$0xff] }
 0x3fa   :  { %v6857_v16 = vadd.f32 %v6856_v53, %v6855_v63  ;;  %v14612_v63 = vld [vmem:[#allocation50_spill] sm:$0xff]  ;;  %v6872_v62 = vsel %vm6500_vm4, %v6754_v31, 0.0  ;;  %v6695_v36 = vsub.f32 %v14619_v17, %v13779_v3  ;;  %v6757_v12 = vmul.f32 %v6693_v39, %v6693_v39 }
 0x3fb   :  { %v7665_v46 = vadd.f32 %v7664_v35, %v7663_v49  ;;  %v7517_v26 = vsub.f32 %v14612_v63, %v13857_v34  ;;  %v7580_v38 = vmul.f32 %v7516_v19, %v7516_v19  ;;  %v7670_v1 = vsel %vm6500_vm4, %v7579_v43, 0.0  ;;  %v14623_v35 = vld [vmem:[#allocation25_spill] sm:$0xff] }
 0x3fc   :  { %v6859_v44 = vadd.f32 %v6858_v48, %v6857_v16  ;;  %v14614_v16 = vld [vmem:[#allocation59_spill] sm:$0xff]  ;;  %v6874_v42 = vsel %vm6500_vm4, %v6755_v32, 0.0  ;;  %v6696_v40 = vsub.f32 %v14621_v57, %v13779_v3  ;;  %v6758_v11 = vmul.f32 %v6694_v37, %v6694_v37  ;;  %v14626_v32 = vld [vmem:[#allocation60_spill] sm:$0xff] }
 0x3fd   :  { %v7667_v53 = vadd.f32 %v7666_v30, %v7665_v46  ;;  %v7518_v56 = vsub.f32 %v14614_v16, %v13857_v34  ;;  %v7581_v4 = vmul.f32 %v7517_v26, %v7517_v26  ;;  %v7672_v15 = vsel %vm6500_vm4, %v7580_v38, 0.0 }
 0x3fe   :  { %v6861_v33 = vadd.f32 %v6860_v55, %v6859_v44  ;;  %v14616_v44 = vld [vmem:[#allocation52_spill] sm:$0xff]  ;;  %v6876_v23 = vsel %vm6500_vm4, %v6756_v47, 0.0  ;;  %v6697_v14 = vsub.f32 %v14623_v35, %v13779_v3  ;;  %v6759_v27 = vmul.f32 %v6695_v36, %v6695_v36  ;;  %v14632_v35 = vld [vmem:[#allocation9_spill] sm:$0xff] }
 0x3ff   :  { %v7669_v48 = vadd.f32 %v7668_v0, %v7667_v53  ;;  %v7519_v25 = vsub.f32 %v14616_v44, %v13857_v34  ;;  %v7582_v60 = vmul.f32 %v7518_v56, %v7518_v56  ;;  %v7674_v20 = vsel %vm6500_vm4, %v7581_v4, 0.0  ;;  %v14625_v53 = vld [vmem:[#allocation56_spill] sm:$0xff] }
 0x400   :  { %v6863_v50 = vadd.f32 %v6862_v52, %v6861_v33  ;;  %v14618_v33 = vld [vmem:[#allocation61_spill] sm:$0xff]  ;;  %v6878_v54 = vsel %vm6500_vm4, %v6757_v12, 0.0  ;;  %v6698_v30 = vsub.f32 %v13740_v18, %v13779_v3  ;;  %v6760_v2 = vmul.f32 %v6696_v40, %v6696_v40 }
 0x401   :  { %v7671_v55 = vadd.f32 %v7670_v1, %v7669_v48  ;;  %v7520_v10 = vsub.f32 %v14618_v33, %v13857_v34  ;;  %v7583_v5 = vmul.f32 %v7519_v25, %v7519_v25  ;;  %v7676_v41 = vsel %vm6500_vm4, %v7582_v60, 0.0  ;;  %v14627_v1 = vld [vmem:[#allocation58_spill] sm:$0xff]  ;;  %v14628_v33 = vld [vmem:[#allocation64_spill] sm:$0xff] }
 0x402   :  { %v6865_v13 = vadd.f32 %v6864_v59, %v6863_v50  ;;  %v14620_v50 = vld [vmem:[#allocation54_spill] sm:$0xff]  ;;  %v6880_v61 = vsel %vm6500_vm4, %v6758_v11, 0.0  ;;  %v6761_v38 = vmul.f32 %v6697_v14, %v6697_v14  ;;  %v6882_v0 = vsel %vm6500_vm4, %v6759_v27, 0.0 }
 0x403   :  { %v7673_v52 = vadd.f32 %v7672_v15, %v7671_v55  ;;  %v7521_v7 = vsub.f32 %v14620_v50, %v13857_v34  ;;  %v7584_v19 = vmul.f32 %v7520_v10, %v7520_v10  ;;  %v7678_v43 = vsel %vm6500_vm4, %v7583_v5, 0.0  ;;  %v14630_v5 = vld [vmem:[#allocation67_spill] sm:$0xff] }
 0x404   :  { %v6867_v29 = vadd.f32 %v6866_v8, %v6865_v13  ;;  %v14622_v13 = vld [vmem:[#allocation63_spill] sm:$0xff]  ;;  %v6884_v44 = vsel %vm6500_vm4, %v6760_v2, 0.0  ;;  %v7526_v21 = vsub.f32 %v14627_v1, %v13857_v34  ;;  %v7527_v10 = vsub.f32 %v14628_v33, %v13857_v34 }
 0x405   :  { %v7675_v59 = vadd.f32 %v7674_v20, %v7673_v52  ;;  %v7522_v45 = vsub.f32 %v14622_v13, %v13857_v34  ;;  %v7585_v26 = vmul.f32 %v7521_v7, %v7521_v7  ;;  %v7680_v56 = vsel %vm6500_vm4, %v7584_v19, 0.0 }
 0x406   :  { %v6869_v6 = vadd.f32 %v6868_v22, %v6867_v29  ;;  %v14624_v29 = vld [vmem:[#allocation66_spill] sm:$0xff]  ;;  %v7529_v20 = vsub.f32 %v14630_v5, %v13857_v34  ;;  %v7591_v57 = vmul.f32 %v7527_v10, %v7527_v10  ;;  %v7531_v14 = vsub.f32 %v14632_v35, %v13857_v34 }
 0x407   :  { %v7677_v8 = vadd.f32 %v7676_v41, %v7675_v59  ;;  %v7523_v63 = vsub.f32 %v14624_v29, %v13857_v34  ;;  %v7586_v16 = vmul.f32 %v7522_v45, %v7522_v45  ;;  %v7682_v48 = vsel %vm6500_vm4, %v7585_v26, 0.0  ;;  %v14631_v59 = vld [vmem:[#allocation65_spill] sm:$0xff]  ;;  %v14633_v29 = vld [vmem:[#allocation68_spill] sm:$0xff] }
 0x408   :  { %v6871_v9 = vadd.f32 %v6870_v28, %v6869_v6  ;;  %v7524_v6 = vsub.f32 %v14625_v53, %v13857_v34  ;;  %v7525_v28 = vsub.f32 %v14626_v32, %v13857_v34  ;;  %v7593_v27 = vmul.f32 %v7529_v20, %v7529_v20  ;;  %v14636_v32 = vld [vmem:[#allocation72_spill] sm:$0xff] }
 0x409   :  { %v7679_v31 = vadd.f32 %v7678_v43, %v7677_v8  ;;  %v7587_v18 = vmul.f32 %v7523_v63, %v7523_v63  ;;  %v7684_v47 = vsel %vm6500_vm4, %v7586_v16, 0.0  ;;  %v7532_v63 = vsub.f32 %v14633_v29, %v13857_v34 }
 0x40a   :  { %v6873_v51 = vadd.f32 %v6872_v62, %v6871_v9  ;;  %v6762_v9 = vmul.f32 %v6698_v30, %v6698_v30  ;;  %v7588_v37 = vmul.f32 %v7524_v6, %v7524_v6  ;;  %v6886_v62 = vsel %vm6500_vm4, %v6761_v38, 0.0 }
 0x40b   :  { %v7681_v58 = vadd.f32 %v7680_v56, %v7679_v31  ;;  %v7589_v60 = vmul.f32 %v7525_v28, %v7525_v28  ;;  %v7686_v15 = vsel %vm6500_vm4, %v7587_v18, 0.0  ;;  %v7698_v53 = vsel %vm6500_vm4, %v7593_v27, 0.0  ;;  %v14635_v56 = vld [vmem:[#allocation10_spill] sm:$0xff] }
 0x40c   :  { %v6875_v24 = vadd.f32 %v6874_v42, %v6873_v51  ;;  %v6888_v17 = vsel %vm6500_vm4, %v6762_v9, 0.0  ;;  %v14629_v42 = vld [vmem:[#allocation62_spill] sm:$0xff]  ;;  %v7688_v50 = vsel %vm6500_vm4, %v7588_v37, 0.0  ;;  %v7534_v38 = vsub.f32 %v14635_v56, %v13857_v34 }
 0x40d   :  { %v7683_v25 = vadd.f32 %v7682_v48, %v7681_v58  ;;  %v7528_v52 = vsub.f32 %v14629_v42, %v13857_v34  ;;  %v7690_v40 = vsel %vm6500_vm4, %v7589_v60, 0.0  ;;  %v7535_v28 = vsub.f32 %v14636_v32, %v13857_v34 }
 0x40e   :  { %v6877_v49 = vadd.f32 %v6876_v23, %v6875_v24  ;;  %v7590_v24 = vmul.f32 %v7526_v21, %v7526_v21  ;;  %v7598_v21 = vmul.f32 %v7534_v38, %v7534_v38 }
 0x40f   :  { %v7685_v55 = vadd.f32 %v7684_v47, %v7683_v25  ;;  %v7592_v13 = vmul.f32 %v7528_v52, %v7528_v52 }
 0x410   :  { %v6879_v46 = vadd.f32 %v6878_v54, %v6877_v49  ;;  %v7530_v49 = vsub.f32 %v14631_v59, %v13857_v34  ;;  %v7692_v45 = vsel %vm6500_vm4, %v7590_v24, 0.0  ;;  %v7694_v54 = vsel %vm6500_vm4, %v7591_v57, 0.0 }
 0x411   :  { %v7687_v36 = vadd.f32 %v7686_v15, %v7685_v55  ;;  %v7696_v43 = vsel %vm6500_vm4, %v7592_v13, 0.0 }
 0x412   :  { %v6881_v22 = vadd.f32 %v6880_v61, %v6879_v46  ;;  %v7594_v26 = vmul.f32 %v7530_v49, %v7530_v49  ;;  %v14634_v61 = vld [vmem:[#allocation69_spill] sm:$0xff] }
 0x413   :  { %v7689_v7 = vadd.f32 %v7688_v50, %v7687_v36  ;;  %v7533_v31 = vsub.f32 %v14634_v61, %v13857_v34 }
 0x414   :  { %v6883_v39 = vadd.f32 %v6882_v0, %v6881_v22  ;;  %v7595_v22 = vmul.f32 %v7531_v14, %v7531_v14  ;;  %v7596_v0 = vmul.f32 %v7532_v63, %v7532_v63  ;;  %v7700_v58 = vsel %vm6500_vm4, %v7594_v26, 0.0 }
 0x415   :  { %v7691_v23 = vadd.f32 %v7690_v40, %v7689_v7  ;;  %v7597_v48 = vmul.f32 %v7533_v31, %v7533_v31 }
 0x416   :  { %v6885_v4 = vadd.f32 %v6884_v44, %v6883_v39  ;;  %v7702_v9 = vsel %vm6500_vm4, %v7595_v22, 0.0  ;;  %v7704_v37 = vsel %vm6500_vm4, %v7596_v0, 0.0 }
 0x417   :  { %v7693_v41 = vadd.f32 %v7692_v45, %v7691_v23 }
 0x418   :  { %v6887_v51 = vadd.f32 %v6886_v62, %v6885_v4  ;;  %v14637_v4 = vld [vmem:[#allocation70_spill] sm:$0xff] }
 0x419   :  { %v7695_v46 = vadd.f32 %v7694_v54, %v7693_v41  ;;  %v7536_v1 = vsub.f32 %v14637_v4, %v13857_v34 }
 0x41a   :  { %v6889_v12 = vadd.f32 %v6888_v17, %v6887_v51 }
 0x41b   :  { %v7697_v2 = vadd.f32 %v7696_v43, %v7695_v46 }
 0x41c   :  { %v6890_v11 = vrot.slane %v6889_v12, 4 }
 0x41d   :  { %v7699_v16 = vadd.f32 %v7698_v53, %v7697_v2 }
 0x41e   :  { %v6891_v19 = vadd.f32 %v6890_v11, %v6889_v12 }
 0x41f   :  { %v7701_v18 = vadd.f32 %v7700_v58, %v7699_v16 }
 0x420   :  { %v6892_v8 = vrot.slane %v6891_v19, 2 }
 0x421   :  { %v7703_v25 = vadd.f32 %v7702_v9, %v7701_v18 }
 0x422   :  { %v6893_v30 = vadd.f32 %v6892_v8, %v6891_v19 }
 0x424   :  { %v6894_v6 = vrot.slane %v6893_v30, 1 }
 0x426   :  { %v6895_v39 = vadd.f32 %v6894_v6, %v6893_v30 }
 0x428   :  { %v6897_v44 = vsel %vm6896_vm5, %v13779_v3, %v6895_v39 }
 0x429   :  { %6899 = vst.msk [vmem:[#allocation3] sm:$0x3] %vm6898_vm6, %v6897_v44 }
 0x42a   :  { %10728 = shalt.err (!%p10725_p4)
}
 0x42b   :  { %s10729_s14 = scalar_lea.hbm %s14203_s4, 32 }
 0x42c   :  { %p10730_p5 = scmp.ne.s32.totalorder %s14203_s4, %s10729_s14  ;;  %p10733_p6 = scmp.lt.u32.totalorder %s10729_s14, %s14203_s4 }
 0x42e   :  { %p10735_p7 = pnand %p10733_p6, %p10730_p5 }
 0x430   :  { %10738 = shalt.err (!%p10735_p7)
}
 0x431   :  { %7825 = dma.vmem_to_hbm [thread:$0]  %s7823_s5, 32, %s14203_s4, [#allocation4]   ;;  %v7705_v3 = vadd.f32 %v7704_v37, %v7703_v25  ;;  %v14638_v47 = vld [vmem:[#allocation76_spill] sm:$0xff]  ;;  %v7599_v55 = vmul.f32 %v7535_v28, %v7535_v28  ;;  %v7706_v51 = vsel %vm6500_vm4, %v7597_v48, 0.0  ;;  %v14639_v10 = vld [vmem:[#allocation74_spill] sm:$0xff]  ;;  %v7600_v15 = vmul.f32 %v7536_v1, %v7536_v1  ;;  %v14643_v45 = vld [vmem:[#allocation81_spill] sm:$0xff] }
 0x432   :  { %v7537_v62 = vsub.f32 %v14638_v47, %v13857_v34  ;;  %v7538_v60 = vsub.f32 %v14639_v10, %v13857_v34  ;;  %v7708_v17 = vsel %vm6500_vm4, %v7598_v21, 0.0  ;;  %v14640_v12 = vld [vmem:[#allocation80_spill] sm:$0xff]  ;;  %v14641_v7 = vld [vmem:[#allocation78_spill] sm:$0xff]  ;;  %v7542_v19 = vsub.f32 %v14643_v45, %v13857_v34  ;;  %v14644_v27 = vld [vmem:[#allocation85_spill] sm:$0xff]  ;;  %s10767_s4 = smov [#allocation5]  }
 0x433   :  { %v7707_v33 = vadd.f32 %v7706_v51, %v7705_v3  ;;  %v7539_v42 = vsub.f32 %v14640_v12, %v13857_v34  ;;  %v7710_v24 = vsel %vm6500_vm4, %v7599_v55, 0.0  ;;  %v7540_v5 = vsub.f32 %v14641_v7, %v13857_v34  ;;  %v14642_v11 = vld [vmem:[#allocation82_spill] sm:$0xff]  ;;  %v14645_v63 = vld [vmem:[#allocation84_spill] sm:$0xff]  ;;  %v14646_v61 = vld [vmem:[#allocation87_spill] sm:$0xff]  ;;  %s7834_s20 = sshll.u32 %s10767_s4, 4  ;;  %s7835_s20 = int_to_ptr.vmem [resolvable:$true] %s7834_s20 }
 0x434   :  { %v7601_v52 = vmul.f32 %v7537_v62, %v7537_v62  ;;  %v7602_v20 = vmul.f32 %v7538_v60, %v7538_v60  ;;  %v7712_v57 = vsel %vm6500_vm4, %v7600_v15, 0.0  ;;  %v7541_v23 = vsub.f32 %v14642_v11, %v13857_v34  ;;  %v14647_v16 = vld [vmem:[#allocation86_spill] sm:$0xff]  ;;  %v14648_v39 = vld [vmem:[#allocation89_spill] sm:$0xff]  ;;  %v14649_v9 = vld [vmem:[#allocation88_spill] sm:$0xff]  ;;  %s10739_s21 = scalar_lea.vmem %s7835_s20, 32  ;;  %p10744_p9 = scmp.lt.s32.totalorder %s7835_s20, %s7835_s20 }
 0x435   :  { %v7709_v36 = vadd.f32 %v7708_v17, %v7707_v33  ;;  %v7603_v59 = vmul.f32 %v7539_v42, %v7539_v42  ;;  %v7604_v41 = vmul.f32 %v7540_v5, %v7540_v5  ;;  %v7543_v54 = vsub.f32 %v14644_v27, %v13857_v34  ;;  %v14650_v21 = vld [vmem:[#allocation16_spill] sm:$0xff]  ;;  %v14651_v55 = vld [vmem:[#allocation90_spill] sm:$0xff]  ;;  %p10740_p8 = scmp.ne.s32.totalorder %s7835_s20, %s10739_s21  ;;  %p10745_p10 = scmp.lt.s32.totalorder %s10739_s21, %s10739_s21 }
 0x436   :  { %v7714_v49 = vsel %vm6500_vm4, %v7601_v52, 0.0  ;;  %v7716_v35 = vsel %vm6500_vm4, %v7602_v20, 0.0  ;;  %v7605_v8 = vmul.f32 %v7541_v23, %v7541_v23  ;;  %v7544_v26 = vsub.f32 %v14645_v63, %v13857_v34 }
 0x437   :  { %v7711_v50 = vadd.f32 %v7710_v24, %v7709_v36  ;;  %v7718_v46 = vsel %vm6500_vm4, %v7603_v59, 0.0  ;;  %v7606_v43 = vmul.f32 %v7542_v19, %v7542_v19  ;;  %v7720_v30 = vsel %vm6500_vm4, %v7604_v41, 0.0  ;;  %p10746_p11 = por %p10745_p10, %p10744_p9 }
 0x438   :  { %v7545_v31 = vsub.f32 %v14646_v61, %v13857_v34  ;;  %v7607_v22 = vmul.f32 %v7543_v54, %v7543_v54  ;;  %v7722_v53 = vsel %vm6500_vm4, %v7605_v8, 0.0  ;;  %v7546_v56 = vsub.f32 %v14647_v16, %v13857_v34 }
 0x439   :  { %v7713_v40 = vadd.f32 %v7712_v57, %v7711_v50  ;;  %v7608_v38 = vmul.f32 %v7544_v26, %v7544_v26  ;;  %v7724_v0 = vsel %vm6500_vm4, %v7606_v43, 0.0  ;;  %v7547_v32 = vsub.f32 %v14648_v39, %v13857_v34  ;;  %p10747_p12 = pnand %p10746_p11, %p10740_p8 }
 0x43a   :  { %v7609_v28 = vmul.f32 %v7545_v31, %v7545_v31  ;;  %v7726_v18 = vsel %vm6500_vm4, %v7607_v22, 0.0  ;;  %v7548_v44 = vsub.f32 %v14649_v9, %v13857_v34  ;;  %v7610_v25 = vmul.f32 %v7546_v56, %v7546_v56 }
 0x43b   :  { %v7715_v13 = vadd.f32 %v7714_v49, %v7713_v40  ;;  %v7728_v4 = vsel %vm6500_vm4, %v7608_v38, 0.0  ;;  %v7549_v37 = vsub.f32 %v14650_v21, %v13857_v34  ;;  %v7611_v3 = vmul.f32 %v7547_v32, %v7547_v32 }
 0x43c   :  { %v7730_v47 = vsel %vm6500_vm4, %v7609_v28, 0.0  ;;  %v7550_v51 = vsub.f32 %v14651_v55, %v13857_v34  ;;  %v7612_v33 = vmul.f32 %v7548_v44, %v7548_v44  ;;  %v7732_v10 = vsel %vm6500_vm4, %v7610_v25, 0.0 }
 0x43d   :  { %v7717_v14 = vadd.f32 %v7716_v35, %v7715_v13  ;;  %v7613_v15 = vmul.f32 %v7549_v37, %v7549_v37  ;;  %v7734_v17 = vsel %vm6500_vm4, %v7611_v3, 0.0 }
 0x43e   :  { %v7614_v12 = vmul.f32 %v7550_v51, %v7550_v51  ;;  %v7736_v42 = vsel %vm6500_vm4, %v7612_v33, 0.0 }
 0x43f   :  { %v7719_v29 = vadd.f32 %v7718_v46, %v7717_v14  ;;  %v7738_v24 = vsel %vm6500_vm4, %v7613_v15, 0.0 }
 0x440   :  { %v7740_v7 = vsel %vm6500_vm4, %v7614_v12, 0.0 }
 0x441   :  { %v7721_v2 = vadd.f32 %v7720_v30, %v7719_v29 }
 0x443   :  { %v7723_v6 = vadd.f32 %v7722_v53, %v7721_v2 }
 0x445   :  { %v7725_v58 = vadd.f32 %v7724_v0, %v7723_v6 }
 0x447   :  { %v7727_v48 = vadd.f32 %v7726_v18, %v7725_v58 }
 0x449   :  { %v7729_v1 = vadd.f32 %v7728_v4, %v7727_v48 }
 0x44b   :  { %v7731_v62 = vadd.f32 %v7730_v47, %v7729_v1 }
 0x44d   :  { %v7733_v60 = vadd.f32 %v7732_v10, %v7731_v62 }
 0x44f   :  { %v7735_v36 = vadd.f32 %v7734_v17, %v7733_v60 }
 0x451   :  { %v7737_v52 = vadd.f32 %v7736_v42, %v7735_v36 }
 0x453   :  { %v7739_v50 = vadd.f32 %v7738_v24, %v7737_v52 }
 0x455   :  { %v7741_v5 = vadd.f32 %v7740_v7, %v7739_v50 }
 0x457   :  { %v7742_v20 = vrot.slane %v7741_v5, 4 }
 0x459   :  { %v7743_v57 = vadd.f32 %v7742_v20, %v7741_v5 }
 0x45b   :  { %v7744_v40 = vrot.slane %v7743_v57, 2 }
 0x45d   :  { %v7745_v11 = vadd.f32 %v7744_v40, %v7743_v57 }
 0x45f   :  { %v7746_v23 = vrot.slane %v7745_v11, 1 }
 0x461   :  { %v7747_v59 = vadd.f32 %v7746_v23, %v7745_v11 }
 0x463   :  { %v7748_v49 = vsel %vm6896_vm5, %v13857_v34, %v7747_v59 }
 0x464   :  { %7749 = vst.msk [vmem:[#allocation5] sm:$0x3] %vm6898_vm6, %v7748_v49 }
 0x465   :  { %10750 = shalt.err (!%p10747_p12)
}
 0x466   :  { %s10751_s1 = scalar_lea.hbm %s14205_s6, 32 }
 0x467   :  { %p10752_p13 = scmp.ne.s32.totalorder %s14205_s6, %s10751_s1  ;;  %p10755_p0 = scmp.lt.u32.totalorder %s10751_s1, %s14205_s6 }
 0x469   :  { %p10757_p1 = pnand %p10755_p0, %p10752_p13 }
 0x46b   :  { %10760 = shalt.err (!%p10757_p1)
}
 0x46c   :  { %7837 = dma.vmem_to_hbm [thread:$0]  %s7835_s20, 32, %s14205_s6, [#allocation6]  }
 0x46d   :  { %10761 = dma.done.wait [#allocation4], 32  }
 0x46e   :  { %10762 = vsyncadd [#allocation4], 4294967264 }
 0x46f   :  { %10763 = dma.done.wait [#allocation6], 32  }
 0x470   :  { %10764 = vsyncadd [#allocation6], 4294967264 }
 0x471   :  { %7848 = vsyncpa [#allocation4], 1 }
 0x472   :  { %7849 = vsyncpa [#allocation6], 1 }

</bundles_post_ra>
